<compile_context>
chip_gen: v7x
topology: tpu7x:2x2x1
jax: 0.10.0
libtpu: 0.0.40
codegen_flags: <defaults>
</compile_context>

<pallas_src>
import functools

import jax
import jax.numpy as jnp
from jax import lax
from jax.experimental import pallas as pl
from jax.experimental.pallas import tpu as pltpu

# ----- script-level constants mirrored from the PyTorch file (deterministic) --
num_neuron = 128
num_S1 = 128
I_max = 100.0
Simulation_time = 50
TrickID = 0                       # use the Izhikevich-simulation branch

param_threshold = 30.0
param_a = 0.02
param_b = 0.2
param_c = -65.0
param_d = 8.0
param_mem = -65.0                 # reset membrane potential
param_u = param_b * param_c       # reset recovery variable
param_dt = 0.5

# pre-folded Euler-step constants (saves VALU ops inside the 50-step loop)
_K_V2 = 0.04 * param_dt                     # dt * 0.04
_K_V1 = 1.0 + 5.0 * param_dt                # 1 + dt*5
_K_U1 = 1.0 - param_dt * param_a            # 1 - dt*a
_DT_A_B = param_dt * param_a * param_b      # dt*a*b
_INV_T = 1.0 / float(Simulation_time)


def _ainet_kernel(fr_ref, w_ref, inp_ref, frn_ref, inpn_ref, *, C, unroll):
    """fr_ref:  VMEM (TB, n_conn, N)  per-instance firing rates (natural layout)
       w_ref:   VMEM (n_conn, N)      shared per-connection weights
       inp_ref: VMEM (TB, N)          per-instance input state
       frn_ref / inpn_ref: VMEM (TB, N) outputs (FR_n, input_n).
       C is closed over as a Python float (trace-time constant)."""
    n_conn = w_ref.shape[0]

    inp = inp_ref[...]                                 # (TB, N)

    # FR_W[b, n] = sum_c FR[b, c, n] * W[c, n]  — n_conn is tiny, static unroll.
    fr_w = fr_ref[:, 0, :] * w_ref[0:1, :]
    for c in range(1, n_conn):
        fr_w = fr_w + fr_ref[:, c, :] * w_ref[c:c + 1, :]

    sf = jnp.maximum(jnp.tanh(fr_w), 0.0)              # torch.where(sf < 0, 0, sf)

    input_n = jnp.maximum(inp - C * (inp - sf), 0.0)   # == relu(-C*(input - sf) + input)
    inpn_ref[...] = input_n

    input_r = jnp.round(input_n * I_max)               # injected current
    drive_dt = param_dt * (input_r + 140.0)            # dt*(I + 140), hoisted

    # IzhNodeMU: n_reset() then Simulation_time Euler steps, counting spikes.
    v0 = jnp.full_like(input_r, param_mem)
    u0 = jnp.full_like(input_r, param_u)
    s0 = jnp.zeros_like(input_r)

    def step(_, carry):
        v, u, s = carry
        # v += dt*(0.04 v^2 + 5 v + 140 - u + I)   (constants pre-folded)
        v = v * (_K_V2 * v + _K_V1) + (drive_dt - param_dt * u)
        # u += dt*a*(b*v_new - u)                  (constants pre-folded)
        u = _K_U1 * u + _DT_A_B * v
        spiked = v >= param_threshold               # boolean mask used directly
        v = jnp.where(spiked, param_c, v)
        u = jnp.where(spiked, u + param_d, u)
        return (v, u, s + spiked.astype(jnp.float32))

    _, _, spikes = lax.fori_loop(0, Simulation_time, step, (v0, u0, s0),
                                 unroll=unroll)
    frn_ref[...] = spikes * _INV_T


def _round_up(x, m):
    return ((x + m - 1) // m) * m


def _choose_batch_tile(B, batch_tile):
    """Pick the sublane batch tile TB.

    - multiple of 8 (sublane granularity), capped at min(batch_tile, 64) so the loop
      carry (v, u, s, drive ~ 4*(TB/8) vregs) + temps stays inside the 64-vreg file;
    - keep the grid at >= 2 steps whenever the batch allows it, so the "parallel"
      grid axis can be sharded across the 2 TensorCores on v7x (no-op on v5e/v6e)."""
    tb_cap = max(8, min(_round_up(batch_tile, 8), 64))
    b8 = _round_up(max(B, 1), 8)
    tb = min(tb_cap, b8)
    if b8 // tb < 2 and b8 >= 16:
        tb = max(8, _round_up(b8 // 2, 8))
    return tb


def ainet_forward_batched(inp, FR, weights, C, *, batch_tile=64):
    """Batched AINet forward over B independent instances.

    inp:     (B, N) f32
    FR:      (B, N) (1-D-FR case) or (B, n_conn, N) f32
    weights: (n_conn, N) f32 (shared "connection[i].weight" params)
    C:       python float
    Returns (FR_n, input_n), each (B, N)."""
    inp = jnp.asarray(inp, jnp.float32)
    B, N = inp.shape
    FR = jnp.asarray(FR, jnp.float32)
    if FR.ndim == 2:                                   # 1-D FR == single connection
        FR = FR[:, None, :]
    n_conn = FR.shape[1]
    weights = jnp.asarray(weights, jnp.float32)[:n_conn]
    assert weights.shape == (n_conn, N)
    C = float(C)

    TB = _choose_batch_tile(B, batch_tile)
    grid = (pl.cdiv(B, TB),)                           # partial tail handled by masking
    # Full unroll only pays when a grid step is a single dependent vreg chain (TB=8);
    # at larger TB the independent per-vreg chains already saturate the VALU slots.
    unroll = True if TB <= 8 else 2

    kernel = functools.partial(_ainet_kernel, C=C, unroll=unroll)

    frn, inpn = pl.pallas_call(
        kernel,
        out_shape=(
            jax.ShapeDtypeStruct((B, N), jnp.float32),   # FR_n
            jax.ShapeDtypeStruct((B, N), jnp.float32),   # input_n
        ),
        grid=grid,
        in_specs=[
            pl.BlockSpec((TB, n_conn, N), lambda b: (b, 0, 0)),   # FR, natural layout
            pl.BlockSpec((n_conn, N), lambda b: (0, 0)),          # weights (shared)
            pl.BlockSpec((TB, N), lambda b: (b, 0)),              # input state
        ],
        out_specs=(
            pl.BlockSpec((TB, N), lambda b: (b, 0)),
            pl.BlockSpec((TB, N), lambda b: (b, 0)),
        ),
        compiler_params=pltpu.CompilerParams(
            dimension_semantics=("parallel",)),                    # 2x on v7x megacore
    )(FR, weights, inp)

    return frn, inpn


def ainet_forward(inp, FR, weights, C):
    """Single-instance AINet.forward(input, FR, C) — matches the PyTorch module API.
    inp: (N,); FR: (N,) or (n_conn, N); weights: (n_conn, N); C: python float."""
    N = inp.shape[-1]
    if FR.ndim == 1:
        FR_b = FR.reshape(1, 1, N)
    else:
        FR_b = FR.reshape(1, FR.shape[0], N)
    frn, inpn = ainet_forward_batched(inp.reshape(1, N), FR_b, weights, C)
    return frn.reshape(N), inpn.reshape(N)


if __name__ == "__main__":
    key = jax.random.PRNGKey(0)
    k1, k2, k3, k4, k5 = jax.random.split(key, 5)

    B = 16                       # small batch of independent AINet instances
    n_conn = 4
    N = num_neuron               # 128

    # "connection[i].weight" parameters: deterministic init (shape (n_conn, N))
    weights = 0.1 * jax.random.normal(k1, (n_conn, N), dtype=jnp.float32)
    # firing-rate inputs (non-negative, like rates), per instance
    FR = jax.random.uniform(k2, (B, n_conn, N), dtype=jnp.float32)
    # current input state (non-negative), per instance
    inp = jax.random.uniform(k3, (B, N), dtype=jnp.float32)
    C = 0.3

    fr_n, input_n = ainet_forward_batched(inp, FR, weights, C)
    jax.block_until_ready((fr_n, input_n))
    assert fr_n.shape == (B, N) and input_n.shape == (B, N)
    assert bool(jnp.all(jnp.isfinite(fr_n))) and bool(jnp.all(jnp.isfinite(input_n)))

    # single-instance path (exact module API, partial-block tail) agrees with row 0
    fr1, in1 = ainet_forward(inp[0], FR[0], weights, C)
    jax.block_until_ready((fr1, in1))
    assert fr1.shape == (N,) and in1.shape == (N,)
    assert bool(jnp.allclose(fr1, fr_n[0])) and bool(jnp.allclose(in1, input_n[0]))

    # larger batch exercises the TB>8 / unroll=2 configuration; self-consistency
    # check against the TB=8 fully-unrolled configuration on identical inputs.
    B2 = 96
    FR2 = jax.random.uniform(k4, (B2, n_conn, N), dtype=jnp.float32)
    inp2 = jax.random.uniform(k5, (B2, N), dtype=jnp.float32)
    fr_a, in_a = ainet_forward_batched(inp2, FR2, weights, C)               # TB=48
    fr_b, in_b = ainet_forward_batched(inp2, FR2, weights, C, batch_tile=8)  # TB=8
    jax.block_until_ready((fr_a, in_a, fr_b, in_b))
    assert bool(jnp.allclose(fr_a, fr_b)) and bool(jnp.allclose(in_a, in_b))

    print("KERNEL_OK")
</pallas_src>

<mosaic_0001>
module attributes {stable_mosaic.version = 11 : i64} {
  func.func @_ainet_kernel(%arg0: i32, %arg1: memref<8x4x128xf32, #tpu.memory_space<vmem>>, %arg2: memref<4x128xf32, #tpu.memory_space<vmem>>, %arg3: memref<8x128xf32, #tpu.memory_space<vmem>>, %arg4: memref<8x128xf32, #tpu.memory_space<vmem>>, %arg5: memref<8x128xf32, #tpu.memory_space<vmem>>) attributes {dimension_semantics = [#tpu.dimension_semantics<parallel>], iteration_bounds = array<i64: 2>, scalar_prefetch = 0 : i64, scratch_operands = 0 : i64, tpu.core_type = #tpu.core_type<tc>, window_params = [{transform_indices = @transform_0, window_bounds = array<i64: 8, 4, 128>}, {pipeline_mode = #tpu.pipeline_mode<synchronous>, transform_indices = @transform_1, window_bounds = array<i64: 4, 128>}, {transform_indices = @transform_2, window_bounds = array<i64: 8, 128>}, {transform_indices = @transform_3, window_bounds = array<i64: 8, 128>}, {transform_indices = @transform_4, window_bounds = array<i64: 8, 128>}]} {
    %c0 = arith.constant 0 : index
    %c0_0 = arith.constant 0 : index
    %0 = vector.load %arg3[%c0, %c0_0] : memref<8x128xf32, #tpu.memory_space<vmem>>, vector<8x128xf32>
    %c0_1 = arith.constant 0 : index
    %c0_2 = arith.constant 0 : index
    %c0_3 = arith.constant 0 : index
    %1 = vector.load %arg1[%c0_1, %c0_2, %c0_3] : memref<8x4x128xf32, #tpu.memory_space<vmem>>, vector<8x1x128xf32>
    %2 = vector.shape_cast %1 : vector<8x1x128xf32> to vector<8x128xf32>
    %c0_4 = arith.constant 0 : index
    %c0_5 = arith.constant 0 : index
    %3 = vector.load %arg2[%c0_4, %c0_5] : memref<4x128xf32, #tpu.memory_space<vmem>>, vector<1x128xf32>
    %4 = vector.broadcast %3 : vector<1x128xf32> to vector<8x128xf32>
    %5 = arith.mulf %2, %4 : vector<8x128xf32>
    %c0_6 = arith.constant 0 : index
    %c1 = arith.constant 1 : index
    %c0_7 = arith.constant 0 : index
    %6 = vector.load %arg1[%c0_6, %c1, %c0_7] : memref<8x4x128xf32, #tpu.memory_space<vmem>>, vector<8x1x128xf32>
    %7 = vector.shape_cast %6 : vector<8x1x128xf32> to vector<8x128xf32>
    %c1_8 = arith.constant 1 : index
    %c0_9 = arith.constant 0 : index
    %8 = vector.load %arg2[%c1_8, %c0_9] : memref<4x128xf32, #tpu.memory_space<vmem>>, vector<1x128xf32>
    %9 = vector.broadcast %8 : vector<1x128xf32> to vector<8x128xf32>
    %10 = arith.mulf %7, %9 : vector<8x128xf32>
    %11 = arith.addf %5, %10 : vector<8x128xf32>
    %c0_10 = arith.constant 0 : index
    %c2 = arith.constant 2 : index
    %c0_11 = arith.constant 0 : index
    %12 = vector.load %arg1[%c0_10, %c2, %c0_11] : memref<8x4x128xf32, #tpu.memory_space<vmem>>, vector<8x1x128xf32>
    %13 = vector.shape_cast %12 : vector<8x1x128xf32> to vector<8x128xf32>
    %c2_12 = arith.constant 2 : index
    %c0_13 = arith.constant 0 : index
    %14 = vector.load %arg2[%c2_12, %c0_13] : memref<4x128xf32, #tpu.memory_space<vmem>>, vector<1x128xf32>
    %15 = vector.broadcast %14 : vector<1x128xf32> to vector<8x128xf32>
    %16 = arith.mulf %13, %15 : vector<8x128xf32>
    %17 = arith.addf %11, %16 : vector<8x128xf32>
    %c0_14 = arith.constant 0 : index
    %c3 = arith.constant 3 : index
    %c0_15 = arith.constant 0 : index
    %18 = vector.load %arg1[%c0_14, %c3, %c0_15] : memref<8x4x128xf32, #tpu.memory_space<vmem>>, vector<8x1x128xf32>
    %19 = vector.shape_cast %18 : vector<8x1x128xf32> to vector<8x128xf32>
    %c3_16 = arith.constant 3 : index
    %c0_17 = arith.constant 0 : index
    %20 = vector.load %arg2[%c3_16, %c0_17] : memref<4x128xf32, #tpu.memory_space<vmem>>, vector<1x128xf32>
    %21 = vector.broadcast %20 : vector<1x128xf32> to vector<8x128xf32>
    %22 = arith.mulf %19, %21 : vector<8x128xf32>
    %23 = arith.addf %17, %22 : vector<8x128xf32>
    %24 = math.tanh %23 : vector<8x128xf32>
    %cst = arith.constant 0.000000e+00 : f32
    %25 = vector.broadcast %cst : f32 to vector<8x128xf32>
    %26 = arith.maximumf %24, %25 : vector<8x128xf32>
    %27 = arith.subf %0, %26 : vector<8x128xf32>
    %cst_18 = arith.constant 3.000000e-01 : f32
    %28 = vector.broadcast %cst_18 : f32 to vector<8x128xf32>
    %29 = arith.mulf %28, %27 : vector<8x128xf32>
    %30 = arith.subf %0, %29 : vector<8x128xf32>
    %cst_19 = arith.constant 0.000000e+00 : f32
    %31 = vector.broadcast %cst_19 : f32 to vector<8x128xf32>
    %32 = arith.maximumf %30, %31 : vector<8x128xf32>
    %c0_20 = arith.constant 0 : index
    %c0_21 = arith.constant 0 : index
    %33 = vector.load %arg5[%c0_20, %c0_21] : memref<8x128xf32, #tpu.memory_space<vmem>>, vector<8x128xf32>
    tpu.vector_store %arg5[%c0_20, %c0_21], %32 {strides = array<i32>} : memref<8x128xf32, #tpu.memory_space<vmem>>, vector<8x128xf32>,
    %cst_22 = arith.constant 1.000000e+02 : f32
    %34 = vector.broadcast %cst_22 : f32 to vector<8x128xf32>
    %35 = arith.mulf %32, %34 : vector<8x128xf32>
    %36 = math.roundeven %35 : vector<8x128xf32>
    %cst_23 = arith.constant 1.400000e+02 : f32
    %37 = vector.broadcast %cst_23 : f32 to vector<8x128xf32>
    %38 = arith.addf %36, %37 : vector<8x128xf32>
    %cst_24 = arith.constant 5.000000e-01 : f32
    %39 = vector.broadcast %cst_24 : f32 to vector<8x128xf32>
    %40 = arith.mulf %39, %38 : vector<8x128xf32>
    %cst_25 = arith.constant -6.500000e+01 : f32
    %41 = vector.broadcast %cst_25 : f32 to vector<8x128xf32>
    %cst_26 = arith.constant -1.300000e+01 : f32
    %42 = vector.broadcast %cst_26 : f32 to vector<8x128xf32>
    %cst_27 = arith.constant 0.000000e+00 : f32
    %43 = vector.broadcast %cst_27 : f32 to vector<8x128xf32>
    %c0_i32 = arith.constant 0 : i32
    %cst_28 = arith.constant 2.000000e-02 : f32
    %44 = vector.broadcast %cst_28 : f32 to vector<8x128xf32>
    %45 = arith.mulf %44, %41 : vector<8x128xf32>
    %cst_29 = arith.constant 3.500000e+00 : f32
    %46 = vector.broadcast %cst_29 : f32 to vector<8x128xf32>
    %47 = arith.addf %45, %46 : vector<8x128xf32>
    %48 = arith.mulf %41, %47 : vector<8x128xf32>
    %cst_30 = arith.constant 5.000000e-01 : f32
    %49 = vector.broadcast %cst_30 : f32 to vector<8x128xf32>
    %50 = arith.mulf %49, %42 : vector<8x128xf32>
    %51 = arith.subf %40, %50 : vector<8x128xf32>
    %52 = arith.addf %48, %51 : vector<8x128xf32>
    %cst_31 = arith.constant 9.900000e-01 : f32
    %53 = vector.broadcast %cst_31 : f32 to vector<8x128xf32>
    %54 = arith.mulf %53, %42 : vector<8x128xf32>
    %cst_32 = arith.constant 2.000000e-03 : f32
    %55 = vector.broadcast %cst_32 : f32 to vector<8x128xf32>
    %56 = arith.mulf %55, %52 : vector<8x128xf32>
    %57 = arith.addf %54, %56 : vector<8x128xf32>
    %cst_33 = arith.constant 3.000000e+01 : f32
    %58 = vector.broadcast %cst_33 : f32 to vector<8x128xf32>
    %59 = arith.cmpf oge, %52, %58 : vector<8x128xf32>
    %cst_34 = arith.constant -6.500000e+01 : f32
    %60 = vector.broadcast %cst_34 : f32 to vector<8x128xf32>
    %61 = arith.select %59, %60, %52 : vector<8x128xi1>, vector<8x128xf32>
    %cst_35 = arith.constant 8.000000e+00 : f32
    %62 = vector.broadcast %cst_35 : f32 to vector<8x128xf32>
    %63 = arith.addf %57, %62 : vector<8x128xf32>
    %64 = arith.select %59, %63, %57 : vector<8x128xi1>, vector<8x128xf32>
    %65 = arith.extui %59 : vector<8x128xi1> to vector<8x128xi32>
    %66 = arith.sitofp %65 : vector<8x128xi32> to vector<8x128xf32>
    %67 = arith.addf %43, %66 : vector<8x128xf32>
    %c1_i32 = arith.constant 1 : i32
    %cst_36 = arith.constant 2.000000e-02 : f32
    %68 = vector.broadcast %cst_36 : f32 to vector<8x128xf32>
    %69 = arith.mulf %68, %61 : vector<8x128xf32>
    %cst_37 = arith.constant 3.500000e+00 : f32
    %70 = vector.broadcast %cst_37 : f32 to vector<8x128xf32>
    %71 = arith.addf %69, %70 : vector<8x128xf32>
    %72 = arith.mulf %61, %71 : vector<8x128xf32>
    %cst_38 = arith.constant 5.000000e-01 : f32
    %73 = vector.broadcast %cst_38 : f32 to vector<8x128xf32>
    %74 = arith.mulf %73, %64 : vector<8x128xf32>
    %75 = arith.subf %40, %74 : vector<8x128xf32>
    %76 = arith.addf %72, %75 : vector<8x128xf32>
    %cst_39 = arith.constant 9.900000e-01 : f32
    %77 = vector.broadcast %cst_39 : f32 to vector<8x128xf32>
    %78 = arith.mulf %77, %64 : vector<8x128xf32>
    %cst_40 = arith.constant 2.000000e-03 : f32
    %79 = vector.broadcast %cst_40 : f32 to vector<8x128xf32>
    %80 = arith.mulf %79, %76 : vector<8x128xf32>
    %81 = arith.addf %78, %80 : vector<8x128xf32>
    %cst_41 = arith.constant 3.000000e+01 : f32
    %82 = vector.broadcast %cst_41 : f32 to vector<8x128xf32>
    %83 = arith.cmpf oge, %76, %82 : vector<8x128xf32>
    %cst_42 = arith.constant -6.500000e+01 : f32
    %84 = vector.broadcast %cst_42 : f32 to vector<8x128xf32>
    %85 = arith.select %83, %84, %76 : vector<8x128xi1>, vector<8x128xf32>
    %cst_43 = arith.constant 8.000000e+00 : f32
    %86 = vector.broadcast %cst_43 : f32 to vector<8x128xf32>
    %87 = arith.addf %81, %86 : vector<8x128xf32>
    %88 = arith.select %83, %87, %81 : vector<8x128xi1>, vector<8x128xf32>
    %89 = arith.extui %83 : vector<8x128xi1> to vector<8x128xi32>
    %90 = arith.sitofp %89 : vector<8x128xi32> to vector<8x128xf32>
    %91 = arith.addf %67, %90 : vector<8x128xf32>
    %c2_i32 = arith.constant 2 : i32
    %cst_44 = arith.constant 2.000000e-02 : f32
    %92 = vector.broadcast %cst_44 : f32 to vector<8x128xf32>
    %93 = arith.mulf %92, %85 : vector<8x128xf32>
    %cst_45 = arith.constant 3.500000e+00 : f32
    %94 = vector.broadcast %cst_45 : f32 to vector<8x128xf32>
    %95 = arith.addf %93, %94 : vector<8x128xf32>
    %96 = arith.mulf %85, %95 : vector<8x128xf32>
    %cst_46 = arith.constant 5.000000e-01 : f32
    %97 = vector.broadcast %cst_46 : f32 to vector<8x128xf32>
    %98 = arith.mulf %97, %88 : vector<8x128xf32>
    %99 = arith.subf %40, %98 : vector<8x128xf32>
    %100 = arith.addf %96, %99 : vector<8x128xf32>
    %cst_47 = arith.constant 9.900000e-01 : f32
    %101 = vector.broadcast %cst_47 : f32 to vector<8x128xf32>
    %102 = arith.mulf %101, %88 : vector<8x128xf32>
    %cst_48 = arith.constant 2.000000e-03 : f32
    %103 = vector.broadcast %cst_48 : f32 to vector<8x128xf32>
    %104 = arith.mulf %103, %100 : vector<8x128xf32>
    %105 = arith.addf %102, %104 : vector<8x128xf32>
    %cst_49 = arith.constant 3.000000e+01 : f32
    %106 = vector.broadcast %cst_49 : f32 to vector<8x128xf32>
    %107 = arith.cmpf oge, %100, %106 : vector<8x128xf32>
    %cst_50 = arith.constant -6.500000e+01 : f32
    %108 = vector.broadcast %cst_50 : f32 to vector<8x128xf32>
    %109 = arith.select %107, %108, %100 : vector<8x128xi1>, vector<8x128xf32>
    %cst_51 = arith.constant 8.000000e+00 : f32
    %110 = vector.broadcast %cst_51 : f32 to vector<8x128xf32>
    %111 = arith.addf %105, %110 : vector<8x128xf32>
    %112 = arith.select %107, %111, %105 : vector<8x128xi1>, vector<8x128xf32>
    %113 = arith.extui %107 : vector<8x128xi1> to vector<8x128xi32>
    %114 = arith.sitofp %113 : vector<8x128xi32> to vector<8x128xf32>
    %115 = arith.addf %91, %114 : vector<8x128xf32>
    %c3_i32 = arith.constant 3 : i32
    %cst_52 = arith.constant 2.000000e-02 : f32
    %116 = vector.broadcast %cst_52 : f32 to vector<8x128xf32>
    %117 = arith.mulf %116, %109 : vector<8x128xf32>
    %cst_53 = arith.constant 3.500000e+00 : f32
    %118 = vector.broadcast %cst_53 : f32 to vector<8x128xf32>
    %119 = arith.addf %117, %118 : vector<8x128xf32>
    %120 = arith.mulf %109, %119 : vector<8x128xf32>
    %cst_54 = arith.constant 5.000000e-01 : f32
    %121 = vector.broadcast %cst_54 : f32 to vector<8x128xf32>
    %122 = arith.mulf %121, %112 : vector<8x128xf32>
    %123 = arith.subf %40, %122 : vector<8x128xf32>
    %124 = arith.addf %120, %123 : vector<8x128xf32>
    %cst_55 = arith.constant 9.900000e-01 : f32
    %125 = vector.broadcast %cst_55 : f32 to vector<8x128xf32>
    %126 = arith.mulf %125, %112 : vector<8x128xf32>
    %cst_56 = arith.constant 2.000000e-03 : f32
    %127 = vector.broadcast %cst_56 : f32 to vector<8x128xf32>
    %128 = arith.mulf %127, %124 : vector<8x128xf32>
    %129 = arith.addf %126, %128 : vector<8x128xf32>
    %cst_57 = arith.constant 3.000000e+01 : f32
    %130 = vector.broadcast %cst_57 : f32 to vector<8x128xf32>
    %131 = arith.cmpf oge, %124, %130 : vector<8x128xf32>
    %cst_58 = arith.constant -6.500000e+01 : f32
    %132 = vector.broadcast %cst_58 : f32 to vector<8x128xf32>
    %133 = arith.select %131, %132, %124 : vector<8x128xi1>, vector<8x128xf32>
    %cst_59 = arith.constant 8.000000e+00 : f32
    %134 = vector.broadcast %cst_59 : f32 to vector<8x128xf32>
    %135 = arith.addf %129, %134 : vector<8x128xf32>
    %136 = arith.select %131, %135, %129 : vector<8x128xi1>, vector<8x128xf32>
    %137 = arith.extui %131 : vector<8x128xi1> to vector<8x128xi32>
    %138 = arith.sitofp %137 : vector<8x128xi32> to vector<8x128xf32>
    %139 = arith.addf %115, %138 : vector<8x128xf32>
    %c4_i32 = arith.constant 4 : i32
    %cst_60 = arith.constant 2.000000e-02 : f32
    %140 = vector.broadcast %cst_60 : f32 to vector<8x128xf32>
    %141 = arith.mulf %140, %133 : vector<8x128xf32>
    %cst_61 = arith.constant 3.500000e+00 : f32
    %142 = vector.broadcast %cst_61 : f32 to vector<8x128xf32>
    %143 = arith.addf %141, %142 : vector<8x128xf32>
    %144 = arith.mulf %133, %143 : vector<8x128xf32>
    %cst_62 = arith.constant 5.000000e-01 : f32
    %145 = vector.broadcast %cst_62 : f32 to vector<8x128xf32>
    %146 = arith.mulf %145, %136 : vector<8x128xf32>
    %147 = arith.subf %40, %146 : vector<8x128xf32>
    %148 = arith.addf %144, %147 : vector<8x128xf32>
    %cst_63 = arith.constant 9.900000e-01 : f32
    %149 = vector.broadcast %cst_63 : f32 to vector<8x128xf32>
    %150 = arith.mulf %149, %136 : vector<8x128xf32>
    %cst_64 = arith.constant 2.000000e-03 : f32
    %151 = vector.broadcast %cst_64 : f32 to vector<8x128xf32>
    %152 = arith.mulf %151, %148 : vector<8x128xf32>
    %153 = arith.addf %150, %152 : vector<8x128xf32>
    %cst_65 = arith.constant 3.000000e+01 : f32
    %154 = vector.broadcast %cst_65 : f32 to vector<8x128xf32>
    %155 = arith.cmpf oge, %148, %154 : vector<8x128xf32>
    %cst_66 = arith.constant -6.500000e+01 : f32
    %156 = vector.broadcast %cst_66 : f32 to vector<8x128xf32>
    %157 = arith.select %155, %156, %148 : vector<8x128xi1>, vector<8x128xf32>
    %cst_67 = arith.constant 8.000000e+00 : f32
    %158 = vector.broadcast %cst_67 : f32 to vector<8x128xf32>
    %159 = arith.addf %153, %158 : vector<8x128xf32>
    %160 = arith.select %155, %159, %153 : vector<8x128xi1>, vector<8x128xf32>
    %161 = arith.extui %155 : vector<8x128xi1> to vector<8x128xi32>
    %162 = arith.sitofp %161 : vector<8x128xi32> to vector<8x128xf32>
    %163 = arith.addf %139, %162 : vector<8x128xf32>
    %c5_i32 = arith.constant 5 : i32
    %cst_68 = arith.constant 2.000000e-02 : f32
    %164 = vector.broadcast %cst_68 : f32 to vector<8x128xf32>
    %165 = arith.mulf %164, %157 : vector<8x128xf32>
    %cst_69 = arith.constant 3.500000e+00 : f32
    %166 = vector.broadcast %cst_69 : f32 to vector<8x128xf32>
    %167 = arith.addf %165, %166 : vector<8x128xf32>
    %168 = arith.mulf %157, %167 : vector<8x128xf32>
    %cst_70 = arith.constant 5.000000e-01 : f32
    %169 = vector.broadcast %cst_70 : f32 to vector<8x128xf32>
    %170 = arith.mulf %169, %160 : vector<8x128xf32>
    %171 = arith.subf %40, %170 : vector<8x128xf32>
    %172 = arith.addf %168, %171 : vector<8x128xf32>
    %cst_71 = arith.constant 9.900000e-01 : f32
    %173 = vector.broadcast %cst_71 : f32 to vector<8x128xf32>
    %174 = arith.mulf %173, %160 : vector<8x128xf32>
    %cst_72 = arith.constant 2.000000e-03 : f32
    %175 = vector.broadcast %cst_72 : f32 to vector<8x128xf32>
    %176 = arith.mulf %175, %172 : vector<8x128xf32>
    %177 = arith.addf %174, %176 : vector<8x128xf32>
    %cst_73 = arith.constant 3.000000e+01 : f32
    %178 = vector.broadcast %cst_73 : f32 to vector<8x128xf32>
    %179 = arith.cmpf oge, %172, %178 : vector<8x128xf32>
    %cst_74 = arith.constant -6.500000e+01 : f32
    %180 = vector.broadcast %cst_74 : f32 to vector<8x128xf32>
    %181 = arith.select %179, %180, %172 : vector<8x128xi1>, vector<8x128xf32>
    %cst_75 = arith.constant 8.000000e+00 : f32
    %182 = vector.broadcast %cst_75 : f32 to vector<8x128xf32>
    %183 = arith.addf %177, %182 : vector<8x128xf32>
    %184 = arith.select %179, %183, %177 : vector<8x128xi1>, vector<8x128xf32>
    %185 = arith.extui %179 : vector<8x128xi1> to vector<8x128xi32>
    %186 = arith.sitofp %185 : vector<8x128xi32> to vector<8x128xf32>
    %187 = arith.addf %163, %186 : vector<8x128xf32>
    %c6_i32 = arith.constant 6 : i32
    %cst_76 = arith.constant 2.000000e-02 : f32
    %188 = vector.broadcast %cst_76 : f32 to vector<8x128xf32>
    %189 = arith.mulf %188, %181 : vector<8x128xf32>
    %cst_77 = arith.constant 3.500000e+00 : f32
    %190 = vector.broadcast %cst_77 : f32 to vector<8x128xf32>
    %191 = arith.addf %189, %190 : vector<8x128xf32>
    %192 = arith.mulf %181, %191 : vector<8x128xf32>
    %cst_78 = arith.constant 5.000000e-01 : f32
    %193 = vector.broadcast %cst_78 : f32 to vector<8x128xf32>
    %194 = arith.mulf %193, %184 : vector<8x128xf32>
    %195 = arith.subf %40, %194 : vector<8x128xf32>
    %196 = arith.addf %192, %195 : vector<8x128xf32>
    %cst_79 = arith.constant 9.900000e-01 : f32
    %197 = vector.broadcast %cst_79 : f32 to vector<8x128xf32>
    %198 = arith.mulf %197, %184 : vector<8x128xf32>
    %cst_80 = arith.constant 2.000000e-03 : f32
    %199 = vector.broadcast %cst_80 : f32 to vector<8x128xf32>
    %200 = arith.mulf %199, %196 : vector<8x128xf32>
    %201 = arith.addf %198, %200 : vector<8x128xf32>
    %cst_81 = arith.constant 3.000000e+01 : f32
    %202 = vector.broadcast %cst_81 : f32 to vector<8x128xf32>
    %203 = arith.cmpf oge, %196, %202 : vector<8x128xf32>
    %cst_82 = arith.constant -6.500000e+01 : f32
    %204 = vector.broadcast %cst_82 : f32 to vector<8x128xf32>
    %205 = arith.select %203, %204, %196 : vector<8x128xi1>, vector<8x128xf32>
    %cst_83 = arith.constant 8.000000e+00 : f32
    %206 = vector.broadcast %cst_83 : f32 to vector<8x128xf32>
    %207 = arith.addf %201, %206 : vector<8x128xf32>
    %208 = arith.select %203, %207, %201 : vector<8x128xi1>, vector<8x128xf32>
    %209 = arith.extui %203 : vector<8x128xi1> to vector<8x128xi32>
    %210 = arith.sitofp %209 : vector<8x128xi32> to vector<8x128xf32>
    %211 = arith.addf %187, %210 : vector<8x128xf32>
    %c7_i32 = arith.constant 7 : i32
    %cst_84 = arith.constant 2.000000e-02 : f32
    %212 = vector.broadcast %cst_84 : f32 to vector<8x128xf32>
    %213 = arith.mulf %212, %205 : vector<8x128xf32>
    %cst_85 = arith.constant 3.500000e+00 : f32
    %214 = vector.broadcast %cst_85 : f32 to vector<8x128xf32>
    %215 = arith.addf %213, %214 : vector<8x128xf32>
    %216 = arith.mulf %205, %215 : vector<8x128xf32>
    %cst_86 = arith.constant 5.000000e-01 : f32
    %217 = vector.broadcast %cst_86 : f32 to vector<8x128xf32>
    %218 = arith.mulf %217, %208 : vector<8x128xf32>
    %219 = arith.subf %40, %218 : vector<8x128xf32>
    %220 = arith.addf %216, %219 : vector<8x128xf32>
    %cst_87 = arith.constant 9.900000e-01 : f32
    %221 = vector.broadcast %cst_87 : f32 to vector<8x128xf32>
    %222 = arith.mulf %221, %208 : vector<8x128xf32>
    %cst_88 = arith.constant 2.000000e-03 : f32
    %223 = vector.broadcast %cst_88 : f32 to vector<8x128xf32>
    %224 = arith.mulf %223, %220 : vector<8x128xf32>
    %225 = arith.addf %222, %224 : vector<8x128xf32>
    %cst_89 = arith.constant 3.000000e+01 : f32
    %226 = vector.broadcast %cst_89 : f32 to vector<8x128xf32>
    %227 = arith.cmpf oge, %220, %226 : vector<8x128xf32>
    %cst_90 = arith.constant -6.500000e+01 : f32
    %228 = vector.broadcast %cst_90 : f32 to vector<8x128xf32>
    %229 = arith.select %227, %228, %220 : vector<8x128xi1>, vector<8x128xf32>
    %cst_91 = arith.constant 8.000000e+00 : f32
    %230 = vector.broadcast %cst_91 : f32 to vector<8x128xf32>
    %231 = arith.addf %225, %230 : vector<8x128xf32>
    %232 = arith.select %227, %231, %225 : vector<8x128xi1>, vector<8x128xf32>
    %233 = arith.extui %227 : vector<8x128xi1> to vector<8x128xi32>
    %234 = arith.sitofp %233 : vector<8x128xi32> to vector<8x128xf32>
    %235 = arith.addf %211, %234 : vector<8x128xf32>
    %c8_i32 = arith.constant 8 : i32
    %cst_92 = arith.constant 2.000000e-02 : f32
    %236 = vector.broadcast %cst_92 : f32 to vector<8x128xf32>
    %237 = arith.mulf %236, %229 : vector<8x128xf32>
    %cst_93 = arith.constant 3.500000e+00 : f32
    %238 = vector.broadcast %cst_93 : f32 to vector<8x128xf32>
    %239 = arith.addf %237, %238 : vector<8x128xf32>
    %240 = arith.mulf %229, %239 : vector<8x128xf32>
    %cst_94 = arith.constant 5.000000e-01 : f32
    %241 = vector.broadcast %cst_94 : f32 to vector<8x128xf32>
    %242 = arith.mulf %241, %232 : vector<8x128xf32>
    %243 = arith.subf %40, %242 : vector<8x128xf32>
    %244 = arith.addf %240, %243 : vector<8x128xf32>
    %cst_95 = arith.constant 9.900000e-01 : f32
    %245 = vector.broadcast %cst_95 : f32 to vector<8x128xf32>
    %246 = arith.mulf %245, %232 : vector<8x128xf32>
    %cst_96 = arith.constant 2.000000e-03 : f32
    %247 = vector.broadcast %cst_96 : f32 to vector<8x128xf32>
    %248 = arith.mulf %247, %244 : vector<8x128xf32>
    %249 = arith.addf %246, %248 : vector<8x128xf32>
    %cst_97 = arith.constant 3.000000e+01 : f32
    %250 = vector.broadcast %cst_97 : f32 to vector<8x128xf32>
    %251 = arith.cmpf oge, %244, %250 : vector<8x128xf32>
    %cst_98 = arith.constant -6.500000e+01 : f32
    %252 = vector.broadcast %cst_98 : f32 to vector<8x128xf32>
    %253 = arith.select %251, %252, %244 : vector<8x128xi1>, vector<8x128xf32>
    %cst_99 = arith.constant 8.000000e+00 : f32
    %254 = vector.broadcast %cst_99 : f32 to vector<8x128xf32>
    %255 = arith.addf %249, %254 : vector<8x128xf32>
    %256 = arith.select %251, %255, %249 : vector<8x128xi1>, vector<8x128xf32>
    %257 = arith.extui %251 : vector<8x128xi1> to vector<8x128xi32>
    %258 = arith.sitofp %257 : vector<8x128xi32> to vector<8x128xf32>
    %259 = arith.addf %235, %258 : vector<8x128xf32>
    %c9_i32 = arith.constant 9 : i32
    %cst_100 = arith.constant 2.000000e-02 : f32
    %260 = vector.broadcast %cst_100 : f32 to vector<8x128xf32>
    %261 = arith.mulf %260, %253 : vector<8x128xf32>
    %cst_101 = arith.constant 3.500000e+00 : f32
    %262 = vector.broadcast %cst_101 : f32 to vector<8x128xf32>
    %263 = arith.addf %261, %262 : vector<8x128xf32>
    %264 = arith.mulf %253, %263 : vector<8x128xf32>
    %cst_102 = arith.constant 5.000000e-01 : f32
    %265 = vector.broadcast %cst_102 : f32 to vector<8x128xf32>
    %266 = arith.mulf %265, %256 : vector<8x128xf32>
    %267 = arith.subf %40, %266 : vector<8x128xf32>
    %268 = arith.addf %264, %267 : vector<8x128xf32>
    %cst_103 = arith.constant 9.900000e-01 : f32
    %269 = vector.broadcast %cst_103 : f32 to vector<8x128xf32>
    %270 = arith.mulf %269, %256 : vector<8x128xf32>
    %cst_104 = arith.constant 2.000000e-03 : f32
    %271 = vector.broadcast %cst_104 : f32 to vector<8x128xf32>
    %272 = arith.mulf %271, %268 : vector<8x128xf32>
    %273 = arith.addf %270, %272 : vector<8x128xf32>
    %cst_105 = arith.constant 3.000000e+01 : f32
    %274 = vector.broadcast %cst_105 : f32 to vector<8x128xf32>
    %275 = arith.cmpf oge, %268, %274 : vector<8x128xf32>
    %cst_106 = arith.constant -6.500000e+01 : f32
    %276 = vector.broadcast %cst_106 : f32 to vector<8x128xf32>
    %277 = arith.select %275, %276, %268 : vector<8x128xi1>, vector<8x128xf32>
    %cst_107 = arith.constant 8.000000e+00 : f32
    %278 = vector.broadcast %cst_107 : f32 to vector<8x128xf32>
    %279 = arith.addf %273, %278 : vector<8x128xf32>
    %280 = arith.select %275, %279, %273 : vector<8x128xi1>, vector<8x128xf32>
    %281 = arith.extui %275 : vector<8x128xi1> to vector<8x128xi32>
    %282 = arith.sitofp %281 : vector<8x128xi32> to vector<8x128xf32>
    %283 = arith.addf %259, %282 : vector<8x128xf32>
    %c10_i32 = arith.constant 10 : i32
    %cst_108 = arith.constant 2.000000e-02 : f32
    %284 = vector.broadcast %cst_108 : f32 to vector<8x128xf32>
    %285 = arith.mulf %284, %277 : vector<8x128xf32>
    %cst_109 = arith.constant 3.500000e+00 : f32
    %286 = vector.broadcast %cst_109 : f32 to vector<8x128xf32>
    %287 = arith.addf %285, %286 : vector<8x128xf32>
    %288 = arith.mulf %277, %287 : vector<8x128xf32>
    %cst_110 = arith.constant 5.000000e-01 : f32
    %289 = vector.broadcast %cst_110 : f32 to vector<8x128xf32>
    %290 = arith.mulf %289, %280 : vector<8x128xf32>
    %291 = arith.subf %40, %290 : vector<8x128xf32>
    %292 = arith.addf %288, %291 : vector<8x128xf32>
    %cst_111 = arith.constant 9.900000e-01 : f32
    %293 = vector.broadcast %cst_111 : f32 to vector<8x128xf32>
    %294 = arith.mulf %293, %280 : vector<8x128xf32>
    %cst_112 = arith.constant 2.000000e-03 : f32
    %295 = vector.broadcast %cst_112 : f32 to vector<8x128xf32>
    %296 = arith.mulf %295, %292 : vector<8x128xf32>
    %297 = arith.addf %294, %296 : vector<8x128xf32>
    %cst_113 = arith.constant 3.000000e+01 : f32
    %298 = vector.broadcast %cst_113 : f32 to vector<8x128xf32>
    %299 = arith.cmpf oge, %292, %298 : vector<8x128xf32>
    %cst_114 = arith.constant -6.500000e+01 : f32
    %300 = vector.broadcast %cst_114 : f32 to vector<8x128xf32>
    %301 = arith.select %299, %300, %292 : vector<8x128xi1>, vector<8x128xf32>
    %cst_115 = arith.constant 8.000000e+00 : f32
    %302 = vector.broadcast %cst_115 : f32 to vector<8x128xf32>
    %303 = arith.addf %297, %302 : vector<8x128xf32>
    %304 = arith.select %299, %303, %297 : vector<8x128xi1>, vector<8x128xf32>
    %305 = arith.extui %299 : vector<8x128xi1> to vector<8x128xi32>
    %306 = arith.sitofp %305 : vector<8x128xi32> to vector<8x128xf32>
    %307 = arith.addf %283, %306 : vector<8x128xf32>
    %c11_i32 = arith.constant 11 : i32
    %cst_116 = arith.constant 2.000000e-02 : f32
    %308 = vector.broadcast %cst_116 : f32 to vector<8x128xf32>
    %309 = arith.mulf %308, %301 : vector<8x128xf32>
    %cst_117 = arith.constant 3.500000e+00 : f32
    %310 = vector.broadcast %cst_117 : f32 to vector<8x128xf32>
    %311 = arith.addf %309, %310 : vector<8x128xf32>
    %312 = arith.mulf %301, %311 : vector<8x128xf32>
    %cst_118 = arith.constant 5.000000e-01 : f32
    %313 = vector.broadcast %cst_118 : f32 to vector<8x128xf32>
    %314 = arith.mulf %313, %304 : vector<8x128xf32>
    %315 = arith.subf %40, %314 : vector<8x128xf32>
    %316 = arith.addf %312, %315 : vector<8x128xf32>
    %cst_119 = arith.constant 9.900000e-01 : f32
    %317 = vector.broadcast %cst_119 : f32 to vector<8x128xf32>
    %318 = arith.mulf %317, %304 : vector<8x128xf32>
    %cst_120 = arith.constant 2.000000e-03 : f32
    %319 = vector.broadcast %cst_120 : f32 to vector<8x128xf32>
    %320 = arith.mulf %319, %316 : vector<8x128xf32>
    %321 = arith.addf %318, %320 : vector<8x128xf32>
    %cst_121 = arith.constant 3.000000e+01 : f32
    %322 = vector.broadcast %cst_121 : f32 to vector<8x128xf32>
    %323 = arith.cmpf oge, %316, %322 : vector<8x128xf32>
    %cst_122 = arith.constant -6.500000e+01 : f32
    %324 = vector.broadcast %cst_122 : f32 to vector<8x128xf32>
    %325 = arith.select %323, %324, %316 : vector<8x128xi1>, vector<8x128xf32>
    %cst_123 = arith.constant 8.000000e+00 : f32
    %326 = vector.broadcast %cst_123 : f32 to vector<8x128xf32>
    %327 = arith.addf %321, %326 : vector<8x128xf32>
    %328 = arith.select %323, %327, %321 : vector<8x128xi1>, vector<8x128xf32>
    %329 = arith.extui %323 : vector<8x128xi1> to vector<8x128xi32>
    %330 = arith.sitofp %329 : vector<8x128xi32> to vector<8x128xf32>
    %331 = arith.addf %307, %330 : vector<8x128xf32>
    %c12_i32 = arith.constant 12 : i32
    %cst_124 = arith.constant 2.000000e-02 : f32
    %332 = vector.broadcast %cst_124 : f32 to vector<8x128xf32>
    %333 = arith.mulf %332, %325 : vector<8x128xf32>
    %cst_125 = arith.constant 3.500000e+00 : f32
    %334 = vector.broadcast %cst_125 : f32 to vector<8x128xf32>
    %335 = arith.addf %333, %334 : vector<8x128xf32>
    %336 = arith.mulf %325, %335 : vector<8x128xf32>
    %cst_126 = arith.constant 5.000000e-01 : f32
    %337 = vector.broadcast %cst_126 : f32 to vector<8x128xf32>
    %338 = arith.mulf %337, %328 : vector<8x128xf32>
    %339 = arith.subf %40, %338 : vector<8x128xf32>
    %340 = arith.addf %336, %339 : vector<8x128xf32>
    %cst_127 = arith.constant 9.900000e-01 : f32
    %341 = vector.broadcast %cst_127 : f32 to vector<8x128xf32>
    %342 = arith.mulf %341, %328 : vector<8x128xf32>
    %cst_128 = arith.constant 2.000000e-03 : f32
    %343 = vector.broadcast %cst_128 : f32 to vector<8x128xf32>
    %344 = arith.mulf %343, %340 : vector<8x128xf32>
    %345 = arith.addf %342, %344 : vector<8x128xf32>
    %cst_129 = arith.constant 3.000000e+01 : f32
    %346 = vector.broadcast %cst_129 : f32 to vector<8x128xf32>
    %347 = arith.cmpf oge, %340, %346 : vector<8x128xf32>
    %cst_130 = arith.constant -6.500000e+01 : f32
    %348 = vector.broadcast %cst_130 : f32 to vector<8x128xf32>
    %349 = arith.select %347, %348, %340 : vector<8x128xi1>, vector<8x128xf32>
    %cst_131 = arith.constant 8.000000e+00 : f32
    %350 = vector.broadcast %cst_131 : f32 to vector<8x128xf32>
    %351 = arith.addf %345, %350 : vector<8x128xf32>
    %352 = arith.select %347, %351, %345 : vector<8x128xi1>, vector<8x128xf32>
    %353 = arith.extui %347 : vector<8x128xi1> to vector<8x128xi32>
    %354 = arith.sitofp %353 : vector<8x128xi32> to vector<8x128xf32>
    %355 = arith.addf %331, %354 : vector<8x128xf32>
    %c13_i32 = arith.constant 13 : i32
    %cst_132 = arith.constant 2.000000e-02 : f32
    %356 = vector.broadcast %cst_132 : f32 to vector<8x128xf32>
    %357 = arith.mulf %356, %349 : vector<8x128xf32>
    %cst_133 = arith.constant 3.500000e+00 : f32
    %358 = vector.broadcast %cst_133 : f32 to vector<8x128xf32>
    %359 = arith.addf %357, %358 : vector<8x128xf32>
    %360 = arith.mulf %349, %359 : vector<8x128xf32>
    %cst_134 = arith.constant 5.000000e-01 : f32
    %361 = vector.broadcast %cst_134 : f32 to vector<8x128xf32>
    %362 = arith.mulf %361, %352 : vector<8x128xf32>
    %363 = arith.subf %40, %362 : vector<8x128xf32>
    %364 = arith.addf %360, %363 : vector<8x128xf32>
    %cst_135 = arith.constant 9.900000e-01 : f32
    %365 = vector.broadcast %cst_135 : f32 to vector<8x128xf32>
    %366 = arith.mulf %365, %352 : vector<8x128xf32>
    %cst_136 = arith.constant 2.000000e-03 : f32
    %367 = vector.broadcast %cst_136 : f32 to vector<8x128xf32>
    %368 = arith.mulf %367, %364 : vector<8x128xf32>
    %369 = arith.addf %366, %368 : vector<8x128xf32>
    %cst_137 = arith.constant 3.000000e+01 : f32
    %370 = vector.broadcast %cst_137 : f32 to vector<8x128xf32>
    %371 = arith.cmpf oge, %364, %370 : vector<8x128xf32>
    %cst_138 = arith.constant -6.500000e+01 : f32
    %372 = vector.broadcast %cst_138 : f32 to vector<8x128xf32>
    %373 = arith.select %371, %372, %364 : vector<8x128xi1>, vector<8x128xf32>
    %cst_139 = arith.constant 8.000000e+00 : f32
    %374 = vector.broadcast %cst_139 : f32 to vector<8x128xf32>
    %375 = arith.addf %369, %374 : vector<8x128xf32>
    %376 = arith.select %371, %375, %369 : vector<8x128xi1>, vector<8x128xf32>
    %377 = arith.extui %371 : vector<8x128xi1> to vector<8x128xi32>
    %378 = arith.sitofp %377 : vector<8x128xi32> to vector<8x128xf32>
    %379 = arith.addf %355, %378 : vector<8x128xf32>
    %c14_i32 = arith.constant 14 : i32
    %cst_140 = arith.constant 2.000000e-02 : f32
    %380 = vector.broadcast %cst_140 : f32 to vector<8x128xf32>
    %381 = arith.mulf %380, %373 : vector<8x128xf32>
    %cst_141 = arith.constant 3.500000e+00 : f32
    %382 = vector.broadcast %cst_141 : f32 to vector<8x128xf32>
    %383 = arith.addf %381, %382 : vector<8x128xf32>
    %384 = arith.mulf %373, %383 : vector<8x128xf32>
    %cst_142 = arith.constant 5.000000e-01 : f32
    %385 = vector.broadcast %cst_142 : f32 to vector<8x128xf32>
    %386 = arith.mulf %385, %376 : vector<8x128xf32>
    %387 = arith.subf %40, %386 : vector<8x128xf32>
    %388 = arith.addf %384, %387 : vector<8x128xf32>
    %cst_143 = arith.constant 9.900000e-01 : f32
    %389 = vector.broadcast %cst_143 : f32 to vector<8x128xf32>
    %390 = arith.mulf %389, %376 : vector<8x128xf32>
    %cst_144 = arith.constant 2.000000e-03 : f32
    %391 = vector.broadcast %cst_144 : f32 to vector<8x128xf32>
    %392 = arith.mulf %391, %388 : vector<8x128xf32>
    %393 = arith.addf %390, %392 : vector<8x128xf32>
    %cst_145 = arith.constant 3.000000e+01 : f32
    %394 = vector.broadcast %cst_145 : f32 to vector<8x128xf32>
    %395 = arith.cmpf oge, %388, %394 : vector<8x128xf32>
    %cst_146 = arith.constant -6.500000e+01 : f32
    %396 = vector.broadcast %cst_146 : f32 to vector<8x128xf32>
    %397 = arith.select %395, %396, %388 : vector<8x128xi1>, vector<8x128xf32>
    %cst_147 = arith.constant 8.000000e+00 : f32
    %398 = vector.broadcast %cst_147 : f32 to vector<8x128xf32>
    %399 = arith.addf %393, %398 : vector<8x128xf32>
    %400 = arith.select %395, %399, %393 : vector<8x128xi1>, vector<8x128xf32>
    %401 = arith.extui %395 : vector<8x128xi1> to vector<8x128xi32>
    %402 = arith.sitofp %401 : vector<8x128xi32> to vector<8x128xf32>
    %403 = arith.addf %379, %402 : vector<8x128xf32>
    %c15_i32 = arith.constant 15 : i32
    %cst_148 = arith.constant 2.000000e-02 : f32
    %404 = vector.broadcast %cst_148 : f32 to vector<8x128xf32>
    %405 = arith.mulf %404, %397 : vector<8x128xf32>
    %cst_149 = arith.constant 3.500000e+00 : f32
    %406 = vector.broadcast %cst_149 : f32 to vector<8x128xf32>
    %407 = arith.addf %405, %406 : vector<8x128xf32>
    %408 = arith.mulf %397, %407 : vector<8x128xf32>
    %cst_150 = arith.constant 5.000000e-01 : f32
    %409 = vector.broadcast %cst_150 : f32 to vector<8x128xf32>
    %410 = arith.mulf %409, %400 : vector<8x128xf32>
    %411 = arith.subf %40, %410 : vector<8x128xf32>
    %412 = arith.addf %408, %411 : vector<8x128xf32>
    %cst_151 = arith.constant 9.900000e-01 : f32
    %413 = vector.broadcast %cst_151 : f32 to vector<8x128xf32>
    %414 = arith.mulf %413, %400 : vector<8x128xf32>
    %cst_152 = arith.constant 2.000000e-03 : f32
    %415 = vector.broadcast %cst_152 : f32 to vector<8x128xf32>
    %416 = arith.mulf %415, %412 : vector<8x128xf32>
    %417 = arith.addf %414, %416 : vector<8x128xf32>
    %cst_153 = arith.constant 3.000000e+01 : f32
    %418 = vector.broadcast %cst_153 : f32 to vector<8x128xf32>
    %419 = arith.cmpf oge, %412, %418 : vector<8x128xf32>
    %cst_154 = arith.constant -6.500000e+01 : f32
    %420 = vector.broadcast %cst_154 : f32 to vector<8x128xf32>
    %421 = arith.select %419, %420, %412 : vector<8x128xi1>, vector<8x128xf32>
    %cst_155 = arith.constant 8.000000e+00 : f32
    %422 = vector.broadcast %cst_155 : f32 to vector<8x128xf32>
    %423 = arith.addf %417, %422 : vector<8x128xf32>
    %424 = arith.select %419, %423, %417 : vector<8x128xi1>, vector<8x128xf32>
    %425 = arith.extui %419 : vector<8x128xi1> to vector<8x128xi32>
    %426 = arith.sitofp %425 : vector<8x128xi32> to vector<8x128xf32>
    %427 = arith.addf %403, %426 : vector<8x128xf32>
    %c16_i32 = arith.constant 16 : i32
    %cst_156 = arith.constant 2.000000e-02 : f32
    %428 = vector.broadcast %cst_156 : f32 to vector<8x128xf32>
    %429 = arith.mulf %428, %421 : vector<8x128xf32>
    %cst_157 = arith.constant 3.500000e+00 : f32
    %430 = vector.broadcast %cst_157 : f32 to vector<8x128xf32>
    %431 = arith.addf %429, %430 : vector<8x128xf32>
    %432 = arith.mulf %421, %431 : vector<8x128xf32>
    %cst_158 = arith.constant 5.000000e-01 : f32
    %433 = vector.broadcast %cst_158 : f32 to vector<8x128xf32>
    %434 = arith.mulf %433, %424 : vector<8x128xf32>
    %435 = arith.subf %40, %434 : vector<8x128xf32>
    %436 = arith.addf %432, %435 : vector<8x128xf32>
    %cst_159 = arith.constant 9.900000e-01 : f32
    %437 = vector.broadcast %cst_159 : f32 to vector<8x128xf32>
    %438 = arith.mulf %437, %424 : vector<8x128xf32>
    %cst_160 = arith.constant 2.000000e-03 : f32
    %439 = vector.broadcast %cst_160 : f32 to vector<8x128xf32>
    %440 = arith.mulf %439, %436 : vector<8x128xf32>
    %441 = arith.addf %438, %440 : vector<8x128xf32>
    %cst_161 = arith.constant 3.000000e+01 : f32
    %442 = vector.broadcast %cst_161 : f32 to vector<8x128xf32>
    %443 = arith.cmpf oge, %436, %442 : vector<8x128xf32>
    %cst_162 = arith.constant -6.500000e+01 : f32
    %444 = vector.broadcast %cst_162 : f32 to vector<8x128xf32>
    %445 = arith.select %443, %444, %436 : vector<8x128xi1>, vector<8x128xf32>
    %cst_163 = arith.constant 8.000000e+00 : f32
    %446 = vector.broadcast %cst_163 : f32 to vector<8x128xf32>
    %447 = arith.addf %441, %446 : vector<8x128xf32>
    %448 = arith.select %443, %447, %441 : vector<8x128xi1>, vector<8x128xf32>
    %449 = arith.extui %443 : vector<8x128xi1> to vector<8x128xi32>
    %450 = arith.sitofp %449 : vector<8x128xi32> to vector<8x128xf32>
    %451 = arith.addf %427, %450 : vector<8x128xf32>
    %c17_i32 = arith.constant 17 : i32
    %cst_164 = arith.constant 2.000000e-02 : f32
    %452 = vector.broadcast %cst_164 : f32 to vector<8x128xf32>
    %453 = arith.mulf %452, %445 : vector<8x128xf32>
    %cst_165 = arith.constant 3.500000e+00 : f32
    %454 = vector.broadcast %cst_165 : f32 to vector<8x128xf32>
    %455 = arith.addf %453, %454 : vector<8x128xf32>
    %456 = arith.mulf %445, %455 : vector<8x128xf32>
    %cst_166 = arith.constant 5.000000e-01 : f32
    %457 = vector.broadcast %cst_166 : f32 to vector<8x128xf32>
    %458 = arith.mulf %457, %448 : vector<8x128xf32>
    %459 = arith.subf %40, %458 : vector<8x128xf32>
    %460 = arith.addf %456, %459 : vector<8x128xf32>
    %cst_167 = arith.constant 9.900000e-01 : f32
    %461 = vector.broadcast %cst_167 : f32 to vector<8x128xf32>
    %462 = arith.mulf %461, %448 : vector<8x128xf32>
    %cst_168 = arith.constant 2.000000e-03 : f32
    %463 = vector.broadcast %cst_168 : f32 to vector<8x128xf32>
    %464 = arith.mulf %463, %460 : vector<8x128xf32>
    %465 = arith.addf %462, %464 : vector<8x128xf32>
    %cst_169 = arith.constant 3.000000e+01 : f32
    %466 = vector.broadcast %cst_169 : f32 to vector<8x128xf32>
    %467 = arith.cmpf oge, %460, %466 : vector<8x128xf32>
    %cst_170 = arith.constant -6.500000e+01 : f32
    %468 = vector.broadcast %cst_170 : f32 to vector<8x128xf32>
    %469 = arith.select %467, %468, %460 : vector<8x128xi1>, vector<8x128xf32>
    %cst_171 = arith.constant 8.000000e+00 : f32
    %470 = vector.broadcast %cst_171 : f32 to vector<8x128xf32>
    %471 = arith.addf %465, %470 : vector<8x128xf32>
    %472 = arith.select %467, %471, %465 : vector<8x128xi1>, vector<8x128xf32>
    %473 = arith.extui %467 : vector<8x128xi1> to vector<8x128xi32>
    %474 = arith.sitofp %473 : vector<8x128xi32> to vector<8x128xf32>
    %475 = arith.addf %451, %474 : vector<8x128xf32>
    %c18_i32 = arith.constant 18 : i32
    %cst_172 = arith.constant 2.000000e-02 : f32
    %476 = vector.broadcast %cst_172 : f32 to vector<8x128xf32>
    %477 = arith.mulf %476, %469 : vector<8x128xf32>
    %cst_173 = arith.constant 3.500000e+00 : f32
    %478 = vector.broadcast %cst_173 : f32 to vector<8x128xf32>
    %479 = arith.addf %477, %478 : vector<8x128xf32>
    %480 = arith.mulf %469, %479 : vector<8x128xf32>
    %cst_174 = arith.constant 5.000000e-01 : f32
    %481 = vector.broadcast %cst_174 : f32 to vector<8x128xf32>
    %482 = arith.mulf %481, %472 : vector<8x128xf32>
    %483 = arith.subf %40, %482 : vector<8x128xf32>
    %484 = arith.addf %480, %483 : vector<8x128xf32>
    %cst_175 = arith.constant 9.900000e-01 : f32
    %485 = vector.broadcast %cst_175 : f32 to vector<8x128xf32>
    %486 = arith.mulf %485, %472 : vector<8x128xf32>
    %cst_176 = arith.constant 2.000000e-03 : f32
    %487 = vector.broadcast %cst_176 : f32 to vector<8x128xf32>
    %488 = arith.mulf %487, %484 : vector<8x128xf32>
    %489 = arith.addf %486, %488 : vector<8x128xf32>
    %cst_177 = arith.constant 3.000000e+01 : f32
    %490 = vector.broadcast %cst_177 : f32 to vector<8x128xf32>
    %491 = arith.cmpf oge, %484, %490 : vector<8x128xf32>
    %cst_178 = arith.constant -6.500000e+01 : f32
    %492 = vector.broadcast %cst_178 : f32 to vector<8x128xf32>
    %493 = arith.select %491, %492, %484 : vector<8x128xi1>, vector<8x128xf32>
    %cst_179 = arith.constant 8.000000e+00 : f32
    %494 = vector.broadcast %cst_179 : f32 to vector<8x128xf32>
    %495 = arith.addf %489, %494 : vector<8x128xf32>
    %496 = arith.select %491, %495, %489 : vector<8x128xi1>, vector<8x128xf32>
    %497 = arith.extui %491 : vector<8x128xi1> to vector<8x128xi32>
    %498 = arith.sitofp %497 : vector<8x128xi32> to vector<8x128xf32>
    %499 = arith.addf %475, %498 : vector<8x128xf32>
    %c19_i32 = arith.constant 19 : i32
    %cst_180 = arith.constant 2.000000e-02 : f32
    %500 = vector.broadcast %cst_180 : f32 to vector<8x128xf32>
    %501 = arith.mulf %500, %493 : vector<8x128xf32>
    %cst_181 = arith.constant 3.500000e+00 : f32
    %502 = vector.broadcast %cst_181 : f32 to vector<8x128xf32>
    %503 = arith.addf %501, %502 : vector<8x128xf32>
    %504 = arith.mulf %493, %503 : vector<8x128xf32>
    %cst_182 = arith.constant 5.000000e-01 : f32
    %505 = vector.broadcast %cst_182 : f32 to vector<8x128xf32>
    %506 = arith.mulf %505, %496 : vector<8x128xf32>
    %507 = arith.subf %40, %506 : vector<8x128xf32>
    %508 = arith.addf %504, %507 : vector<8x128xf32>
    %cst_183 = arith.constant 9.900000e-01 : f32
    %509 = vector.broadcast %cst_183 : f32 to vector<8x128xf32>
    %510 = arith.mulf %509, %496 : vector<8x128xf32>
    %cst_184 = arith.constant 2.000000e-03 : f32
    %511 = vector.broadcast %cst_184 : f32 to vector<8x128xf32>
    %512 = arith.mulf %511, %508 : vector<8x128xf32>
    %513 = arith.addf %510, %512 : vector<8x128xf32>
    %cst_185 = arith.constant 3.000000e+01 : f32
    %514 = vector.broadcast %cst_185 : f32 to vector<8x128xf32>
    %515 = arith.cmpf oge, %508, %514 : vector<8x128xf32>
    %cst_186 = arith.constant -6.500000e+01 : f32
    %516 = vector.broadcast %cst_186 : f32 to vector<8x128xf32>
    %517 = arith.select %515, %516, %508 : vector<8x128xi1>, vector<8x128xf32>
    %cst_187 = arith.constant 8.000000e+00 : f32
    %518 = vector.broadcast %cst_187 : f32 to vector<8x128xf32>
    %519 = arith.addf %513, %518 : vector<8x128xf32>
    %520 = arith.select %515, %519, %513 : vector<8x128xi1>, vector<8x128xf32>
    %521 = arith.extui %515 : vector<8x128xi1> to vector<8x128xi32>
    %522 = arith.sitofp %521 : vector<8x128xi32> to vector<8x128xf32>
    %523 = arith.addf %499, %522 : vector<8x128xf32>
    %c20_i32 = arith.constant 20 : i32
    %cst_188 = arith.constant 2.000000e-02 : f32
    %524 = vector.broadcast %cst_188 : f32 to vector<8x128xf32>
    %525 = arith.mulf %524, %517 : vector<8x128xf32>
    %cst_189 = arith.constant 3.500000e+00 : f32
    %526 = vector.broadcast %cst_189 : f32 to vector<8x128xf32>
    %527 = arith.addf %525, %526 : vector<8x128xf32>
    %528 = arith.mulf %517, %527 : vector<8x128xf32>
    %cst_190 = arith.constant 5.000000e-01 : f32
    %529 = vector.broadcast %cst_190 : f32 to vector<8x128xf32>
    %530 = arith.mulf %529, %520 : vector<8x128xf32>
    %531 = arith.subf %40, %530 : vector<8x128xf32>
    %532 = arith.addf %528, %531 : vector<8x128xf32>
    %cst_191 = arith.constant 9.900000e-01 : f32
    %533 = vector.broadcast %cst_191 : f32 to vector<8x128xf32>
    %534 = arith.mulf %533, %520 : vector<8x128xf32>
    %cst_192 = arith.constant 2.000000e-03 : f32
    %535 = vector.broadcast %cst_192 : f32 to vector<8x128xf32>
    %536 = arith.mulf %535, %532 : vector<8x128xf32>
    %537 = arith.addf %534, %536 : vector<8x128xf32>
    %cst_193 = arith.constant 3.000000e+01 : f32
    %538 = vector.broadcast %cst_193 : f32 to vector<8x128xf32>
    %539 = arith.cmpf oge, %532, %538 : vector<8x128xf32>
    %cst_194 = arith.constant -6.500000e+01 : f32
    %540 = vector.broadcast %cst_194 : f32 to vector<8x128xf32>
    %541 = arith.select %539, %540, %532 : vector<8x128xi1>, vector<8x128xf32>
    %cst_195 = arith.constant 8.000000e+00 : f32
    %542 = vector.broadcast %cst_195 : f32 to vector<8x128xf32>
    %543 = arith.addf %537, %542 : vector<8x128xf32>
    %544 = arith.select %539, %543, %537 : vector<8x128xi1>, vector<8x128xf32>
    %545 = arith.extui %539 : vector<8x128xi1> to vector<8x128xi32>
    %546 = arith.sitofp %545 : vector<8x128xi32> to vector<8x128xf32>
    %547 = arith.addf %523, %546 : vector<8x128xf32>
    %c21_i32 = arith.constant 21 : i32
    %cst_196 = arith.constant 2.000000e-02 : f32
    %548 = vector.broadcast %cst_196 : f32 to vector<8x128xf32>
    %549 = arith.mulf %548, %541 : vector<8x128xf32>
    %cst_197 = arith.constant 3.500000e+00 : f32
    %550 = vector.broadcast %cst_197 : f32 to vector<8x128xf32>
    %551 = arith.addf %549, %550 : vector<8x128xf32>
    %552 = arith.mulf %541, %551 : vector<8x128xf32>
    %cst_198 = arith.constant 5.000000e-01 : f32
    %553 = vector.broadcast %cst_198 : f32 to vector<8x128xf32>
    %554 = arith.mulf %553, %544 : vector<8x128xf32>
    %555 = arith.subf %40, %554 : vector<8x128xf32>
    %556 = arith.addf %552, %555 : vector<8x128xf32>
    %cst_199 = arith.constant 9.900000e-01 : f32
    %557 = vector.broadcast %cst_199 : f32 to vector<8x128xf32>
    %558 = arith.mulf %557, %544 : vector<8x128xf32>
    %cst_200 = arith.constant 2.000000e-03 : f32
    %559 = vector.broadcast %cst_200 : f32 to vector<8x128xf32>
    %560 = arith.mulf %559, %556 : vector<8x128xf32>
    %561 = arith.addf %558, %560 : vector<8x128xf32>
    %cst_201 = arith.constant 3.000000e+01 : f32
    %562 = vector.broadcast %cst_201 : f32 to vector<8x128xf32>
    %563 = arith.cmpf oge, %556, %562 : vector<8x128xf32>
    %cst_202 = arith.constant -6.500000e+01 : f32
    %564 = vector.broadcast %cst_202 : f32 to vector<8x128xf32>
    %565 = arith.select %563, %564, %556 : vector<8x128xi1>, vector<8x128xf32>
    %cst_203 = arith.constant 8.000000e+00 : f32
    %566 = vector.broadcast %cst_203 : f32 to vector<8x128xf32>
    %567 = arith.addf %561, %566 : vector<8x128xf32>
    %568 = arith.select %563, %567, %561 : vector<8x128xi1>, vector<8x128xf32>
    %569 = arith.extui %563 : vector<8x128xi1> to vector<8x128xi32>
    %570 = arith.sitofp %569 : vector<8x128xi32> to vector<8x128xf32>
    %571 = arith.addf %547, %570 : vector<8x128xf32>
    %c22_i32 = arith.constant 22 : i32
    %cst_204 = arith.constant 2.000000e-02 : f32
    %572 = vector.broadcast %cst_204 : f32 to vector<8x128xf32>
    %573 = arith.mulf %572, %565 : vector<8x128xf32>
    %cst_205 = arith.constant 3.500000e+00 : f32
    %574 = vector.broadcast %cst_205 : f32 to vector<8x128xf32>
    %575 = arith.addf %573, %574 : vector<8x128xf32>
    %576 = arith.mulf %565, %575 : vector<8x128xf32>
    %cst_206 = arith.constant 5.000000e-01 : f32
    %577 = vector.broadcast %cst_206 : f32 to vector<8x128xf32>
    %578 = arith.mulf %577, %568 : vector<8x128xf32>
    %579 = arith.subf %40, %578 : vector<8x128xf32>
    %580 = arith.addf %576, %579 : vector<8x128xf32>
    %cst_207 = arith.constant 9.900000e-01 : f32
    %581 = vector.broadcast %cst_207 : f32 to vector<8x128xf32>
    %582 = arith.mulf %581, %568 : vector<8x128xf32>
    %cst_208 = arith.constant 2.000000e-03 : f32
    %583 = vector.broadcast %cst_208 : f32 to vector<8x128xf32>
    %584 = arith.mulf %583, %580 : vector<8x128xf32>
    %585 = arith.addf %582, %584 : vector<8x128xf32>
    %cst_209 = arith.constant 3.000000e+01 : f32
    %586 = vector.broadcast %cst_209 : f32 to vector<8x128xf32>
    %587 = arith.cmpf oge, %580, %586 : vector<8x128xf32>
    %cst_210 = arith.constant -6.500000e+01 : f32
    %588 = vector.broadcast %cst_210 : f32 to vector<8x128xf32>
    %589 = arith.select %587, %588, %580 : vector<8x128xi1>, vector<8x128xf32>
    %cst_211 = arith.constant 8.000000e+00 : f32
    %590 = vector.broadcast %cst_211 : f32 to vector<8x128xf32>
    %591 = arith.addf %585, %590 : vector<8x128xf32>
    %592 = arith.select %587, %591, %585 : vector<8x128xi1>, vector<8x128xf32>
    %593 = arith.extui %587 : vector<8x128xi1> to vector<8x128xi32>
    %594 = arith.sitofp %593 : vector<8x128xi32> to vector<8x128xf32>
    %595 = arith.addf %571, %594 : vector<8x128xf32>
    %c23_i32 = arith.constant 23 : i32
    %cst_212 = arith.constant 2.000000e-02 : f32
    %596 = vector.broadcast %cst_212 : f32 to vector<8x128xf32>
    %597 = arith.mulf %596, %589 : vector<8x128xf32>
    %cst_213 = arith.constant 3.500000e+00 : f32
    %598 = vector.broadcast %cst_213 : f32 to vector<8x128xf32>
    %599 = arith.addf %597, %598 : vector<8x128xf32>
    %600 = arith.mulf %589, %599 : vector<8x128xf32>
    %cst_214 = arith.constant 5.000000e-01 : f32
    %601 = vector.broadcast %cst_214 : f32 to vector<8x128xf32>
    %602 = arith.mulf %601, %592 : vector<8x128xf32>
    %603 = arith.subf %40, %602 : vector<8x128xf32>
    %604 = arith.addf %600, %603 : vector<8x128xf32>
    %cst_215 = arith.constant 9.900000e-01 : f32
    %605 = vector.broadcast %cst_215 : f32 to vector<8x128xf32>
    %606 = arith.mulf %605, %592 : vector<8x128xf32>
    %cst_216 = arith.constant 2.000000e-03 : f32
    %607 = vector.broadcast %cst_216 : f32 to vector<8x128xf32>
    %608 = arith.mulf %607, %604 : vector<8x128xf32>
    %609 = arith.addf %606, %608 : vector<8x128xf32>
    %cst_217 = arith.constant 3.000000e+01 : f32
    %610 = vector.broadcast %cst_217 : f32 to vector<8x128xf32>
    %611 = arith.cmpf oge, %604, %610 : vector<8x128xf32>
    %cst_218 = arith.constant -6.500000e+01 : f32
    %612 = vector.broadcast %cst_218 : f32 to vector<8x128xf32>
    %613 = arith.select %611, %612, %604 : vector<8x128xi1>, vector<8x128xf32>
    %cst_219 = arith.constant 8.000000e+00 : f32
    %614 = vector.broadcast %cst_219 : f32 to vector<8x128xf32>
    %615 = arith.addf %609, %614 : vector<8x128xf32>
    %616 = arith.select %611, %615, %609 : vector<8x128xi1>, vector<8x128xf32>
    %617 = arith.extui %611 : vector<8x128xi1> to vector<8x128xi32>
    %618 = arith.sitofp %617 : vector<8x128xi32> to vector<8x128xf32>
    %619 = arith.addf %595, %618 : vector<8x128xf32>
    %c24_i32 = arith.constant 24 : i32
    %cst_220 = arith.constant 2.000000e-02 : f32
    %620 = vector.broadcast %cst_220 : f32 to vector<8x128xf32>
    %621 = arith.mulf %620, %613 : vector<8x128xf32>
    %cst_221 = arith.constant 3.500000e+00 : f32
    %622 = vector.broadcast %cst_221 : f32 to vector<8x128xf32>
    %623 = arith.addf %621, %622 : vector<8x128xf32>
    %624 = arith.mulf %613, %623 : vector<8x128xf32>
    %cst_222 = arith.constant 5.000000e-01 : f32
    %625 = vector.broadcast %cst_222 : f32 to vector<8x128xf32>
    %626 = arith.mulf %625, %616 : vector<8x128xf32>
    %627 = arith.subf %40, %626 : vector<8x128xf32>
    %628 = arith.addf %624, %627 : vector<8x128xf32>
    %cst_223 = arith.constant 9.900000e-01 : f32
    %629 = vector.broadcast %cst_223 : f32 to vector<8x128xf32>
    %630 = arith.mulf %629, %616 : vector<8x128xf32>
    %cst_224 = arith.constant 2.000000e-03 : f32
    %631 = vector.broadcast %cst_224 : f32 to vector<8x128xf32>
    %632 = arith.mulf %631, %628 : vector<8x128xf32>
    %633 = arith.addf %630, %632 : vector<8x128xf32>
    %cst_225 = arith.constant 3.000000e+01 : f32
    %634 = vector.broadcast %cst_225 : f32 to vector<8x128xf32>
    %635 = arith.cmpf oge, %628, %634 : vector<8x128xf32>
    %cst_226 = arith.constant -6.500000e+01 : f32
    %636 = vector.broadcast %cst_226 : f32 to vector<8x128xf32>
    %637 = arith.select %635, %636, %628 : vector<8x128xi1>, vector<8x128xf32>
    %cst_227 = arith.constant 8.000000e+00 : f32
    %638 = vector.broadcast %cst_227 : f32 to vector<8x128xf32>
    %639 = arith.addf %633, %638 : vector<8x128xf32>
    %640 = arith.select %635, %639, %633 : vector<8x128xi1>, vector<8x128xf32>
    %641 = arith.extui %635 : vector<8x128xi1> to vector<8x128xi32>
    %642 = arith.sitofp %641 : vector<8x128xi32> to vector<8x128xf32>
    %643 = arith.addf %619, %642 : vector<8x128xf32>
    %c25_i32 = arith.constant 25 : i32
    %cst_228 = arith.constant 2.000000e-02 : f32
    %644 = vector.broadcast %cst_228 : f32 to vector<8x128xf32>
    %645 = arith.mulf %644, %637 : vector<8x128xf32>
    %cst_229 = arith.constant 3.500000e+00 : f32
    %646 = vector.broadcast %cst_229 : f32 to vector<8x128xf32>
    %647 = arith.addf %645, %646 : vector<8x128xf32>
    %648 = arith.mulf %637, %647 : vector<8x128xf32>
    %cst_230 = arith.constant 5.000000e-01 : f32
    %649 = vector.broadcast %cst_230 : f32 to vector<8x128xf32>
    %650 = arith.mulf %649, %640 : vector<8x128xf32>
    %651 = arith.subf %40, %650 : vector<8x128xf32>
    %652 = arith.addf %648, %651 : vector<8x128xf32>
    %cst_231 = arith.constant 9.900000e-01 : f32
    %653 = vector.broadcast %cst_231 : f32 to vector<8x128xf32>
    %654 = arith.mulf %653, %640 : vector<8x128xf32>
    %cst_232 = arith.constant 2.000000e-03 : f32
    %655 = vector.broadcast %cst_232 : f32 to vector<8x128xf32>
    %656 = arith.mulf %655, %652 : vector<8x128xf32>
    %657 = arith.addf %654, %656 : vector<8x128xf32>
    %cst_233 = arith.constant 3.000000e+01 : f32
    %658 = vector.broadcast %cst_233 : f32 to vector<8x128xf32>
    %659 = arith.cmpf oge, %652, %658 : vector<8x128xf32>
    %cst_234 = arith.constant -6.500000e+01 : f32
    %660 = vector.broadcast %cst_234 : f32 to vector<8x128xf32>
    %661 = arith.select %659, %660, %652 : vector<8x128xi1>, vector<8x128xf32>
    %cst_235 = arith.constant 8.000000e+00 : f32
    %662 = vector.broadcast %cst_235 : f32 to vector<8x128xf32>
    %663 = arith.addf %657, %662 : vector<8x128xf32>
    %664 = arith.select %659, %663, %657 : vector<8x128xi1>, vector<8x128xf32>
    %665 = arith.extui %659 : vector<8x128xi1> to vector<8x128xi32>
    %666 = arith.sitofp %665 : vector<8x128xi32> to vector<8x128xf32>
    %667 = arith.addf %643, %666 : vector<8x128xf32>
    %c26_i32 = arith.constant 26 : i32
    %cst_236 = arith.constant 2.000000e-02 : f32
    %668 = vector.broadcast %cst_236 : f32 to vector<8x128xf32>
    %669 = arith.mulf %668, %661 : vector<8x128xf32>
    %cst_237 = arith.constant 3.500000e+00 : f32
    %670 = vector.broadcast %cst_237 : f32 to vector<8x128xf32>
    %671 = arith.addf %669, %670 : vector<8x128xf32>
    %672 = arith.mulf %661, %671 : vector<8x128xf32>
    %cst_238 = arith.constant 5.000000e-01 : f32
    %673 = vector.broadcast %cst_238 : f32 to vector<8x128xf32>
    %674 = arith.mulf %673, %664 : vector<8x128xf32>
    %675 = arith.subf %40, %674 : vector<8x128xf32>
    %676 = arith.addf %672, %675 : vector<8x128xf32>
    %cst_239 = arith.constant 9.900000e-01 : f32
    %677 = vector.broadcast %cst_239 : f32 to vector<8x128xf32>
    %678 = arith.mulf %677, %664 : vector<8x128xf32>
    %cst_240 = arith.constant 2.000000e-03 : f32
    %679 = vector.broadcast %cst_240 : f32 to vector<8x128xf32>
    %680 = arith.mulf %679, %676 : vector<8x128xf32>
    %681 = arith.addf %678, %680 : vector<8x128xf32>
    %cst_241 = arith.constant 3.000000e+01 : f32
    %682 = vector.broadcast %cst_241 : f32 to vector<8x128xf32>
    %683 = arith.cmpf oge, %676, %682 : vector<8x128xf32>
    %cst_242 = arith.constant -6.500000e+01 : f32
    %684 = vector.broadcast %cst_242 : f32 to vector<8x128xf32>
    %685 = arith.select %683, %684, %676 : vector<8x128xi1>, vector<8x128xf32>
    %cst_243 = arith.constant 8.000000e+00 : f32
    %686 = vector.broadcast %cst_243 : f32 to vector<8x128xf32>
    %687 = arith.addf %681, %686 : vector<8x128xf32>
    %688 = arith.select %683, %687, %681 : vector<8x128xi1>, vector<8x128xf32>
    %689 = arith.extui %683 : vector<8x128xi1> to vector<8x128xi32>
    %690 = arith.sitofp %689 : vector<8x128xi32> to vector<8x128xf32>
    %691 = arith.addf %667, %690 : vector<8x128xf32>
    %c27_i32 = arith.constant 27 : i32
    %cst_244 = arith.constant 2.000000e-02 : f32
    %692 = vector.broadcast %cst_244 : f32 to vector<8x128xf32>
    %693 = arith.mulf %692, %685 : vector<8x128xf32>
    %cst_245 = arith.constant 3.500000e+00 : f32
    %694 = vector.broadcast %cst_245 : f32 to vector<8x128xf32>
    %695 = arith.addf %693, %694 : vector<8x128xf32>
    %696 = arith.mulf %685, %695 : vector<8x128xf32>
    %cst_246 = arith.constant 5.000000e-01 : f32
    %697 = vector.broadcast %cst_246 : f32 to vector<8x128xf32>
    %698 = arith.mulf %697, %688 : vector<8x128xf32>
    %699 = arith.subf %40, %698 : vector<8x128xf32>
    %700 = arith.addf %696, %699 : vector<8x128xf32>
    %cst_247 = arith.constant 9.900000e-01 : f32
    %701 = vector.broadcast %cst_247 : f32 to vector<8x128xf32>
    %702 = arith.mulf %701, %688 : vector<8x128xf32>
    %cst_248 = arith.constant 2.000000e-03 : f32
    %703 = vector.broadcast %cst_248 : f32 to vector<8x128xf32>
    %704 = arith.mulf %703, %700 : vector<8x128xf32>
    %705 = arith.addf %702, %704 : vector<8x128xf32>
    %cst_249 = arith.constant 3.000000e+01 : f32
    %706 = vector.broadcast %cst_249 : f32 to vector<8x128xf32>
    %707 = arith.cmpf oge, %700, %706 : vector<8x128xf32>
    %cst_250 = arith.constant -6.500000e+01 : f32
    %708 = vector.broadcast %cst_250 : f32 to vector<8x128xf32>
    %709 = arith.select %707, %708, %700 : vector<8x128xi1>, vector<8x128xf32>
    %cst_251 = arith.constant 8.000000e+00 : f32
    %710 = vector.broadcast %cst_251 : f32 to vector<8x128xf32>
    %711 = arith.addf %705, %710 : vector<8x128xf32>
    %712 = arith.select %707, %711, %705 : vector<8x128xi1>, vector<8x128xf32>
    %713 = arith.extui %707 : vector<8x128xi1> to vector<8x128xi32>
    %714 = arith.sitofp %713 : vector<8x128xi32> to vector<8x128xf32>
    %715 = arith.addf %691, %714 : vector<8x128xf32>
    %c28_i32 = arith.constant 28 : i32
    %cst_252 = arith.constant 2.000000e-02 : f32
    %716 = vector.broadcast %cst_252 : f32 to vector<8x128xf32>
    %717 = arith.mulf %716, %709 : vector<8x128xf32>
    %cst_253 = arith.constant 3.500000e+00 : f32
    %718 = vector.broadcast %cst_253 : f32 to vector<8x128xf32>
    %719 = arith.addf %717, %718 : vector<8x128xf32>
    %720 = arith.mulf %709, %719 : vector<8x128xf32>
    %cst_254 = arith.constant 5.000000e-01 : f32
    %721 = vector.broadcast %cst_254 : f32 to vector<8x128xf32>
    %722 = arith.mulf %721, %712 : vector<8x128xf32>
    %723 = arith.subf %40, %722 : vector<8x128xf32>
    %724 = arith.addf %720, %723 : vector<8x128xf32>
    %cst_255 = arith.constant 9.900000e-01 : f32
    %725 = vector.broadcast %cst_255 : f32 to vector<8x128xf32>
    %726 = arith.mulf %725, %712 : vector<8x128xf32>
    %cst_256 = arith.constant 2.000000e-03 : f32
    %727 = vector.broadcast %cst_256 : f32 to vector<8x128xf32>
    %728 = arith.mulf %727, %724 : vector<8x128xf32>
    %729 = arith.addf %726, %728 : vector<8x128xf32>
    %cst_257 = arith.constant 3.000000e+01 : f32
    %730 = vector.broadcast %cst_257 : f32 to vector<8x128xf32>
    %731 = arith.cmpf oge, %724, %730 : vector<8x128xf32>
    %cst_258 = arith.constant -6.500000e+01 : f32
    %732 = vector.broadcast %cst_258 : f32 to vector<8x128xf32>
    %733 = arith.select %731, %732, %724 : vector<8x128xi1>, vector<8x128xf32>
    %cst_259 = arith.constant 8.000000e+00 : f32
    %734 = vector.broadcast %cst_259 : f32 to vector<8x128xf32>
    %735 = arith.addf %729, %734 : vector<8x128xf32>
    %736 = arith.select %731, %735, %729 : vector<8x128xi1>, vector<8x128xf32>
    %737 = arith.extui %731 : vector<8x128xi1> to vector<8x128xi32>
    %738 = arith.sitofp %737 : vector<8x128xi32> to vector<8x128xf32>
    %739 = arith.addf %715, %738 : vector<8x128xf32>
    %c29_i32 = arith.constant 29 : i32
    %cst_260 = arith.constant 2.000000e-02 : f32
    %740 = vector.broadcast %cst_260 : f32 to vector<8x128xf32>
    %741 = arith.mulf %740, %733 : vector<8x128xf32>
    %cst_261 = arith.constant 3.500000e+00 : f32
    %742 = vector.broadcast %cst_261 : f32 to vector<8x128xf32>
    %743 = arith.addf %741, %742 : vector<8x128xf32>
    %744 = arith.mulf %733, %743 : vector<8x128xf32>
    %cst_262 = arith.constant 5.000000e-01 : f32
    %745 = vector.broadcast %cst_262 : f32 to vector<8x128xf32>
    %746 = arith.mulf %745, %736 : vector<8x128xf32>
    %747 = arith.subf %40, %746 : vector<8x128xf32>
    %748 = arith.addf %744, %747 : vector<8x128xf32>
    %cst_263 = arith.constant 9.900000e-01 : f32
    %749 = vector.broadcast %cst_263 : f32 to vector<8x128xf32>
    %750 = arith.mulf %749, %736 : vector<8x128xf32>
    %cst_264 = arith.constant 2.000000e-03 : f32
    %751 = vector.broadcast %cst_264 : f32 to vector<8x128xf32>
    %752 = arith.mulf %751, %748 : vector<8x128xf32>
    %753 = arith.addf %750, %752 : vector<8x128xf32>
    %cst_265 = arith.constant 3.000000e+01 : f32
    %754 = vector.broadcast %cst_265 : f32 to vector<8x128xf32>
    %755 = arith.cmpf oge, %748, %754 : vector<8x128xf32>
    %cst_266 = arith.constant -6.500000e+01 : f32
    %756 = vector.broadcast %cst_266 : f32 to vector<8x128xf32>
    %757 = arith.select %755, %756, %748 : vector<8x128xi1>, vector<8x128xf32>
    %cst_267 = arith.constant 8.000000e+00 : f32
    %758 = vector.broadcast %cst_267 : f32 to vector<8x128xf32>
    %759 = arith.addf %753, %758 : vector<8x128xf32>
    %760 = arith.select %755, %759, %753 : vector<8x128xi1>, vector<8x128xf32>
    %761 = arith.extui %755 : vector<8x128xi1> to vector<8x128xi32>
    %762 = arith.sitofp %761 : vector<8x128xi32> to vector<8x128xf32>
    %763 = arith.addf %739, %762 : vector<8x128xf32>
    %c30_i32 = arith.constant 30 : i32
    %cst_268 = arith.constant 2.000000e-02 : f32
    %764 = vector.broadcast %cst_268 : f32 to vector<8x128xf32>
    %765 = arith.mulf %764, %757 : vector<8x128xf32>
    %cst_269 = arith.constant 3.500000e+00 : f32
    %766 = vector.broadcast %cst_269 : f32 to vector<8x128xf32>
    %767 = arith.addf %765, %766 : vector<8x128xf32>
    %768 = arith.mulf %757, %767 : vector<8x128xf32>
    %cst_270 = arith.constant 5.000000e-01 : f32
    %769 = vector.broadcast %cst_270 : f32 to vector<8x128xf32>
    %770 = arith.mulf %769, %760 : vector<8x128xf32>
    %771 = arith.subf %40, %770 : vector<8x128xf32>
    %772 = arith.addf %768, %771 : vector<8x128xf32>
    %cst_271 = arith.constant 9.900000e-01 : f32
    %773 = vector.broadcast %cst_271 : f32 to vector<8x128xf32>
    %774 = arith.mulf %773, %760 : vector<8x128xf32>
    %cst_272 = arith.constant 2.000000e-03 : f32
    %775 = vector.broadcast %cst_272 : f32 to vector<8x128xf32>
    %776 = arith.mulf %775, %772 : vector<8x128xf32>
    %777 = arith.addf %774, %776 : vector<8x128xf32>
    %cst_273 = arith.constant 3.000000e+01 : f32
    %778 = vector.broadcast %cst_273 : f32 to vector<8x128xf32>
    %779 = arith.cmpf oge, %772, %778 : vector<8x128xf32>
    %cst_274 = arith.constant -6.500000e+01 : f32
    %780 = vector.broadcast %cst_274 : f32 to vector<8x128xf32>
    %781 = arith.select %779, %780, %772 : vector<8x128xi1>, vector<8x128xf32>
    %cst_275 = arith.constant 8.000000e+00 : f32
    %782 = vector.broadcast %cst_275 : f32 to vector<8x128xf32>
    %783 = arith.addf %777, %782 : vector<8x128xf32>
    %784 = arith.select %779, %783, %777 : vector<8x128xi1>, vector<8x128xf32>
    %785 = arith.extui %779 : vector<8x128xi1> to vector<8x128xi32>
    %786 = arith.sitofp %785 : vector<8x128xi32> to vector<8x128xf32>
    %787 = arith.addf %763, %786 : vector<8x128xf32>
    %c31_i32 = arith.constant 31 : i32
    %cst_276 = arith.constant 2.000000e-02 : f32
    %788 = vector.broadcast %cst_276 : f32 to vector<8x128xf32>
    %789 = arith.mulf %788, %781 : vector<8x128xf32>
    %cst_277 = arith.constant 3.500000e+00 : f32
    %790 = vector.broadcast %cst_277 : f32 to vector<8x128xf32>
    %791 = arith.addf %789, %790 : vector<8x128xf32>
    %792 = arith.mulf %781, %791 : vector<8x128xf32>
    %cst_278 = arith.constant 5.000000e-01 : f32
    %793 = vector.broadcast %cst_278 : f32 to vector<8x128xf32>
    %794 = arith.mulf %793, %784 : vector<8x128xf32>
    %795 = arith.subf %40, %794 : vector<8x128xf32>
    %796 = arith.addf %792, %795 : vector<8x128xf32>
    %cst_279 = arith.constant 9.900000e-01 : f32
    %797 = vector.broadcast %cst_279 : f32 to vector<8x128xf32>
    %798 = arith.mulf %797, %784 : vector<8x128xf32>
    %cst_280 = arith.constant 2.000000e-03 : f32
    %799 = vector.broadcast %cst_280 : f32 to vector<8x128xf32>
    %800 = arith.mulf %799, %796 : vector<8x128xf32>
    %801 = arith.addf %798, %800 : vector<8x128xf32>
    %cst_281 = arith.constant 3.000000e+01 : f32
    %802 = vector.broadcast %cst_281 : f32 to vector<8x128xf32>
    %803 = arith.cmpf oge, %796, %802 : vector<8x128xf32>
    %cst_282 = arith.constant -6.500000e+01 : f32
    %804 = vector.broadcast %cst_282 : f32 to vector<8x128xf32>
    %805 = arith.select %803, %804, %796 : vector<8x128xi1>, vector<8x128xf32>
    %cst_283 = arith.constant 8.000000e+00 : f32
    %806 = vector.broadcast %cst_283 : f32 to vector<8x128xf32>
    %807 = arith.addf %801, %806 : vector<8x128xf32>
    %808 = arith.select %803, %807, %801 : vector<8x128xi1>, vector<8x128xf32>
    %809 = arith.extui %803 : vector<8x128xi1> to vector<8x128xi32>
    %810 = arith.sitofp %809 : vector<8x128xi32> to vector<8x128xf32>
    %811 = arith.addf %787, %810 : vector<8x128xf32>
    %c32_i32 = arith.constant 32 : i32
    %cst_284 = arith.constant 2.000000e-02 : f32
    %812 = vector.broadcast %cst_284 : f32 to vector<8x128xf32>
    %813 = arith.mulf %812, %805 : vector<8x128xf32>
    %cst_285 = arith.constant 3.500000e+00 : f32
    %814 = vector.broadcast %cst_285 : f32 to vector<8x128xf32>
    %815 = arith.addf %813, %814 : vector<8x128xf32>
    %816 = arith.mulf %805, %815 : vector<8x128xf32>
    %cst_286 = arith.constant 5.000000e-01 : f32
    %817 = vector.broadcast %cst_286 : f32 to vector<8x128xf32>
    %818 = arith.mulf %817, %808 : vector<8x128xf32>
    %819 = arith.subf %40, %818 : vector<8x128xf32>
    %820 = arith.addf %816, %819 : vector<8x128xf32>
    %cst_287 = arith.constant 9.900000e-01 : f32
    %821 = vector.broadcast %cst_287 : f32 to vector<8x128xf32>
    %822 = arith.mulf %821, %808 : vector<8x128xf32>
    %cst_288 = arith.constant 2.000000e-03 : f32
    %823 = vector.broadcast %cst_288 : f32 to vector<8x128xf32>
    %824 = arith.mulf %823, %820 : vector<8x128xf32>
    %825 = arith.addf %822, %824 : vector<8x128xf32>
    %cst_289 = arith.constant 3.000000e+01 : f32
    %826 = vector.broadcast %cst_289 : f32 to vector<8x128xf32>
    %827 = arith.cmpf oge, %820, %826 : vector<8x128xf32>
    %cst_290 = arith.constant -6.500000e+01 : f32
    %828 = vector.broadcast %cst_290 : f32 to vector<8x128xf32>
    %829 = arith.select %827, %828, %820 : vector<8x128xi1>, vector<8x128xf32>
    %cst_291 = arith.constant 8.000000e+00 : f32
    %830 = vector.broadcast %cst_291 : f32 to vector<8x128xf32>
    %831 = arith.addf %825, %830 : vector<8x128xf32>
    %832 = arith.select %827, %831, %825 : vector<8x128xi1>, vector<8x128xf32>
    %833 = arith.extui %827 : vector<8x128xi1> to vector<8x128xi32>
    %834 = arith.sitofp %833 : vector<8x128xi32> to vector<8x128xf32>
    %835 = arith.addf %811, %834 : vector<8x128xf32>
    %c33_i32 = arith.constant 33 : i32
    %cst_292 = arith.constant 2.000000e-02 : f32
    %836 = vector.broadcast %cst_292 : f32 to vector<8x128xf32>
    %837 = arith.mulf %836, %829 : vector<8x128xf32>
    %cst_293 = arith.constant 3.500000e+00 : f32
    %838 = vector.broadcast %cst_293 : f32 to vector<8x128xf32>
    %839 = arith.addf %837, %838 : vector<8x128xf32>
    %840 = arith.mulf %829, %839 : vector<8x128xf32>
    %cst_294 = arith.constant 5.000000e-01 : f32
    %841 = vector.broadcast %cst_294 : f32 to vector<8x128xf32>
    %842 = arith.mulf %841, %832 : vector<8x128xf32>
    %843 = arith.subf %40, %842 : vector<8x128xf32>
    %844 = arith.addf %840, %843 : vector<8x128xf32>
    %cst_295 = arith.constant 9.900000e-01 : f32
    %845 = vector.broadcast %cst_295 : f32 to vector<8x128xf32>
    %846 = arith.mulf %845, %832 : vector<8x128xf32>
    %cst_296 = arith.constant 2.000000e-03 : f32
    %847 = vector.broadcast %cst_296 : f32 to vector<8x128xf32>
    %848 = arith.mulf %847, %844 : vector<8x128xf32>
    %849 = arith.addf %846, %848 : vector<8x128xf32>
    %cst_297 = arith.constant 3.000000e+01 : f32
    %850 = vector.broadcast %cst_297 : f32 to vector<8x128xf32>
    %851 = arith.cmpf oge, %844, %850 : vector<8x128xf32>
    %cst_298 = arith.constant -6.500000e+01 : f32
    %852 = vector.broadcast %cst_298 : f32 to vector<8x128xf32>
    %853 = arith.select %851, %852, %844 : vector<8x128xi1>, vector<8x128xf32>
    %cst_299 = arith.constant 8.000000e+00 : f32
    %854 = vector.broadcast %cst_299 : f32 to vector<8x128xf32>
    %855 = arith.addf %849, %854 : vector<8x128xf32>
    %856 = arith.select %851, %855, %849 : vector<8x128xi1>, vector<8x128xf32>
    %857 = arith.extui %851 : vector<8x128xi1> to vector<8x128xi32>
    %858 = arith.sitofp %857 : vector<8x128xi32> to vector<8x128xf32>
    %859 = arith.addf %835, %858 : vector<8x128xf32>
    %c34_i32 = arith.constant 34 : i32
    %cst_300 = arith.constant 2.000000e-02 : f32
    %860 = vector.broadcast %cst_300 : f32 to vector<8x128xf32>
    %861 = arith.mulf %860, %853 : vector<8x128xf32>
    %cst_301 = arith.constant 3.500000e+00 : f32
    %862 = vector.broadcast %cst_301 : f32 to vector<8x128xf32>
    %863 = arith.addf %861, %862 : vector<8x128xf32>
    %864 = arith.mulf %853, %863 : vector<8x128xf32>
    %cst_302 = arith.constant 5.000000e-01 : f32
    %865 = vector.broadcast %cst_302 : f32 to vector<8x128xf32>
    %866 = arith.mulf %865, %856 : vector<8x128xf32>
    %867 = arith.subf %40, %866 : vector<8x128xf32>
    %868 = arith.addf %864, %867 : vector<8x128xf32>
    %cst_303 = arith.constant 9.900000e-01 : f32
    %869 = vector.broadcast %cst_303 : f32 to vector<8x128xf32>
    %870 = arith.mulf %869, %856 : vector<8x128xf32>
    %cst_304 = arith.constant 2.000000e-03 : f32
    %871 = vector.broadcast %cst_304 : f32 to vector<8x128xf32>
    %872 = arith.mulf %871, %868 : vector<8x128xf32>
    %873 = arith.addf %870, %872 : vector<8x128xf32>
    %cst_305 = arith.constant 3.000000e+01 : f32
    %874 = vector.broadcast %cst_305 : f32 to vector<8x128xf32>
    %875 = arith.cmpf oge, %868, %874 : vector<8x128xf32>
    %cst_306 = arith.constant -6.500000e+01 : f32
    %876 = vector.broadcast %cst_306 : f32 to vector<8x128xf32>
    %877 = arith.select %875, %876, %868 : vector<8x128xi1>, vector<8x128xf32>
    %cst_307 = arith.constant 8.000000e+00 : f32
    %878 = vector.broadcast %cst_307 : f32 to vector<8x128xf32>
    %879 = arith.addf %873, %878 : vector<8x128xf32>
    %880 = arith.select %875, %879, %873 : vector<8x128xi1>, vector<8x128xf32>
    %881 = arith.extui %875 : vector<8x128xi1> to vector<8x128xi32>
    %882 = arith.sitofp %881 : vector<8x128xi32> to vector<8x128xf32>
    %883 = arith.addf %859, %882 : vector<8x128xf32>
    %c35_i32 = arith.constant 35 : i32
    %cst_308 = arith.constant 2.000000e-02 : f32
    %884 = vector.broadcast %cst_308 : f32 to vector<8x128xf32>
    %885 = arith.mulf %884, %877 : vector<8x128xf32>
    %cst_309 = arith.constant 3.500000e+00 : f32
    %886 = vector.broadcast %cst_309 : f32 to vector<8x128xf32>
    %887 = arith.addf %885, %886 : vector<8x128xf32>
    %888 = arith.mulf %877, %887 : vector<8x128xf32>
    %cst_310 = arith.constant 5.000000e-01 : f32
    %889 = vector.broadcast %cst_310 : f32 to vector<8x128xf32>
    %890 = arith.mulf %889, %880 : vector<8x128xf32>
    %891 = arith.subf %40, %890 : vector<8x128xf32>
    %892 = arith.addf %888, %891 : vector<8x128xf32>
    %cst_311 = arith.constant 9.900000e-01 : f32
    %893 = vector.broadcast %cst_311 : f32 to vector<8x128xf32>
    %894 = arith.mulf %893, %880 : vector<8x128xf32>
    %cst_312 = arith.constant 2.000000e-03 : f32
    %895 = vector.broadcast %cst_312 : f32 to vector<8x128xf32>
    %896 = arith.mulf %895, %892 : vector<8x128xf32>
    %897 = arith.addf %894, %896 : vector<8x128xf32>
    %cst_313 = arith.constant 3.000000e+01 : f32
    %898 = vector.broadcast %cst_313 : f32 to vector<8x128xf32>
    %899 = arith.cmpf oge, %892, %898 : vector<8x128xf32>
    %cst_314 = arith.constant -6.500000e+01 : f32
    %900 = vector.broadcast %cst_314 : f32 to vector<8x128xf32>
    %901 = arith.select %899, %900, %892 : vector<8x128xi1>, vector<8x128xf32>
    %cst_315 = arith.constant 8.000000e+00 : f32
    %902 = vector.broadcast %cst_315 : f32 to vector<8x128xf32>
    %903 = arith.addf %897, %902 : vector<8x128xf32>
    %904 = arith.select %899, %903, %897 : vector<8x128xi1>, vector<8x128xf32>
    %905 = arith.extui %899 : vector<8x128xi1> to vector<8x128xi32>
    %906 = arith.sitofp %905 : vector<8x128xi32> to vector<8x128xf32>
    %907 = arith.addf %883, %906 : vector<8x128xf32>
    %c36_i32 = arith.constant 36 : i32
    %cst_316 = arith.constant 2.000000e-02 : f32
    %908 = vector.broadcast %cst_316 : f32 to vector<8x128xf32>
    %909 = arith.mulf %908, %901 : vector<8x128xf32>
    %cst_317 = arith.constant 3.500000e+00 : f32
    %910 = vector.broadcast %cst_317 : f32 to vector<8x128xf32>
    %911 = arith.addf %909, %910 : vector<8x128xf32>
    %912 = arith.mulf %901, %911 : vector<8x128xf32>
    %cst_318 = arith.constant 5.000000e-01 : f32
    %913 = vector.broadcast %cst_318 : f32 to vector<8x128xf32>
    %914 = arith.mulf %913, %904 : vector<8x128xf32>
    %915 = arith.subf %40, %914 : vector<8x128xf32>
    %916 = arith.addf %912, %915 : vector<8x128xf32>
    %cst_319 = arith.constant 9.900000e-01 : f32
    %917 = vector.broadcast %cst_319 : f32 to vector<8x128xf32>
    %918 = arith.mulf %917, %904 : vector<8x128xf32>
    %cst_320 = arith.constant 2.000000e-03 : f32
    %919 = vector.broadcast %cst_320 : f32 to vector<8x128xf32>
    %920 = arith.mulf %919, %916 : vector<8x128xf32>
    %921 = arith.addf %918, %920 : vector<8x128xf32>
    %cst_321 = arith.constant 3.000000e+01 : f32
    %922 = vector.broadcast %cst_321 : f32 to vector<8x128xf32>
    %923 = arith.cmpf oge, %916, %922 : vector<8x128xf32>
    %cst_322 = arith.constant -6.500000e+01 : f32
    %924 = vector.broadcast %cst_322 : f32 to vector<8x128xf32>
    %925 = arith.select %923, %924, %916 : vector<8x128xi1>, vector<8x128xf32>
    %cst_323 = arith.constant 8.000000e+00 : f32
    %926 = vector.broadcast %cst_323 : f32 to vector<8x128xf32>
    %927 = arith.addf %921, %926 : vector<8x128xf32>
    %928 = arith.select %923, %927, %921 : vector<8x128xi1>, vector<8x128xf32>
    %929 = arith.extui %923 : vector<8x128xi1> to vector<8x128xi32>
    %930 = arith.sitofp %929 : vector<8x128xi32> to vector<8x128xf32>
    %931 = arith.addf %907, %930 : vector<8x128xf32>
    %c37_i32 = arith.constant 37 : i32
    %cst_324 = arith.constant 2.000000e-02 : f32
    %932 = vector.broadcast %cst_324 : f32 to vector<8x128xf32>
    %933 = arith.mulf %932, %925 : vector<8x128xf32>
    %cst_325 = arith.constant 3.500000e+00 : f32
    %934 = vector.broadcast %cst_325 : f32 to vector<8x128xf32>
    %935 = arith.addf %933, %934 : vector<8x128xf32>
    %936 = arith.mulf %925, %935 : vector<8x128xf32>
    %cst_326 = arith.constant 5.000000e-01 : f32
    %937 = vector.broadcast %cst_326 : f32 to vector<8x128xf32>
    %938 = arith.mulf %937, %928 : vector<8x128xf32>
    %939 = arith.subf %40, %938 : vector<8x128xf32>
    %940 = arith.addf %936, %939 : vector<8x128xf32>
    %cst_327 = arith.constant 9.900000e-01 : f32
    %941 = vector.broadcast %cst_327 : f32 to vector<8x128xf32>
    %942 = arith.mulf %941, %928 : vector<8x128xf32>
    %cst_328 = arith.constant 2.000000e-03 : f32
    %943 = vector.broadcast %cst_328 : f32 to vector<8x128xf32>
    %944 = arith.mulf %943, %940 : vector<8x128xf32>
    %945 = arith.addf %942, %944 : vector<8x128xf32>
    %cst_329 = arith.constant 3.000000e+01 : f32
    %946 = vector.broadcast %cst_329 : f32 to vector<8x128xf32>
    %947 = arith.cmpf oge, %940, %946 : vector<8x128xf32>
    %cst_330 = arith.constant -6.500000e+01 : f32
    %948 = vector.broadcast %cst_330 : f32 to vector<8x128xf32>
    %949 = arith.select %947, %948, %940 : vector<8x128xi1>, vector<8x128xf32>
    %cst_331 = arith.constant 8.000000e+00 : f32
    %950 = vector.broadcast %cst_331 : f32 to vector<8x128xf32>
    %951 = arith.addf %945, %950 : vector<8x128xf32>
    %952 = arith.select %947, %951, %945 : vector<8x128xi1>, vector<8x128xf32>
    %953 = arith.extui %947 : vector<8x128xi1> to vector<8x128xi32>
    %954 = arith.sitofp %953 : vector<8x128xi32> to vector<8x128xf32>
    %955 = arith.addf %931, %954 : vector<8x128xf32>
    %c38_i32 = arith.constant 38 : i32
    %cst_332 = arith.constant 2.000000e-02 : f32
    %956 = vector.broadcast %cst_332 : f32 to vector<8x128xf32>
    %957 = arith.mulf %956, %949 : vector<8x128xf32>
    %cst_333 = arith.constant 3.500000e+00 : f32
    %958 = vector.broadcast %cst_333 : f32 to vector<8x128xf32>
    %959 = arith.addf %957, %958 : vector<8x128xf32>
    %960 = arith.mulf %949, %959 : vector<8x128xf32>
    %cst_334 = arith.constant 5.000000e-01 : f32
    %961 = vector.broadcast %cst_334 : f32 to vector<8x128xf32>
    %962 = arith.mulf %961, %952 : vector<8x128xf32>
    %963 = arith.subf %40, %962 : vector<8x128xf32>
    %964 = arith.addf %960, %963 : vector<8x128xf32>
    %cst_335 = arith.constant 9.900000e-01 : f32
    %965 = vector.broadcast %cst_335 : f32 to vector<8x128xf32>
    %966 = arith.mulf %965, %952 : vector<8x128xf32>
    %cst_336 = arith.constant 2.000000e-03 : f32
    %967 = vector.broadcast %cst_336 : f32 to vector<8x128xf32>
    %968 = arith.mulf %967, %964 : vector<8x128xf32>
    %969 = arith.addf %966, %968 : vector<8x128xf32>
    %cst_337 = arith.constant 3.000000e+01 : f32
    %970 = vector.broadcast %cst_337 : f32 to vector<8x128xf32>
    %971 = arith.cmpf oge, %964, %970 : vector<8x128xf32>
    %cst_338 = arith.constant -6.500000e+01 : f32
    %972 = vector.broadcast %cst_338 : f32 to vector<8x128xf32>
    %973 = arith.select %971, %972, %964 : vector<8x128xi1>, vector<8x128xf32>
    %cst_339 = arith.constant 8.000000e+00 : f32
    %974 = vector.broadcast %cst_339 : f32 to vector<8x128xf32>
    %975 = arith.addf %969, %974 : vector<8x128xf32>
    %976 = arith.select %971, %975, %969 : vector<8x128xi1>, vector<8x128xf32>
    %977 = arith.extui %971 : vector<8x128xi1> to vector<8x128xi32>
    %978 = arith.sitofp %977 : vector<8x128xi32> to vector<8x128xf32>
    %979 = arith.addf %955, %978 : vector<8x128xf32>
    %c39_i32 = arith.constant 39 : i32
    %cst_340 = arith.constant 2.000000e-02 : f32
    %980 = vector.broadcast %cst_340 : f32 to vector<8x128xf32>
    %981 = arith.mulf %980, %973 : vector<8x128xf32>
    %cst_341 = arith.constant 3.500000e+00 : f32
    %982 = vector.broadcast %cst_341 : f32 to vector<8x128xf32>
    %983 = arith.addf %981, %982 : vector<8x128xf32>
    %984 = arith.mulf %973, %983 : vector<8x128xf32>
    %cst_342 = arith.constant 5.000000e-01 : f32
    %985 = vector.broadcast %cst_342 : f32 to vector<8x128xf32>
    %986 = arith.mulf %985, %976 : vector<8x128xf32>
    %987 = arith.subf %40, %986 : vector<8x128xf32>
    %988 = arith.addf %984, %987 : vector<8x128xf32>
    %cst_343 = arith.constant 9.900000e-01 : f32
    %989 = vector.broadcast %cst_343 : f32 to vector<8x128xf32>
    %990 = arith.mulf %989, %976 : vector<8x128xf32>
    %cst_344 = arith.constant 2.000000e-03 : f32
    %991 = vector.broadcast %cst_344 : f32 to vector<8x128xf32>
    %992 = arith.mulf %991, %988 : vector<8x128xf32>
    %993 = arith.addf %990, %992 : vector<8x128xf32>
    %cst_345 = arith.constant 3.000000e+01 : f32
    %994 = vector.broadcast %cst_345 : f32 to vector<8x128xf32>
    %995 = arith.cmpf oge, %988, %994 : vector<8x128xf32>
    %cst_346 = arith.constant -6.500000e+01 : f32
    %996 = vector.broadcast %cst_346 : f32 to vector<8x128xf32>
    %997 = arith.select %995, %996, %988 : vector<8x128xi1>, vector<8x128xf32>
    %cst_347 = arith.constant 8.000000e+00 : f32
    %998 = vector.broadcast %cst_347 : f32 to vector<8x128xf32>
    %999 = arith.addf %993, %998 : vector<8x128xf32>
    %1000 = arith.select %995, %999, %993 : vector<8x128xi1>, vector<8x128xf32>
    %1001 = arith.extui %995 : vector<8x128xi1> to vector<8x128xi32>
    %1002 = arith.sitofp %1001 : vector<8x128xi32> to vector<8x128xf32>
    %1003 = arith.addf %979, %1002 : vector<8x128xf32>
    %c40_i32 = arith.constant 40 : i32
    %cst_348 = arith.constant 2.000000e-02 : f32
    %1004 = vector.broadcast %cst_348 : f32 to vector<8x128xf32>
    %1005 = arith.mulf %1004, %997 : vector<8x128xf32>
    %cst_349 = arith.constant 3.500000e+00 : f32
    %1006 = vector.broadcast %cst_349 : f32 to vector<8x128xf32>
    %1007 = arith.addf %1005, %1006 : vector<8x128xf32>
    %1008 = arith.mulf %997, %1007 : vector<8x128xf32>
    %cst_350 = arith.constant 5.000000e-01 : f32
    %1009 = vector.broadcast %cst_350 : f32 to vector<8x128xf32>
    %1010 = arith.mulf %1009, %1000 : vector<8x128xf32>
    %1011 = arith.subf %40, %1010 : vector<8x128xf32>
    %1012 = arith.addf %1008, %1011 : vector<8x128xf32>
    %cst_351 = arith.constant 9.900000e-01 : f32
    %1013 = vector.broadcast %cst_351 : f32 to vector<8x128xf32>
    %1014 = arith.mulf %1013, %1000 : vector<8x128xf32>
    %cst_352 = arith.constant 2.000000e-03 : f32
    %1015 = vector.broadcast %cst_352 : f32 to vector<8x128xf32>
    %1016 = arith.mulf %1015, %1012 : vector<8x128xf32>
    %1017 = arith.addf %1014, %1016 : vector<8x128xf32>
    %cst_353 = arith.constant 3.000000e+01 : f32
    %1018 = vector.broadcast %cst_353 : f32 to vector<8x128xf32>
    %1019 = arith.cmpf oge, %1012, %1018 : vector<8x128xf32>
    %cst_354 = arith.constant -6.500000e+01 : f32
    %1020 = vector.broadcast %cst_354 : f32 to vector<8x128xf32>
    %1021 = arith.select %1019, %1020, %1012 : vector<8x128xi1>, vector<8x128xf32>
    %cst_355 = arith.constant 8.000000e+00 : f32
    %1022 = vector.broadcast %cst_355 : f32 to vector<8x128xf32>
    %1023 = arith.addf %1017, %1022 : vector<8x128xf32>
    %1024 = arith.select %1019, %1023, %1017 : vector<8x128xi1>, vector<8x128xf32>
    %1025 = arith.extui %1019 : vector<8x128xi1> to vector<8x128xi32>
    %1026 = arith.sitofp %1025 : vector<8x128xi32> to vector<8x128xf32>
    %1027 = arith.addf %1003, %1026 : vector<8x128xf32>
    %c41_i32 = arith.constant 41 : i32
    %cst_356 = arith.constant 2.000000e-02 : f32
    %1028 = vector.broadcast %cst_356 : f32 to vector<8x128xf32>
    %1029 = arith.mulf %1028, %1021 : vector<8x128xf32>
    %cst_357 = arith.constant 3.500000e+00 : f32
    %1030 = vector.broadcast %cst_357 : f32 to vector<8x128xf32>
    %1031 = arith.addf %1029, %1030 : vector<8x128xf32>
    %1032 = arith.mulf %1021, %1031 : vector<8x128xf32>
    %cst_358 = arith.constant 5.000000e-01 : f32
    %1033 = vector.broadcast %cst_358 : f32 to vector<8x128xf32>
    %1034 = arith.mulf %1033, %1024 : vector<8x128xf32>
    %1035 = arith.subf %40, %1034 : vector<8x128xf32>
    %1036 = arith.addf %1032, %1035 : vector<8x128xf32>
    %cst_359 = arith.constant 9.900000e-01 : f32
    %1037 = vector.broadcast %cst_359 : f32 to vector<8x128xf32>
    %1038 = arith.mulf %1037, %1024 : vector<8x128xf32>
    %cst_360 = arith.constant 2.000000e-03 : f32
    %1039 = vector.broadcast %cst_360 : f32 to vector<8x128xf32>
    %1040 = arith.mulf %1039, %1036 : vector<8x128xf32>
    %1041 = arith.addf %1038, %1040 : vector<8x128xf32>
    %cst_361 = arith.constant 3.000000e+01 : f32
    %1042 = vector.broadcast %cst_361 : f32 to vector<8x128xf32>
    %1043 = arith.cmpf oge, %1036, %1042 : vector<8x128xf32>
    %cst_362 = arith.constant -6.500000e+01 : f32
    %1044 = vector.broadcast %cst_362 : f32 to vector<8x128xf32>
    %1045 = arith.select %1043, %1044, %1036 : vector<8x128xi1>, vector<8x128xf32>
    %cst_363 = arith.constant 8.000000e+00 : f32
    %1046 = vector.broadcast %cst_363 : f32 to vector<8x128xf32>
    %1047 = arith.addf %1041, %1046 : vector<8x128xf32>
    %1048 = arith.select %1043, %1047, %1041 : vector<8x128xi1>, vector<8x128xf32>
    %1049 = arith.extui %1043 : vector<8x128xi1> to vector<8x128xi32>
    %1050 = arith.sitofp %1049 : vector<8x128xi32> to vector<8x128xf32>
    %1051 = arith.addf %1027, %1050 : vector<8x128xf32>
    %c42_i32 = arith.constant 42 : i32
    %cst_364 = arith.constant 2.000000e-02 : f32
    %1052 = vector.broadcast %cst_364 : f32 to vector<8x128xf32>
    %1053 = arith.mulf %1052, %1045 : vector<8x128xf32>
    %cst_365 = arith.constant 3.500000e+00 : f32
    %1054 = vector.broadcast %cst_365 : f32 to vector<8x128xf32>
    %1055 = arith.addf %1053, %1054 : vector<8x128xf32>
    %1056 = arith.mulf %1045, %1055 : vector<8x128xf32>
    %cst_366 = arith.constant 5.000000e-01 : f32
    %1057 = vector.broadcast %cst_366 : f32 to vector<8x128xf32>
    %1058 = arith.mulf %1057, %1048 : vector<8x128xf32>
    %1059 = arith.subf %40, %1058 : vector<8x128xf32>
    %1060 = arith.addf %1056, %1059 : vector<8x128xf32>
    %cst_367 = arith.constant 9.900000e-01 : f32
    %1061 = vector.broadcast %cst_367 : f32 to vector<8x128xf32>
    %1062 = arith.mulf %1061, %1048 : vector<8x128xf32>
    %cst_368 = arith.constant 2.000000e-03 : f32
    %1063 = vector.broadcast %cst_368 : f32 to vector<8x128xf32>
    %1064 = arith.mulf %1063, %1060 : vector<8x128xf32>
    %1065 = arith.addf %1062, %1064 : vector<8x128xf32>
    %cst_369 = arith.constant 3.000000e+01 : f32
    %1066 = vector.broadcast %cst_369 : f32 to vector<8x128xf32>
    %1067 = arith.cmpf oge, %1060, %1066 : vector<8x128xf32>
    %cst_370 = arith.constant -6.500000e+01 : f32
    %1068 = vector.broadcast %cst_370 : f32 to vector<8x128xf32>
    %1069 = arith.select %1067, %1068, %1060 : vector<8x128xi1>, vector<8x128xf32>
    %cst_371 = arith.constant 8.000000e+00 : f32
    %1070 = vector.broadcast %cst_371 : f32 to vector<8x128xf32>
    %1071 = arith.addf %1065, %1070 : vector<8x128xf32>
    %1072 = arith.select %1067, %1071, %1065 : vector<8x128xi1>, vector<8x128xf32>
    %1073 = arith.extui %1067 : vector<8x128xi1> to vector<8x128xi32>
    %1074 = arith.sitofp %1073 : vector<8x128xi32> to vector<8x128xf32>
    %1075 = arith.addf %1051, %1074 : vector<8x128xf32>
    %c43_i32 = arith.constant 43 : i32
    %cst_372 = arith.constant 2.000000e-02 : f32
    %1076 = vector.broadcast %cst_372 : f32 to vector<8x128xf32>
    %1077 = arith.mulf %1076, %1069 : vector<8x128xf32>
    %cst_373 = arith.constant 3.500000e+00 : f32
    %1078 = vector.broadcast %cst_373 : f32 to vector<8x128xf32>
    %1079 = arith.addf %1077, %1078 : vector<8x128xf32>
    %1080 = arith.mulf %1069, %1079 : vector<8x128xf32>
    %cst_374 = arith.constant 5.000000e-01 : f32
    %1081 = vector.broadcast %cst_374 : f32 to vector<8x128xf32>
    %1082 = arith.mulf %1081, %1072 : vector<8x128xf32>
    %1083 = arith.subf %40, %1082 : vector<8x128xf32>
    %1084 = arith.addf %1080, %1083 : vector<8x128xf32>
    %cst_375 = arith.constant 9.900000e-01 : f32
    %1085 = vector.broadcast %cst_375 : f32 to vector<8x128xf32>
    %1086 = arith.mulf %1085, %1072 : vector<8x128xf32>
    %cst_376 = arith.constant 2.000000e-03 : f32
    %1087 = vector.broadcast %cst_376 : f32 to vector<8x128xf32>
    %1088 = arith.mulf %1087, %1084 : vector<8x128xf32>
    %1089 = arith.addf %1086, %1088 : vector<8x128xf32>
    %cst_377 = arith.constant 3.000000e+01 : f32
    %1090 = vector.broadcast %cst_377 : f32 to vector<8x128xf32>
    %1091 = arith.cmpf oge, %1084, %1090 : vector<8x128xf32>
    %cst_378 = arith.constant -6.500000e+01 : f32
    %1092 = vector.broadcast %cst_378 : f32 to vector<8x128xf32>
    %1093 = arith.select %1091, %1092, %1084 : vector<8x128xi1>, vector<8x128xf32>
    %cst_379 = arith.constant 8.000000e+00 : f32
    %1094 = vector.broadcast %cst_379 : f32 to vector<8x128xf32>
    %1095 = arith.addf %1089, %1094 : vector<8x128xf32>
    %1096 = arith.select %1091, %1095, %1089 : vector<8x128xi1>, vector<8x128xf32>
    %1097 = arith.extui %1091 : vector<8x128xi1> to vector<8x128xi32>
    %1098 = arith.sitofp %1097 : vector<8x128xi32> to vector<8x128xf32>
    %1099 = arith.addf %1075, %1098 : vector<8x128xf32>
    %c44_i32 = arith.constant 44 : i32
    %cst_380 = arith.constant 2.000000e-02 : f32
    %1100 = vector.broadcast %cst_380 : f32 to vector<8x128xf32>
    %1101 = arith.mulf %1100, %1093 : vector<8x128xf32>
    %cst_381 = arith.constant 3.500000e+00 : f32
    %1102 = vector.broadcast %cst_381 : f32 to vector<8x128xf32>
    %1103 = arith.addf %1101, %1102 : vector<8x128xf32>
    %1104 = arith.mulf %1093, %1103 : vector<8x128xf32>
    %cst_382 = arith.constant 5.000000e-01 : f32
    %1105 = vector.broadcast %cst_382 : f32 to vector<8x128xf32>
    %1106 = arith.mulf %1105, %1096 : vector<8x128xf32>
    %1107 = arith.subf %40, %1106 : vector<8x128xf32>
    %1108 = arith.addf %1104, %1107 : vector<8x128xf32>
    %cst_383 = arith.constant 9.900000e-01 : f32
    %1109 = vector.broadcast %cst_383 : f32 to vector<8x128xf32>
    %1110 = arith.mulf %1109, %1096 : vector<8x128xf32>
    %cst_384 = arith.constant 2.000000e-03 : f32
    %1111 = vector.broadcast %cst_384 : f32 to vector<8x128xf32>
    %1112 = arith.mulf %1111, %1108 : vector<8x128xf32>
    %1113 = arith.addf %1110, %1112 : vector<8x128xf32>
    %cst_385 = arith.constant 3.000000e+01 : f32
    %1114 = vector.broadcast %cst_385 : f32 to vector<8x128xf32>
    %1115 = arith.cmpf oge, %1108, %1114 : vector<8x128xf32>
    %cst_386 = arith.constant -6.500000e+01 : f32
    %1116 = vector.broadcast %cst_386 : f32 to vector<8x128xf32>
    %1117 = arith.select %1115, %1116, %1108 : vector<8x128xi1>, vector<8x128xf32>
    %cst_387 = arith.constant 8.000000e+00 : f32
    %1118 = vector.broadcast %cst_387 : f32 to vector<8x128xf32>
    %1119 = arith.addf %1113, %1118 : vector<8x128xf32>
    %1120 = arith.select %1115, %1119, %1113 : vector<8x128xi1>, vector<8x128xf32>
    %1121 = arith.extui %1115 : vector<8x128xi1> to vector<8x128xi32>
    %1122 = arith.sitofp %1121 : vector<8x128xi32> to vector<8x128xf32>
    %1123 = arith.addf %1099, %1122 : vector<8x128xf32>
    %c45_i32 = arith.constant 45 : i32
    %cst_388 = arith.constant 2.000000e-02 : f32
    %1124 = vector.broadcast %cst_388 : f32 to vector<8x128xf32>
    %1125 = arith.mulf %1124, %1117 : vector<8x128xf32>
    %cst_389 = arith.constant 3.500000e+00 : f32
    %1126 = vector.broadcast %cst_389 : f32 to vector<8x128xf32>
    %1127 = arith.addf %1125, %1126 : vector<8x128xf32>
    %1128 = arith.mulf %1117, %1127 : vector<8x128xf32>
    %cst_390 = arith.constant 5.000000e-01 : f32
    %1129 = vector.broadcast %cst_390 : f32 to vector<8x128xf32>
    %1130 = arith.mulf %1129, %1120 : vector<8x128xf32>
    %1131 = arith.subf %40, %1130 : vector<8x128xf32>
    %1132 = arith.addf %1128, %1131 : vector<8x128xf32>
    %cst_391 = arith.constant 9.900000e-01 : f32
    %1133 = vector.broadcast %cst_391 : f32 to vector<8x128xf32>
    %1134 = arith.mulf %1133, %1120 : vector<8x128xf32>
    %cst_392 = arith.constant 2.000000e-03 : f32
    %1135 = vector.broadcast %cst_392 : f32 to vector<8x128xf32>
    %1136 = arith.mulf %1135, %1132 : vector<8x128xf32>
    %1137 = arith.addf %1134, %1136 : vector<8x128xf32>
    %cst_393 = arith.constant 3.000000e+01 : f32
    %1138 = vector.broadcast %cst_393 : f32 to vector<8x128xf32>
    %1139 = arith.cmpf oge, %1132, %1138 : vector<8x128xf32>
    %cst_394 = arith.constant -6.500000e+01 : f32
    %1140 = vector.broadcast %cst_394 : f32 to vector<8x128xf32>
    %1141 = arith.select %1139, %1140, %1132 : vector<8x128xi1>, vector<8x128xf32>
    %cst_395 = arith.constant 8.000000e+00 : f32
    %1142 = vector.broadcast %cst_395 : f32 to vector<8x128xf32>
    %1143 = arith.addf %1137, %1142 : vector<8x128xf32>
    %1144 = arith.select %1139, %1143, %1137 : vector<8x128xi1>, vector<8x128xf32>
    %1145 = arith.extui %1139 : vector<8x128xi1> to vector<8x128xi32>
    %1146 = arith.sitofp %1145 : vector<8x128xi32> to vector<8x128xf32>
    %1147 = arith.addf %1123, %1146 : vector<8x128xf32>
    %c46_i32 = arith.constant 46 : i32
    %cst_396 = arith.constant 2.000000e-02 : f32
    %1148 = vector.broadcast %cst_396 : f32 to vector<8x128xf32>
    %1149 = arith.mulf %1148, %1141 : vector<8x128xf32>
    %cst_397 = arith.constant 3.500000e+00 : f32
    %1150 = vector.broadcast %cst_397 : f32 to vector<8x128xf32>
    %1151 = arith.addf %1149, %1150 : vector<8x128xf32>
    %1152 = arith.mulf %1141, %1151 : vector<8x128xf32>
    %cst_398 = arith.constant 5.000000e-01 : f32
    %1153 = vector.broadcast %cst_398 : f32 to vector<8x128xf32>
    %1154 = arith.mulf %1153, %1144 : vector<8x128xf32>
    %1155 = arith.subf %40, %1154 : vector<8x128xf32>
    %1156 = arith.addf %1152, %1155 : vector<8x128xf32>
    %cst_399 = arith.constant 9.900000e-01 : f32
    %1157 = vector.broadcast %cst_399 : f32 to vector<8x128xf32>
    %1158 = arith.mulf %1157, %1144 : vector<8x128xf32>
    %cst_400 = arith.constant 2.000000e-03 : f32
    %1159 = vector.broadcast %cst_400 : f32 to vector<8x128xf32>
    %1160 = arith.mulf %1159, %1156 : vector<8x128xf32>
    %1161 = arith.addf %1158, %1160 : vector<8x128xf32>
    %cst_401 = arith.constant 3.000000e+01 : f32
    %1162 = vector.broadcast %cst_401 : f32 to vector<8x128xf32>
    %1163 = arith.cmpf oge, %1156, %1162 : vector<8x128xf32>
    %cst_402 = arith.constant -6.500000e+01 : f32
    %1164 = vector.broadcast %cst_402 : f32 to vector<8x128xf32>
    %1165 = arith.select %1163, %1164, %1156 : vector<8x128xi1>, vector<8x128xf32>
    %cst_403 = arith.constant 8.000000e+00 : f32
    %1166 = vector.broadcast %cst_403 : f32 to vector<8x128xf32>
    %1167 = arith.addf %1161, %1166 : vector<8x128xf32>
    %1168 = arith.select %1163, %1167, %1161 : vector<8x128xi1>, vector<8x128xf32>
    %1169 = arith.extui %1163 : vector<8x128xi1> to vector<8x128xi32>
    %1170 = arith.sitofp %1169 : vector<8x128xi32> to vector<8x128xf32>
    %1171 = arith.addf %1147, %1170 : vector<8x128xf32>
    %c47_i32 = arith.constant 47 : i32
    %cst_404 = arith.constant 2.000000e-02 : f32
    %1172 = vector.broadcast %cst_404 : f32 to vector<8x128xf32>
    %1173 = arith.mulf %1172, %1165 : vector<8x128xf32>
    %cst_405 = arith.constant 3.500000e+00 : f32
    %1174 = vector.broadcast %cst_405 : f32 to vector<8x128xf32>
    %1175 = arith.addf %1173, %1174 : vector<8x128xf32>
    %1176 = arith.mulf %1165, %1175 : vector<8x128xf32>
    %cst_406 = arith.constant 5.000000e-01 : f32
    %1177 = vector.broadcast %cst_406 : f32 to vector<8x128xf32>
    %1178 = arith.mulf %1177, %1168 : vector<8x128xf32>
    %1179 = arith.subf %40, %1178 : vector<8x128xf32>
    %1180 = arith.addf %1176, %1179 : vector<8x128xf32>
    %cst_407 = arith.constant 9.900000e-01 : f32
    %1181 = vector.broadcast %cst_407 : f32 to vector<8x128xf32>
    %1182 = arith.mulf %1181, %1168 : vector<8x128xf32>
    %cst_408 = arith.constant 2.000000e-03 : f32
    %1183 = vector.broadcast %cst_408 : f32 to vector<8x128xf32>
    %1184 = arith.mulf %1183, %1180 : vector<8x128xf32>
    %1185 = arith.addf %1182, %1184 : vector<8x128xf32>
    %cst_409 = arith.constant 3.000000e+01 : f32
    %1186 = vector.broadcast %cst_409 : f32 to vector<8x128xf32>
    %1187 = arith.cmpf oge, %1180, %1186 : vector<8x128xf32>
    %cst_410 = arith.constant -6.500000e+01 : f32
    %1188 = vector.broadcast %cst_410 : f32 to vector<8x128xf32>
    %1189 = arith.select %1187, %1188, %1180 : vector<8x128xi1>, vector<8x128xf32>
    %cst_411 = arith.constant 8.000000e+00 : f32
    %1190 = vector.broadcast %cst_411 : f32 to vector<8x128xf32>
    %1191 = arith.addf %1185, %1190 : vector<8x128xf32>
    %1192 = arith.select %1187, %1191, %1185 : vector<8x128xi1>, vector<8x128xf32>
    %1193 = arith.extui %1187 : vector<8x128xi1> to vector<8x128xi32>
    %1194 = arith.sitofp %1193 : vector<8x128xi32> to vector<8x128xf32>
    %1195 = arith.addf %1171, %1194 : vector<8x128xf32>
    %c48_i32 = arith.constant 48 : i32
    %cst_412 = arith.constant 2.000000e-02 : f32
    %1196 = vector.broadcast %cst_412 : f32 to vector<8x128xf32>
    %1197 = arith.mulf %1196, %1189 : vector<8x128xf32>
    %cst_413 = arith.constant 3.500000e+00 : f32
    %1198 = vector.broadcast %cst_413 : f32 to vector<8x128xf32>
    %1199 = arith.addf %1197, %1198 : vector<8x128xf32>
    %1200 = arith.mulf %1189, %1199 : vector<8x128xf32>
    %cst_414 = arith.constant 5.000000e-01 : f32
    %1201 = vector.broadcast %cst_414 : f32 to vector<8x128xf32>
    %1202 = arith.mulf %1201, %1192 : vector<8x128xf32>
    %1203 = arith.subf %40, %1202 : vector<8x128xf32>
    %1204 = arith.addf %1200, %1203 : vector<8x128xf32>
    %cst_415 = arith.constant 9.900000e-01 : f32
    %1205 = vector.broadcast %cst_415 : f32 to vector<8x128xf32>
    %1206 = arith.mulf %1205, %1192 : vector<8x128xf32>
    %cst_416 = arith.constant 2.000000e-03 : f32
    %1207 = vector.broadcast %cst_416 : f32 to vector<8x128xf32>
    %1208 = arith.mulf %1207, %1204 : vector<8x128xf32>
    %1209 = arith.addf %1206, %1208 : vector<8x128xf32>
    %cst_417 = arith.constant 3.000000e+01 : f32
    %1210 = vector.broadcast %cst_417 : f32 to vector<8x128xf32>
    %1211 = arith.cmpf oge, %1204, %1210 : vector<8x128xf32>
    %cst_418 = arith.constant -6.500000e+01 : f32
    %1212 = vector.broadcast %cst_418 : f32 to vector<8x128xf32>
    %1213 = arith.select %1211, %1212, %1204 : vector<8x128xi1>, vector<8x128xf32>
    %cst_419 = arith.constant 8.000000e+00 : f32
    %1214 = vector.broadcast %cst_419 : f32 to vector<8x128xf32>
    %1215 = arith.addf %1209, %1214 : vector<8x128xf32>
    %1216 = arith.select %1211, %1215, %1209 : vector<8x128xi1>, vector<8x128xf32>
    %1217 = arith.extui %1211 : vector<8x128xi1> to vector<8x128xi32>
    %1218 = arith.sitofp %1217 : vector<8x128xi32> to vector<8x128xf32>
    %1219 = arith.addf %1195, %1218 : vector<8x128xf32>
    %c49_i32 = arith.constant 49 : i32
    %cst_420 = arith.constant 2.000000e-02 : f32
    %1220 = vector.broadcast %cst_420 : f32 to vector<8x128xf32>
    %1221 = arith.mulf %1220, %1213 : vector<8x128xf32>
    %cst_421 = arith.constant 3.500000e+00 : f32
    %1222 = vector.broadcast %cst_421 : f32 to vector<8x128xf32>
    %1223 = arith.addf %1221, %1222 : vector<8x128xf32>
    %1224 = arith.mulf %1213, %1223 : vector<8x128xf32>
    %cst_422 = arith.constant 5.000000e-01 : f32
    %1225 = vector.broadcast %cst_422 : f32 to vector<8x128xf32>
    %1226 = arith.mulf %1225, %1216 : vector<8x128xf32>
    %1227 = arith.subf %40, %1226 : vector<8x128xf32>
    %1228 = arith.addf %1224, %1227 : vector<8x128xf32>
    %cst_423 = arith.constant 9.900000e-01 : f32
    %1229 = vector.broadcast %cst_423 : f32 to vector<8x128xf32>
    %1230 = arith.mulf %1229, %1216 : vector<8x128xf32>
    %cst_424 = arith.constant 2.000000e-03 : f32
    %1231 = vector.broadcast %cst_424 : f32 to vector<8x128xf32>
    %1232 = arith.mulf %1231, %1228 : vector<8x128xf32>
    %1233 = arith.addf %1230, %1232 : vector<8x128xf32>
    %cst_425 = arith.constant 3.000000e+01 : f32
    %1234 = vector.broadcast %cst_425 : f32 to vector<8x128xf32>
    %1235 = arith.cmpf oge, %1228, %1234 : vector<8x128xf32>
    %cst_426 = arith.constant -6.500000e+01 : f32
    %1236 = vector.broadcast %cst_426 : f32 to vector<8x128xf32>
    %1237 = arith.select %1235, %1236, %1228 : vector<8x128xi1>, vector<8x128xf32>
    %cst_427 = arith.constant 8.000000e+00 : f32
    %1238 = vector.broadcast %cst_427 : f32 to vector<8x128xf32>
    %1239 = arith.addf %1233, %1238 : vector<8x128xf32>
    %1240 = arith.select %1235, %1239, %1233 : vector<8x128xi1>, vector<8x128xf32>
    %1241 = arith.extui %1235 : vector<8x128xi1> to vector<8x128xi32>
    %1242 = arith.sitofp %1241 : vector<8x128xi32> to vector<8x128xf32>
    %1243 = arith.addf %1219, %1242 : vector<8x128xf32>
    %cst_428 = arith.constant 2.000000e-02 : f32
    %1244 = vector.broadcast %cst_428 : f32 to vector<8x128xf32>
    %1245 = arith.mulf %1243, %1244 : vector<8x128xf32>
    %c0_429 = arith.constant 0 : index
    %c0_430 = arith.constant 0 : index
    %1246 = vector.load %arg4[%c0_429, %c0_430] : memref<8x128xf32, #tpu.memory_space<vmem>>, vector<8x128xf32>
    tpu.vector_store %arg4[%c0_429, %c0_430], %1245 {strides = array<i32>} : memref<8x128xf32, #tpu.memory_space<vmem>>, vector<8x128xf32>,
    return
  }
  func.func @transform_0(%arg0: i32) -> (i32, i32, i32) {
    %c0_i32 = arith.constant 0 : i32
    %c0_i32_0 = arith.constant 0 : i32
    %c0_i32_1 = arith.constant 0 : i32
    return %arg0, %c0_i32, %c0_i32_0 : i32, i32, i32
  }
  func.func @transform_1(%arg0: i32) -> (i32, i32) {
    %c0_i32 = arith.constant 0 : i32
    %c0_i32_0 = arith.constant 0 : i32
    %c0_i32_1 = arith.constant 0 : i32
    return %c0_i32, %c0_i32_0 : i32, i32
  }
  func.func @transform_2(%arg0: i32) -> (i32, i32) {
    %c0_i32 = arith.constant 0 : i32
    %c0_i32_0 = arith.constant 0 : i32
    return %arg0, %c0_i32 : i32, i32
  }
  func.func @transform_3(%arg0: i32) -> (i32, i32) {
    %c0_i32 = arith.constant 0 : i32
    %c0_i32_0 = arith.constant 0 : i32
    return %arg0, %c0_i32 : i32, i32
  }
  func.func @transform_4(%arg0: i32) -> (i32, i32) {
    %c0_i32 = arith.constant 0 : i32
    %c0_i32_0 = arith.constant 0 : i32
    return %arg0, %c0_i32 : i32, i32
  }
}

</mosaic_0001>

<bundles_post_ra>
// kernel: tpu_custom_call.1
= control target key start
LH: loop header
LB: loop body
LE: loop exit
PB: predicated region body
PF: predicated region fallthrough
CT: control target
= control target key end

     0   :  { %10 = vsyncpa [#allocation3], 0  ;;  %s2218_s0 = inlined_call_operand.hbm [shape: f32[16,4,128], index: 0, kind: input, shape index: {}]   ;;  %s2219_s1 = inlined_call_operand.hbm [shape: f32[4,128], index: 1, kind: input, shape index: {}]   ;;  %s2220_s2 = inlined_call_operand.hbm [shape: f32[16,128], index: 2, kind: input, shape index: {}]   ;;  %s2221_s3 = inlined_call_operand.hbm [shape: f32[16,128], index: 3, kind: output, shape index: {0}]   ;;  %s2222_s4 = inlined_call_operand.hbm [shape: f32[16,128], index: 4, kind: output, shape index: {1}]  }
   0x1   :  { %12 = vsyncpa [#allocation3 + $0x1], 0 }
   0x2   :  { %13 = vsyncpa [#allocation6], 0 }
   0x3   :  { %14 = vsyncpa [#allocation4], 0 }
   0x4   :  { %16 = vsyncpa [#allocation4 + $0x1], 0 }
   0x5   :  { %17 = vsyncpa [#allocation10], 0 }
   0x6   :  { %19 = vsyncpa [#allocation10 + $0x1], 0  ;;  %s1787_s15 = smov 0   ;;  %s1789_s16 = smov 0  }
   0x7   :  { %s1791_s17 = smov 0   ;;  %s1793_s18 = smov 0  }
   0x8 LB: > { %s1808_s19 = sadd.s32 1, %s1752_s18   ;;  %s32_s20 = sadd.s32 1, %s1748_s17  ;;  %s1752_s18 = sphi %s1793_s18, %s2245_s18   ;;  %s1748_s17 = sphi %s1791_s17, %s2244_s17   ;;  %s1744_s16 = sphi %s1789_s16, %s2243_s16   ;;  %s1740_s15 = sphi %s1787_s15, %s2242_s15  }
   0x9   : > { %s29_s21 = ssub.s32 %s1752_s18, %s1808_s19  ;;  %p39_p0 = scmp.ne.s32.totalorder %s1748_s17, %s1744_s16 }
   0xa   : > { %p30_p1 = scmp.eq.s32.totalorder %s29_s21, 0  ;;  %p40_p2 = scmp.eq.s32.totalorder %s1752_s18, 0 }
   0xb   : > { %p1503_p4 = scmp.lt.s32.totalorder %s1752_s18, 2  ;;  %s179_s23 = sand.u32 1, %s1752_s18  }
   0xc   : > { %s1819_s22 = scalar_select %p30_p1, %s1748_s17, %s32_s20  }
   0xd   : > { %p41_p5 = por %p40_p2, %p39_p0  ;;  %s181_s24 = sand.u32 1, %s1748_s17  }
   0xe   : > { %s1398_s25 = sshll.u32 %s181_s24, 5  ;;  %s1470_s26 = sshll.u32 %s1752_s18, 9 }
   0xf   : > { %s1832_s29 = scalar_lea.hbm %s2218_s0, %s1470_s26  ;;  %s183_s30 = scalar_lea.vmem [#allocation2], %s1398_s25 }
  0x10   : > { %s190_s5 = sshll.u32 %s183_s30, 4  ;;  %p1834_p6 = pnand %p1503_p4, %p41_p5  ;;  %s1838_s5 = int_to_ptr.vmem [resolvable:$true] %s190_s5 }
  0x11   : > { %s1840_s7 = scalar_lea.sflag [#allocation3], %s179_s23  ;;  %s1558_s8 = scalar_lea.hbm %s1832_s29, 512 }
  0x12   : > { %p1559_p7 = scmp.ne.s32.totalorder %s1832_s29, %s1558_s8  ;;  %p1560_p8 = pneg %p1834_p6 }
  0x13   : > { %s1563_s11 = scalar_lea.hbm %s2218_s0, 1024  ;;  %p1564_p11 = scmp.lt.u32.totalorder %s1832_s29, %s2218_s0 }
  0x14   : > { %p1561_p9 = pnand %p1560_p8, %p1559_p7  ;;  %p1565_p12 = scmp.lt.u32.totalorder %s1563_s11, %s1558_s8 }
  0x15   : > { %p1567_p1 = scmp.lt.u32.totalorder %s1558_s8, %s1832_s29 }
  0x16   : > { %p1562_p10 = pneg %p1561_p9  ;;  %p1566_p13 = por %p1565_p12, %p1564_p11 }
  0x18   : > { %p1568_p2 = por %p1567_p1, %p1566_p13 }
  0x1a   : > { %p1569_p4 = pnand %p1568_p2, %p1562_p10 }
  0x1c   : > { %1572 = shalt.err (!%p1569_p4)
}
  0x1d   : > { %s1573_s14 = scalar_lea.vmem %s1838_s5, 512  ;;  %s1754_s20 = smov [#allocation2]  }
  0x1e   : > { %p1574_p5 = scmp.ne.s32.totalorder %s1838_s5, %s1573_s14  ;;  %s1578_s21 = sshll.u32 %s1754_s20, 4  ;;  %s1579_s21 = int_to_ptr.vmem [resolvable:$false] %s1578_s21 }
  0x1f   : > { %s1580_s23 = scalar_lea.vmem %s1579_s21, 1024  ;;  %p1581_p3 = scmp.lt.s32.totalorder %s1838_s5, %s1579_s21 }
  0x20   : > { %p1576_p7 = pnand %p1574_p5, %p1560_p8  ;;  %p1582_p11 = scmp.lt.s32.totalorder %s1580_s23, %s1573_s14 }
  0x22   : > { %p1577_p9 = pneg %p1576_p7  ;;  %p1583_p12 = por %p1582_p11, %p1581_p3 }
  0x24   : > { %p1584_p13 = pnand %p1583_p12, %p1577_p9 }
  0x26   : > { %1587 = shalt.err (!%p1584_p13)
}
  0x27   : > { %s1755_s25 = smov 64   ;;  %s1756_s26 = smov 4  }
  0x28   : > { %1491 = dma.hbm_to_vmem [thread:$0]  (!%p1834_p6), %s1832_s29, 512, %s1838_s5, %s1840_s7, %s1755_s25, %s1755_s25, %s1756_s26  }
  0x29   : > { %s1869_s27 = sadd.s32 4294967295, %s1752_s18   ;;  %s1394_s28 = sadd.s32 4294967294, %s1752_s18  }
  0x2a   : > { %p45_p3 = scmp.ne.s32.totalorder %s1744_s16, %s1740_s15  ;;  %p2223_p10 = scmp.eq.s32.totalorder %s1869_s27, 0 }
  0x2b   : > { %p116_p1 = scmp.eq.s32.totalorder %s1869_s27, 1  ;;  %p122_p2 = scmp.eq.s32.totalorder %s1394_s28, 1 }
  0x2c   : > { %p1878_p4 = por %p2223_p10, %p45_p3  ;;  %p1395_p5 = scmp.ge.s32.totalorder %s1752_s18, 1 }
  0x2d   : > { %p1886_p7 = por %p116_p1, %p39_p0  ;;  %p1890_p9 = por %p122_p2, %p45_p3 }
  0x2e   : > { %s2229_s30 = scalar_select %p1878_p4, 1, 0 }
  0x2f   : > { %s2230_s29 = scalar_select %p1886_p7, 1, 0 }
  0x30   : > { %s2231_s5 = scalar_select %p1890_p9, 1, 0 }
  0x31   : > { %p155_p11 = scmp.lt.s32.totalorder %s1752_s18, 3  ;;  %s1401_s8 = sshll.u32 %s181_s24, 3 }
  0x32   : > { %s1757_s10 = smov [#allocation5]   ;;  %s1402_s12 = sshll.u32 %s1752_s18, 7 }
  0x33   : > { %p1897_p12 = pnand %p1395_p5, %p155_p11  ;;  %s168_s11 = sshll.u32 %s1757_s10, 4  ;;  %s1901_s11 = int_to_ptr.vmem [resolvable:$true] %s168_s11 }
  0x34   : > { %s1909_s20 = scalar_lea.hbm %s2220_s2, %s1402_s12  ;;  %s204_s24 = scalar_lea.vmem [#allocation7], %s1401_s8 }
  0x35   : > { %s2232_s9 = scalar_select %p1897_p12, 1, 0 }
  0x36   : > { %p1484_p0 = pneg %p1897_p12  ;;  %s211_s21 = sshll.u32 %s204_s24, 4  ;;  %s212_s21 = int_to_ptr.vmem [resolvable:$true] %s211_s21 }
  0x37   : > { %s1588_s25 = scalar_lea.hbm %s1909_s20, 128  ;;  %s1593_s10 = scalar_lea.hbm %s2220_s2, 256 }
  0x38   : > { %p1913_p13 = pnand %p1484_p0, %p2223_p10  ;;  %p1589_p3 = scmp.ne.s32.totalorder %s1909_s20, %s1588_s25 }
  0x39   : > { %p1594_p5 = scmp.lt.u32.totalorder %s1909_s20, %s2220_s2  ;;  %p1595_p11 = scmp.lt.u32.totalorder %s1593_s10, %s1588_s25 }
  0x3a   : > { %s2233_s23 = scalar_select %p1913_p13, 1, 0 }
  0x3b   : > { %p1591_p1 = pnand %p1589_p3, %p1560_p8  ;;  %p1596_p0 = por %p1595_p11, %p1594_p5 }
  0x3c   : > { %p1597_p10 = scmp.lt.u32.totalorder %s1588_s25, %s1909_s20 }
  0x3d   : > { %p1592_p2 = pneg %p1591_p1 }
  0x3e   : > { %p1598_p9 = por %p1597_p10, %p1596_p0 }
  0x40   : > { %p1599_p7 = pnand %p1598_p9, %p1592_p2 }
  0x42   : > { %1602 = shalt.err (!%p1599_p7)
}
  0x43   : > { %s1603_s8 = scalar_lea.vmem %s212_s21, 128  ;;  %s1758_s14 = smov [#allocation7]  }
  0x44   : > { %p1604_p4 = scmp.ne.s32.totalorder %s212_s21, %s1603_s8  ;;  %s1608_s24 = sshll.u32 %s1758_s14, 4  ;;  %s1609_s24 = int_to_ptr.vmem [resolvable:$false] %s1608_s24 }
  0x45   : > { %s1610_s26 = scalar_lea.vmem %s1609_s24, 256  ;;  %p1611_p12 = scmp.lt.s32.totalorder %s212_s21, %s1609_s24 }
  0x46   : > { %p1606_p3 = pnand %p1604_p4, %p1560_p8  ;;  %p1612_p13 = scmp.lt.s32.totalorder %s1610_s26, %s1603_s8 }
  0x48   : > { %p1607_p1 = pneg %p1606_p3  ;;  %p1613_p5 = por %p1612_p13, %p1611_p12 }
  0x4a   : > { %p1614_p11 = pnand %p1613_p5, %p1607_p1 }
  0x4c   : > { %1617 = shalt.err (!%p1614_p11)
}
  0x4d   : > { %1494 = dma.hbm_to_vmem [thread:$0]  (!%p1834_p6), %s1909_s20, 128, %s212_s21, %s1840_s7  }
  0x4e   : > { %s1618_s10 = scalar_lea.hbm %s2219_s1, 64  ;;  %p2234_p10 = scmp.ne.s32.totalorder %s2233_s23, 0 }
  0x4f   : > { %p1619_p8 = scmp.ne.s32.totalorder %s2219_s1, %s1618_s10  ;;  %p1625_p12 = scmp.lt.u32.totalorder %s1618_s10, %s2219_s1 }
  0x50   : > { %p1620_p4 = pneg %p2234_p10 }
  0x52   : > { %p1621_p7 = pnand %p1620_p4, %p1619_p8 }
  0x54   : > { %p1622_p9 = pneg %p1621_p7 }
  0x56   : > { %p1627_p13 = pnand %p1625_p12, %p1622_p9 }
  0x58   : > { %1630 = shalt.err (!%p1627_p13)
}
  0x59   : > { %s1631_s6 = scalar_lea.vmem %s1901_s11, 64  ;;  %p1639_p3 = scmp.lt.s32.totalorder %s1901_s11, %s1901_s11 }
  0x5a   : > { %p1632_p6 = scmp.ne.s32.totalorder %s1901_s11, %s1631_s6  ;;  %p1640_p1 = scmp.lt.s32.totalorder %s1631_s6, %s1631_s6 }
  0x5c   : > { %p1634_p2 = pnand %p1632_p6, %p1620_p4  ;;  %p1641_p5 = por %p1640_p1, %p1639_p3 }
  0x5e   : > { %p1635_p0 = pneg %p1634_p2 }
  0x60   : > { %p1642_p11 = pnand %p1641_p5, %p1635_p0 }
  0x62   : > { %1645 = shalt.err (!%p1642_p11)
}
  0x63   : > { %1487 = dma.hbm_to_vmem [thread:$0]  (!%p2234_p10), %s2219_s1, 64, %s1901_s11, [#allocation6]  }
  0x64   : > { %p2235_p8 = scmp.ne.s32.totalorder %s2232_s9, 0 }
  0x65   : > { %s222_s21 = sand.u32 (!%p2235_p8), 1, %s1869_s27   ;;  %s1962_s24 = sand.u32 (!%p2235_p8), 1, %s1744_s16  }
  0x66   : > { %220 = sbr.rel (%p2235_p8) target bundleno = 844 (0x34c), region = 32  ;;  %s1404_s26 = sshll.u32 (!%p2235_p8), %s1962_s24, 5 }
  0x67   : > { %s223_s25 = scalar_lea.sflag (!%p2235_p8), [#allocation3], %s222_s21  ;;  %s1965_s28 = scalar_lea.vmem (!%p2235_p8), [#allocation2], %s1404_s26 }
  0x68   : > { %p2236_p4 = scmp.ne.s32.totalorder (!%p2235_p8), %s2229_s30, 0 }
  0x6d   : > { %1719 = dma.done.wait (%p2236_p4), %s223_s25, 512  }
  0x6e   : > { %1721 = vsyncadd (%p2236_p4), %s223_s25, 4294966784  ;;  %p2237_p10 = scmp.eq.s32.totalorder %s1869_s27, 0 }
  0x70   : > { %1723 = dma.done.wait (%p2237_p10), [#allocation6], 64   ;;  %p2238_p7 = pmov %p2237_p10 }
  0x71   : > { %s1976_s9 = sshll.u32 %s1962_s24, 3 }
  0x72   : > { %1725 = vsyncadd (%p2238_p7), [#allocation6], 4294967232  ;;  %s239_s11 = scalar_lea.vmem [#allocation7], %s1976_s9 }
  0x73   : > { %1727 = dma.done.wait (%p2236_p4), %s223_s25, 128  }
  0x74   : > { %1729 = vsyncadd (%p2236_p4), %s223_s25, 4294967168  ;;  %v276_v0 = vld [vmem:[%s1965_s28] sm:$0x1]  ;;  %v277_v1 = vld [vmem:[%s1965_s28 + $0x4] sm:$0x1]  ;;  %vm409_vm0 = vcmask 1041409  }
  0x75   : > { %v278_v2 = vld [vmem:[%s1965_s28 + $0x8] sm:$0x1]  ;;  %v279_v3 = vld [vmem:[%s1965_s28 + $0xc] sm:$0x1]  ;;  %v280_v4 = vld [vmem:[%s1965_s28 + $0x10] sm:$0x1] }
  0x76   : > { %v281_v5 = vld [vmem:[%s1965_s28 + $0x14] sm:$0x1]  ;;  %v282_v6 = vld [vmem:[%s1965_s28 + $0x18] sm:$0x1]  ;;  %v1409_v7 = vld [vmem:[#allocation5] ss:$0 sm:$0xff] }
  0x77   : > { %v297_v8 = vld [vmem:[%s1965_s28 + $0x1] sm:$0x1]  ;;  %v298_v9 = vld [vmem:[%s1965_s28 + $0x5] sm:$0x1]  ;;  %v299_v10 = vld [vmem:[%s1965_s28 + $0x9] sm:$0x1]  ;;  %v289_v12 = vmul.f32 %v1409_v7, %v276_v0  ;;  %v290_v13 = vmul.f32 %v1409_v7, %v277_v1  ;;  %v291_v14 = vmul.f32 %v1409_v7, %v278_v2  ;;  %v292_v19 = vmul.f32 %v1409_v7, %v279_v3 }
  0x78   : > { %v300_v11 = vld [vmem:[%s1965_s28 + $0xd] sm:$0x1]  ;;  %v301_v15 = vld [vmem:[%s1965_s28 + $0x11] sm:$0x1]  ;;  %v302_v16 = vld [vmem:[%s1965_s28 + $0x15] sm:$0x1]  ;;  %v293_v20 = vmul.f32 %v1409_v7, %v280_v4  ;;  %v294_v21 = vmul.f32 %v1409_v7, %v281_v5  ;;  %v295_v30 = vmul.f32 %v1409_v7, %v282_v6 }
  0x79   : > { %v303_v17 = vld [vmem:[%s1965_s28 + $0x19] sm:$0x1]  ;;  %v283_v18 = vld [vmem:[%s1965_s28 + $0x1c] sm:$0x1]  ;;  %v1410_v22 = vld [vmem:[#allocation5 + $0x1] ss:$0 sm:$0xff] }
  0x7a   : > { %v304_v23 = vld [vmem:[%s1965_s28 + $0x1d] sm:$0x1]  ;;  %v310_v24 = vmul.f32 %v1410_v22, %v297_v8  ;;  %v311_v25 = vmul.f32 %v1410_v22, %v298_v9  ;;  %v312_v26 = vmul.f32 %v1410_v22, %v299_v10  ;;  %v313_v27 = vmul.f32 %v1410_v22, %v300_v11  ;;  %v326_v28 = vld [vmem:[%s1965_s28 + $0x2] sm:$0x1]  ;;  %v327_v29 = vld [vmem:[%s1965_s28 + $0x6] sm:$0x1] }
  0x7b   : > { %v314_v31 = vmul.f32 %v1410_v22, %v301_v15  ;;  %v315_v32 = vmul.f32 %v1410_v22, %v302_v16  ;;  %v316_v33 = vmul.f32 %v1410_v22, %v303_v17  ;;  %v328_v34 = vld [vmem:[%s1965_s28 + $0xa] sm:$0x1]  ;;  %v329_v35 = vld [vmem:[%s1965_s28 + $0xe] sm:$0x1]  ;;  %v330_v36 = vld [vmem:[%s1965_s28 + $0x12] sm:$0x1]  ;;  %v296_v37 = vmul.f32 %v1409_v7, %v283_v18 }
  0x7c   : > { %v318_v38 = vadd.f32 %v310_v24, %v289_v12  ;;  %v319_v39 = vadd.f32 %v311_v25, %v290_v13  ;;  %v320_v40 = vadd.f32 %v312_v26, %v291_v14  ;;  %v331_v41 = vld [vmem:[%s1965_s28 + $0x16] sm:$0x1]  ;;  %v332_v42 = vld [vmem:[%s1965_s28 + $0x1a] sm:$0x1]  ;;  %v1411_v43 = vld [vmem:[#allocation5 + $0x2] ss:$0 sm:$0xff]  ;;  %v317_v44 = vmul.f32 %v1410_v22, %v304_v23 }
  0x7d   : > { %v321_v45 = vadd.f32 %v313_v27, %v292_v19  ;;  %v322_v46 = vadd.f32 %v314_v31, %v293_v20  ;;  %v323_v47 = vadd.f32 %v315_v32, %v294_v21  ;;  %v333_v48 = vld [vmem:[%s1965_s28 + $0x1e] sm:$0x1]  ;;  %v339_v49 = vmul.f32 %v1411_v43, %v326_v28  ;;  %v355_v53 = vld [vmem:[%s1965_s28 + $0x3] sm:$0x1]  ;;  %v356_v54 = vld [vmem:[%s1965_s28 + $0x7] sm:$0x1] }
  0x7e   : > { %v340_v50 = vmul.f32 %v1411_v43, %v327_v29  ;;  %v341_v51 = vmul.f32 %v1411_v43, %v328_v34  ;;  %v342_v52 = vmul.f32 %v1411_v43, %v329_v35  ;;  %v324_v55 = vadd.f32 %v316_v33, %v295_v30  ;;  %v357_v59 = vld [vmem:[%s1965_s28 + $0xb] sm:$0x1]  ;;  %v358_v60 = vld [vmem:[%s1965_s28 + $0xf] sm:$0x1]  ;;  %v1412_v61 = vld [vmem:[#allocation5 + $0x3] ss:$0 sm:$0xff] }
  0x7f   : > { %v343_v56 = vmul.f32 %v1411_v43, %v330_v36  ;;  %v344_v57 = vmul.f32 %v1411_v43, %v331_v41  ;;  %v345_v58 = vmul.f32 %v1411_v43, %v332_v42  ;;  %v347_v62 = vadd.f32 %v339_v49, %v318_v38  ;;  %v359_v1 = vld [vmem:[%s1965_s28 + $0x13] sm:$0x1]  ;;  %v360_v2 = vld [vmem:[%s1965_s28 + $0x17] sm:$0x1]  ;;  %v361_v7 = vld [vmem:[%s1965_s28 + $0x1b] sm:$0x1] }
  0x80   : > { %v348_v63 = vadd.f32 %v340_v50, %v319_v39  ;;  %v349_v0 = vadd.f32 %v341_v51, %v320_v40  ;;  %v325_v3 = vadd.f32 %v317_v44, %v296_v37  ;;  %v346_v4 = vmul.f32 %v1411_v43, %v333_v48  ;;  %v362_v8 = vld [vmem:[%s1965_s28 + $0x1f] sm:$0x1]  ;;  %s273_s30 = scalar_lea.vmem [#allocation9], %s1976_s9  ;;  %s1466_s23 = sshll.u32 %s1869_s27, 7 }
  0x81   : > { %v350_v5 = vadd.f32 %v342_v52, %v321_v45  ;;  %v351_v6 = vadd.f32 %v343_v56, %v322_v46  ;;  %v368_v9 = vmul.f32 %v1412_v61, %v355_v53  ;;  %v369_v10 = vmul.f32 %v1412_v61, %v356_v54  ;;  %v275_v54 = vld [vmem:[%s239_s11] sm:$0xff]  ;;  %s2109_s13 = scalar_lea.hbm %s2222_s4, %s1466_s23  ;;  %s1262_s8 = sshll.u32 %s273_s30, 4  ;;  %s1263_s8 = int_to_ptr.vmem [resolvable:$true] %s1262_s8 }
  0x82   : > { %v370_v11 = vmul.f32 %v1412_v61, %v357_v59  ;;  %v371_v12 = vmul.f32 %v1412_v61, %v358_v60  ;;  %v352_v13 = vadd.f32 %v344_v57, %v323_v47  ;;  %v353_v14 = vadd.f32 %v345_v58, %v324_v55  ;;  %s1236_s14 = scalar_lea.sflag [#allocation10], %s1962_s24  ;;  %s1646_s6 = scalar_lea.vmem %s1263_s8, 128 }
  0x83   : > { %v372_v15 = vmul.f32 %v1412_v61, %v359_v1  ;;  %v373_v16 = vmul.f32 %v1412_v61, %v360_v2  ;;  %v374_v17 = vmul.f32 %v1412_v61, %v361_v7  ;;  %v376_v18 = vadd.f32 %v368_v9, %v347_v62  ;;  %p1647_p9 = scmp.ne.s32.totalorder %s1263_s8, %s1646_s6  ;;  %p2239_p12 = scmp.ne.s32.totalorder %s2230_s29, 0 }
  0x84   : > { %v377_v19 = vadd.f32 %v369_v10, %v348_v63  ;;  %v378_v20 = vadd.f32 %v370_v11, %v349_v0  ;;  %v354_v21 = vadd.f32 %v346_v4, %v325_v3  ;;  %v375_v22 = vmul.f32 %v1412_v61, %v362_v8  ;;  %s1760_s7 = smov [#allocation9]  }
  0x85   : > { %v379_v23 = vadd.f32 %v371_v12, %v350_v5  ;;  %v380_v24 = vadd.f32 %v372_v15, %v351_v6  ;;  %1542 = vtanh.f32 %v376_v18  ;;  %v381_v25 = vadd.f32 %v373_v16, %v352_v13  ;;  %p1648_p13 = pnand %p1647_p9, %p2239_p12  ;;  %s1650_s20 = sshll.u32 %s1760_s7, 4  ;;  %s1651_s20 = int_to_ptr.vmem [resolvable:$false] %s1650_s20 }
  0x86   : > { %1544 = vtanh.f32 %v377_v19  ;;  %v382_v26 = vadd.f32 %v374_v17, %v353_v14  ;;  %v383_v27 = vadd.f32 %v375_v22, %v354_v21  ;;  %vm412_vm1 = vcmask 1042434   ;;  %s1652_s21 = scalar_lea.vmem %s1651_s20, 256  ;;  %p1653_p2 = scmp.lt.s32.totalorder %s1263_s8, %s1651_s20 }
  0x87   : > { %1546 = vtanh.f32 %v378_v20  ;;  %vm415_vm2 = vcmask 1043459   ;;  %vm418_vm3 = vcmask 1044484   ;;  %vm421_vm4 = vcmask 1045509   ;;  %p1649_p6 = pneg %p1648_p13  ;;  %p1654_p0 = scmp.lt.s32.totalorder %s1652_s21, %s1646_s6 }
  0x88   : > { %1548 = vtanh.f32 %v379_v23  ;;  %vm424_vm5 = vcmask 1046534   ;;  %vm427_vm6 = vcmask 1047559   ;;  %v1759_v17 = vmov 0.0  }
  0x89   : > { %1550 = vtanh.f32 %v380_v24  ;;  %p1655_p3 = por %p1654_p0, %p1653_p2 }
  0x8a   : > { %1552 = vtanh.f32 %v381_v25 }
  0x8b   : > { %1554 = vtanh.f32 %v382_v26  ;;  %p1656_p1 = pnand %p1655_p3, %p1649_p6 }
  0x8c   : > { %1556 = vtanh.f32 %v383_v27 }
  0x8f   : > { %v1543_v28 = vpop.eup %1542 }
  0x90   : > { %v1545_v29 = vpop.eup %1544  ;;  %v392_v31 = vmax.f32 %v1543_v28, 0.0 }
  0x91   : > { %v1547_v30 = vpop.eup %1546  ;;  %v393_v32 = vmax.f32 %v1545_v29, 0.0 }
  0x92   : > { %v1549_v33 = vpop.eup %1548  ;;  %v394_v34 = vmax.f32 %v1547_v30, 0.0 }
  0x93   : > { %v1551_v35 = vpop.eup %1550  ;;  %v395_v36 = vmax.f32 %v1549_v33, 0.0  ;;  %v408_v37 = vrot.slane %v393_v32, 7 }
  0x94   : > { %v1553_v38 = vpop.eup %1552  ;;  %v396_v39 = vmax.f32 %v1551_v35, 0.0  ;;  %v411_v40 = vrot.slane %v394_v34, 6 }
  0x95   : > { %v1555_v41 = vpop.eup %1554  ;;  %v397_v42 = vmax.f32 %v1553_v38, 0.0  ;;  %v410_v43 = vsel %vm409_vm0, %v408_v37, %v392_v31  ;;  %v414_v44 = vrot.slane %v395_v36, 5 }
  0x96   : > { %v1557_v45 = vpop.eup %1556  ;;  %v398_v46 = vmax.f32 %v1555_v41, 0.0  ;;  %v413_v47 = vsel %vm412_vm1, %v411_v40, %v410_v43  ;;  %v417_v48 = vrot.slane %v396_v39, 4 }
  0x97   : > { %v399_v49 = vmax.f32 %v1557_v45, 0.0  ;;  %v416_v50 = vsel %vm415_vm2, %v414_v44, %v413_v47  ;;  %v420_v51 = vrot.slane %v397_v42, 3 }
  0x98   : > { %v419_v52 = vsel %vm418_vm3, %v417_v48, %v416_v50  ;;  %v423_v53 = vrot.slane %v398_v46, 2 }
  0x99   : > { %v422_v55 = vsel %vm421_vm4, %v420_v51, %v419_v52  ;;  %v426_v56 = vrot.slane %v399_v49, 1 }
  0x9a   : > { %v425_v57 = vsel %vm424_vm5, %v423_v53, %v422_v55 }
  0x9b   : > { %v428_v58 = vsel %vm427_vm6, %v426_v56, %v425_v57 }
  0x9c   : > { %v430_v59 = vsub.f32 %v275_v54, %v428_v58 }
  0x9e   : > { %v431_v60 = vmul.f32 0.3, %v430_v59 }
  0xa0   : > { %v432_v61 = vsub.f32 %v275_v54, %v431_v60 }
  0xa2   : > { %v433_v62 = vmax.f32 %v432_v61, 0.0 }
  0xa4   : > { %434 = vst [vmem:[%s273_s30] sm:$0xff] %v433_v62  ;;  %v435_v63 = vmul.f32 100.0, %v433_v62 }
  0xa6   : > { %v1471_v0 = vround.rtne.f32 %v435_v63 }
  0xa8   : > { %v437_v1 = vadd.f32 140.0, %v1471_v0 }
  0xaa   : > { %v2020_v2 = vmul.f32 0.5, %v437_v1 }
  0xac   : > { %v1413_v3 = vadd.f32 6.5, %v2020_v2 }
  0xae   : > { %v440_v4 = vadd.f32 -143.0, %v1413_v3 }
  0xb0   : > { %v441_v5 = vmul.f32 0.002, %v440_v4  ;;  %vm443_vm7 = vcmp.ge.f32.partialorder %v440_v4, 30.0 }
  0xb1   : > { %v444_v6 = vsel %vm443_vm7, -65.0, %v440_v4  ;;  %v1414_v18 = vsel %vm443_vm7, 1.0, %v1759_v17 }
  0xb2   : > { %v442_v7 = vadd.f32 -12.87, %v441_v5  ;;  %v450_v8 = vmul.f32 0.02, %v444_v6 }
  0xb4   : > { %v445_v9 = vadd.f32 8.0, %v442_v7  ;;  %v451_v10 = vadd.f32 3.5, %v450_v8 }
  0xb6   : > { %v446_v11 = vsel %vm443_vm7, %v445_v9, %v442_v7  ;;  %v452_v12 = vmul.f32 %v451_v10, %v444_v6 }
  0xb7   : > { %v453_v13 = vmul.f32 0.5, %v446_v11  ;;  %v456_v16 = vmul.f32 0.99, %v446_v11 }
  0xb9   : > { %v454_v14 = vsub.f32 %v2020_v2, %v453_v13 }
  0xbb   : > { %v455_v15 = vadd.f32 %v454_v14, %v452_v12 }
  0xbd   : > { %v457_v19 = vmul.f32 0.002, %v455_v15  ;;  %vm459_vm8 = vcmp.ge.f32.partialorder %v455_v15, 30.0 }
  0xbe   : > { %v460_v20 = vsel %vm459_vm8, -65.0, %v455_v15  ;;  %v1415_v21 = vsel %vm459_vm8, 1.0, %v1759_v17 }
  0xbf   : > { %v458_v22 = vadd.f32 %v457_v19, %v456_v16  ;;  %v465_v23 = vadd.f32 %v1415_v21, %v1414_v18  ;;  %v466_v24 = vmul.f32 0.02, %v460_v20 }
  0xc1   : > { %v461_v25 = vadd.f32 8.0, %v458_v22  ;;  %v467_v26 = vadd.f32 3.5, %v466_v24 }
  0xc3   : > { %v462_v27 = vsel %vm459_vm8, %v461_v25, %v458_v22  ;;  %v468_v28 = vmul.f32 %v467_v26, %v460_v20 }
  0xc4   : > { %v469_v29 = vmul.f32 0.5, %v462_v27  ;;  %v472_v32 = vmul.f32 0.99, %v462_v27 }
  0xc6   : > { %v470_v30 = vsub.f32 %v2020_v2, %v469_v29 }
  0xc8   : > { %v471_v31 = vadd.f32 %v470_v30, %v468_v28 }
  0xca   : > { %v473_v33 = vmul.f32 0.002, %v471_v31  ;;  %vm475_vm9 = vcmp.ge.f32.partialorder %v471_v31, 30.0 }
  0xcb   : > { %v476_v34 = vsel %vm475_vm9, -65.0, %v471_v31  ;;  %v1416_v35 = vsel %vm475_vm9, 1.0, %v1759_v17 }
  0xcc   : > { %v474_v36 = vadd.f32 %v473_v33, %v472_v32  ;;  %v481_v37 = vadd.f32 %v1416_v35, %v465_v23  ;;  %v482_v38 = vmul.f32 0.02, %v476_v34 }
  0xce   : > { %v477_v39 = vadd.f32 8.0, %v474_v36  ;;  %v483_v40 = vadd.f32 3.5, %v482_v38 }
  0xd0   : > { %v478_v41 = vsel %vm475_vm9, %v477_v39, %v474_v36  ;;  %v484_v42 = vmul.f32 %v483_v40, %v476_v34 }
  0xd1   : > { %v485_v43 = vmul.f32 0.5, %v478_v41  ;;  %v488_v46 = vmul.f32 0.99, %v478_v41 }
  0xd3   : > { %v486_v44 = vsub.f32 %v2020_v2, %v485_v43 }
  0xd5   : > { %v487_v45 = vadd.f32 %v486_v44, %v484_v42 }
  0xd7   : > { %v489_v47 = vmul.f32 0.002, %v487_v45  ;;  %vm491_vm10 = vcmp.ge.f32.partialorder %v487_v45, 30.0 }
  0xd8   : > { %v492_v48 = vsel %vm491_vm10, -65.0, %v487_v45  ;;  %v1417_v49 = vsel %vm491_vm10, 1.0, %v1759_v17 }
  0xd9   : > { %v490_v50 = vadd.f32 %v489_v47, %v488_v46  ;;  %v497_v51 = vadd.f32 %v1417_v49, %v481_v37  ;;  %v498_v52 = vmul.f32 0.02, %v492_v48 }
  0xdb   : > { %v493_v53 = vadd.f32 8.0, %v490_v50  ;;  %v499_v54 = vadd.f32 3.5, %v498_v52 }
  0xdd   : > { %v494_v55 = vsel %vm491_vm10, %v493_v53, %v490_v50  ;;  %v500_v56 = vmul.f32 %v499_v54, %v492_v48 }
  0xde   : > { %v501_v57 = vmul.f32 0.5, %v494_v55  ;;  %v504_v60 = vmul.f32 0.99, %v494_v55 }
  0xe0   : > { %v502_v58 = vsub.f32 %v2020_v2, %v501_v57 }
  0xe2   : > { %v503_v59 = vadd.f32 %v502_v58, %v500_v56 }
  0xe4   : > { %v505_v61 = vmul.f32 0.002, %v503_v59  ;;  %vm507_vm11 = vcmp.ge.f32.partialorder %v503_v59, 30.0 }
  0xe5   : > { %v508_v62 = vsel %vm507_vm11, -65.0, %v503_v59  ;;  %v1418_v63 = vsel %vm507_vm11, 1.0, %v1759_v17 }
  0xe6   : > { %v506_v0 = vadd.f32 %v505_v61, %v504_v60  ;;  %v513_v1 = vadd.f32 %v1418_v63, %v497_v51  ;;  %v514_v3 = vmul.f32 0.02, %v508_v62 }
  0xe8   : > { %v509_v4 = vadd.f32 8.0, %v506_v0  ;;  %v515_v5 = vadd.f32 3.5, %v514_v3 }
  0xea   : > { %v510_v6 = vsel %vm507_vm11, %v509_v4, %v506_v0  ;;  %v516_v7 = vmul.f32 %v515_v5, %v508_v62 }
  0xeb   : > { %v517_v8 = vmul.f32 0.5, %v510_v6  ;;  %v520_v11 = vmul.f32 0.99, %v510_v6 }
  0xed   : > { %v518_v9 = vsub.f32 %v2020_v2, %v517_v8 }
  0xef   : > { %v519_v10 = vadd.f32 %v518_v9, %v516_v7 }
  0xf1   : > { %v521_v12 = vmul.f32 0.002, %v519_v10  ;;  %vm523_vm12 = vcmp.ge.f32.partialorder %v519_v10, 30.0 }
  0xf2   : > { %v524_v13 = vsel %vm523_vm12, -65.0, %v519_v10  ;;  %v1419_v14 = vsel %vm523_vm12, 1.0, %v1759_v17 }
  0xf3   : > { %v522_v15 = vadd.f32 %v521_v12, %v520_v11  ;;  %v529_v16 = vadd.f32 %v1419_v14, %v513_v1  ;;  %v530_v18 = vmul.f32 0.02, %v524_v13 }
  0xf5   : > { %v525_v19 = vadd.f32 8.0, %v522_v15  ;;  %v531_v20 = vadd.f32 3.5, %v530_v18 }
  0xf7   : > { %v526_v21 = vsel %vm523_vm12, %v525_v19, %v522_v15  ;;  %v532_v22 = vmul.f32 %v531_v20, %v524_v13 }
  0xf8   : > { %v533_v23 = vmul.f32 0.5, %v526_v21  ;;  %v536_v26 = vmul.f32 0.99, %v526_v21 }
  0xfa   : > { %v534_v24 = vsub.f32 %v2020_v2, %v533_v23 }
  0xfc   : > { %v535_v25 = vadd.f32 %v534_v24, %v532_v22 }
  0xfe   : > { %v537_v27 = vmul.f32 0.002, %v535_v25  ;;  %vm539_vm13 = vcmp.ge.f32.partialorder %v535_v25, 30.0 }
  0xff   : > { %v540_v28 = vsel %vm539_vm13, -65.0, %v535_v25  ;;  %v1420_v29 = vsel %vm539_vm13, 1.0, %v1759_v17 }
 0x100   : > { %v538_v30 = vadd.f32 %v537_v27, %v536_v26  ;;  %v545_v31 = vadd.f32 %v1420_v29, %v529_v16  ;;  %v546_v32 = vmul.f32 0.02, %v540_v28 }
 0x102   : > { %v541_v33 = vadd.f32 8.0, %v538_v30  ;;  %v547_v34 = vadd.f32 3.5, %v546_v32 }
 0x104   : > { %v542_v35 = vsel %vm539_vm13, %v541_v33, %v538_v30  ;;  %v548_v36 = vmul.f32 %v547_v34, %v540_v28 }
 0x105   : > { %v549_v37 = vmul.f32 0.5, %v542_v35  ;;  %v552_v40 = vmul.f32 0.99, %v542_v35 }
 0x107   : > { %v550_v38 = vsub.f32 %v2020_v2, %v549_v37 }
 0x109   : > { %v551_v39 = vadd.f32 %v550_v38, %v548_v36 }
 0x10b   : > { %v553_v41 = vmul.f32 0.002, %v551_v39  ;;  %vm555_vm14 = vcmp.ge.f32.partialorder %v551_v39, 30.0 }
 0x10c   : > { %v556_v42 = vsel %vm555_vm14, -65.0, %v551_v39  ;;  %v1421_v43 = vsel %vm555_vm14, 1.0, %v1759_v17 }
 0x10d   : > { %v554_v44 = vadd.f32 %v553_v41, %v552_v40  ;;  %v561_v45 = vadd.f32 %v1421_v43, %v545_v31  ;;  %v562_v46 = vmul.f32 0.02, %v556_v42 }
 0x10f   : > { %v557_v47 = vadd.f32 8.0, %v554_v44  ;;  %v563_v48 = vadd.f32 3.5, %v562_v46 }
 0x111   : > { %v558_v49 = vsel %vm555_vm14, %v557_v47, %v554_v44  ;;  %v564_v50 = vmul.f32 %v563_v48, %v556_v42 }
 0x112   : > { %v565_v51 = vmul.f32 0.5, %v558_v49  ;;  %v568_v54 = vmul.f32 0.99, %v558_v49 }
 0x114   : > { %v566_v52 = vsub.f32 %v2020_v2, %v565_v51 }
 0x116   : > { %v567_v53 = vadd.f32 %v566_v52, %v564_v50 }
 0x118   : > { %v569_v55 = vmul.f32 0.002, %v567_v53  ;;  %vm571_vm15 = vcmp.ge.f32.partialorder %v567_v53, 30.0 }
 0x119   : > { %v572_v56 = vsel %vm571_vm15, -65.0, %v567_v53  ;;  %v1422_v57 = vsel %vm571_vm15, 1.0, %v1759_v17 }
 0x11a   : > { %v570_v58 = vadd.f32 %v569_v55, %v568_v54  ;;  %v577_v59 = vadd.f32 %v1422_v57, %v561_v45  ;;  %v578_v60 = vmul.f32 0.02, %v572_v56 }
 0x11c   : > { %v573_v61 = vadd.f32 8.0, %v570_v58  ;;  %v579_v62 = vadd.f32 3.5, %v578_v60 }
 0x11e   : > { %v574_v63 = vsel %vm571_vm15, %v573_v61, %v570_v58  ;;  %v580_v0 = vmul.f32 %v579_v62, %v572_v56 }
 0x11f   : > { %v581_v1 = vmul.f32 0.5, %v574_v63  ;;  %v584_v5 = vmul.f32 0.99, %v574_v63 }
 0x121   : > { %v582_v3 = vsub.f32 %v2020_v2, %v581_v1 }
 0x123   : > { %v583_v4 = vadd.f32 %v582_v3, %v580_v0 }
 0x125   : > { %v585_v6 = vmul.f32 0.002, %v583_v4  ;;  %vm587_vm0 = vcmp.ge.f32.partialorder %v583_v4, 30.0 }
 0x126   : > { %v588_v7 = vsel %vm587_vm0, -65.0, %v583_v4  ;;  %v1423_v8 = vsel %vm587_vm0, 1.0, %v1759_v17 }
 0x127   : > { %v586_v9 = vadd.f32 %v585_v6, %v584_v5  ;;  %v593_v10 = vadd.f32 %v1423_v8, %v577_v59  ;;  %v594_v11 = vmul.f32 0.02, %v588_v7 }
 0x129   : > { %v589_v12 = vadd.f32 8.0, %v586_v9  ;;  %v595_v13 = vadd.f32 3.5, %v594_v11 }
 0x12b   : > { %v590_v14 = vsel %vm587_vm0, %v589_v12, %v586_v9  ;;  %v596_v15 = vmul.f32 %v595_v13, %v588_v7 }
 0x12c   : > { %v597_v16 = vmul.f32 0.5, %v590_v14  ;;  %v600_v20 = vmul.f32 0.99, %v590_v14 }
 0x12e   : > { %v598_v18 = vsub.f32 %v2020_v2, %v597_v16 }
 0x130   : > { %v599_v19 = vadd.f32 %v598_v18, %v596_v15 }
 0x132   : > { %v601_v21 = vmul.f32 0.002, %v599_v19  ;;  %vm603_vm1 = vcmp.ge.f32.partialorder %v599_v19, 30.0 }
 0x133   : > { %v604_v22 = vsel %vm603_vm1, -65.0, %v599_v19  ;;  %v1424_v23 = vsel %vm603_vm1, 1.0, %v1759_v17 }
 0x134   : > { %v602_v24 = vadd.f32 %v601_v21, %v600_v20  ;;  %v609_v25 = vadd.f32 %v1424_v23, %v593_v10  ;;  %v610_v26 = vmul.f32 0.02, %v604_v22 }
 0x136   : > { %v605_v27 = vadd.f32 8.0, %v602_v24  ;;  %v611_v28 = vadd.f32 3.5, %v610_v26 }
 0x138   : > { %v606_v29 = vsel %vm603_vm1, %v605_v27, %v602_v24  ;;  %v612_v30 = vmul.f32 %v611_v28, %v604_v22 }
 0x139   : > { %v613_v31 = vmul.f32 0.5, %v606_v29  ;;  %v616_v34 = vmul.f32 0.99, %v606_v29 }
 0x13b   : > { %v614_v32 = vsub.f32 %v2020_v2, %v613_v31 }
 0x13d   : > { %v615_v33 = vadd.f32 %v614_v32, %v612_v30 }
 0x13f   : > { %v617_v35 = vmul.f32 0.002, %v615_v33  ;;  %vm619_vm2 = vcmp.ge.f32.partialorder %v615_v33, 30.0 }
 0x140   : > { %v620_v36 = vsel %vm619_vm2, -65.0, %v615_v33  ;;  %v1425_v37 = vsel %vm619_vm2, 1.0, %v1759_v17 }
 0x141   : > { %v618_v38 = vadd.f32 %v617_v35, %v616_v34  ;;  %v625_v39 = vadd.f32 %v1425_v37, %v609_v25  ;;  %v626_v40 = vmul.f32 0.02, %v620_v36 }
 0x143   : > { %v621_v41 = vadd.f32 8.0, %v618_v38  ;;  %v627_v42 = vadd.f32 3.5, %v626_v40 }
 0x145   : > { %v622_v43 = vsel %vm619_vm2, %v621_v41, %v618_v38  ;;  %v628_v44 = vmul.f32 %v627_v42, %v620_v36 }
 0x146   : > { %v629_v45 = vmul.f32 0.5, %v622_v43  ;;  %v632_v48 = vmul.f32 0.99, %v622_v43 }
 0x148   : > { %v630_v46 = vsub.f32 %v2020_v2, %v629_v45 }
 0x14a   : > { %v631_v47 = vadd.f32 %v630_v46, %v628_v44 }
 0x14c   : > { %v633_v49 = vmul.f32 0.002, %v631_v47  ;;  %vm635_vm3 = vcmp.ge.f32.partialorder %v631_v47, 30.0 }
 0x14d   : > { %v636_v50 = vsel %vm635_vm3, -65.0, %v631_v47  ;;  %v1426_v51 = vsel %vm635_vm3, 1.0, %v1759_v17 }
 0x14e   : > { %v634_v52 = vadd.f32 %v633_v49, %v632_v48  ;;  %v641_v53 = vadd.f32 %v1426_v51, %v625_v39  ;;  %v642_v54 = vmul.f32 0.02, %v636_v50 }
 0x150   : > { %v637_v55 = vadd.f32 8.0, %v634_v52  ;;  %v643_v56 = vadd.f32 3.5, %v642_v54 }
 0x152   : > { %v638_v57 = vsel %vm635_vm3, %v637_v55, %v634_v52  ;;  %v644_v58 = vmul.f32 %v643_v56, %v636_v50 }
 0x153   : > { %v645_v59 = vmul.f32 0.5, %v638_v57  ;;  %v648_v62 = vmul.f32 0.99, %v638_v57 }
 0x155   : > { %v646_v60 = vsub.f32 %v2020_v2, %v645_v59 }
 0x157   : > { %v647_v61 = vadd.f32 %v646_v60, %v644_v58 }
 0x159   : > { %v649_v63 = vmul.f32 0.002, %v647_v61  ;;  %vm651_vm4 = vcmp.ge.f32.partialorder %v647_v61, 30.0 }
 0x15a   : > { %v652_v0 = vsel %vm651_vm4, -65.0, %v647_v61  ;;  %v1427_v1 = vsel %vm651_vm4, 1.0, %v1759_v17 }
 0x15b   : > { %v650_v3 = vadd.f32 %v649_v63, %v648_v62  ;;  %v657_v4 = vadd.f32 %v1427_v1, %v641_v53  ;;  %v658_v5 = vmul.f32 0.02, %v652_v0 }
 0x15d   : > { %v653_v6 = vadd.f32 8.0, %v650_v3  ;;  %v659_v7 = vadd.f32 3.5, %v658_v5 }
 0x15f   : > { %v654_v8 = vsel %vm651_vm4, %v653_v6, %v650_v3  ;;  %v660_v9 = vmul.f32 %v659_v7, %v652_v0 }
 0x160   : > { %v661_v10 = vmul.f32 0.5, %v654_v8  ;;  %v664_v13 = vmul.f32 0.99, %v654_v8 }
 0x162   : > { %v662_v11 = vsub.f32 %v2020_v2, %v661_v10 }
 0x164   : > { %v663_v12 = vadd.f32 %v662_v11, %v660_v9 }
 0x166   : > { %v665_v14 = vmul.f32 0.002, %v663_v12  ;;  %vm667_vm5 = vcmp.ge.f32.partialorder %v663_v12, 30.0 }
 0x167   : > { %v668_v15 = vsel %vm667_vm5, -65.0, %v663_v12  ;;  %v1428_v16 = vsel %vm667_vm5, 1.0, %v1759_v17 }
 0x168   : > { %v666_v18 = vadd.f32 %v665_v14, %v664_v13  ;;  %v673_v19 = vadd.f32 %v1428_v16, %v657_v4  ;;  %v674_v20 = vmul.f32 0.02, %v668_v15 }
 0x16a   : > { %v669_v21 = vadd.f32 8.0, %v666_v18  ;;  %v675_v22 = vadd.f32 3.5, %v674_v20 }
 0x16c   : > { %v670_v23 = vsel %vm667_vm5, %v669_v21, %v666_v18  ;;  %v676_v24 = vmul.f32 %v675_v22, %v668_v15 }
 0x16d   : > { %v677_v25 = vmul.f32 0.5, %v670_v23  ;;  %v680_v28 = vmul.f32 0.99, %v670_v23 }
 0x16f   : > { %v678_v26 = vsub.f32 %v2020_v2, %v677_v25 }
 0x171   : > { %v679_v27 = vadd.f32 %v678_v26, %v676_v24 }
 0x173   : > { %v681_v29 = vmul.f32 0.002, %v679_v27  ;;  %vm683_vm6 = vcmp.ge.f32.partialorder %v679_v27, 30.0 }
 0x174   : > { %v684_v30 = vsel %vm683_vm6, -65.0, %v679_v27  ;;  %v1429_v31 = vsel %vm683_vm6, 1.0, %v1759_v17 }
 0x175   : > { %v682_v32 = vadd.f32 %v681_v29, %v680_v28  ;;  %v689_v33 = vadd.f32 %v1429_v31, %v673_v19  ;;  %v690_v34 = vmul.f32 0.02, %v684_v30 }
 0x177   : > { %v685_v35 = vadd.f32 8.0, %v682_v32  ;;  %v691_v36 = vadd.f32 3.5, %v690_v34 }
 0x179   : > { %v686_v37 = vsel %vm683_vm6, %v685_v35, %v682_v32  ;;  %v692_v38 = vmul.f32 %v691_v36, %v684_v30 }
 0x17a   : > { %v693_v39 = vmul.f32 0.5, %v686_v37  ;;  %v696_v42 = vmul.f32 0.99, %v686_v37 }
 0x17c   : > { %v694_v40 = vsub.f32 %v2020_v2, %v693_v39 }
 0x17e   : > { %v695_v41 = vadd.f32 %v694_v40, %v692_v38 }
 0x180   : > { %v697_v43 = vmul.f32 0.002, %v695_v41  ;;  %vm699_vm7 = vcmp.ge.f32.partialorder %v695_v41, 30.0 }
 0x181   : > { %v700_v44 = vsel %vm699_vm7, -65.0, %v695_v41  ;;  %v1430_v45 = vsel %vm699_vm7, 1.0, %v1759_v17 }
 0x182   : > { %v698_v46 = vadd.f32 %v697_v43, %v696_v42  ;;  %v705_v47 = vadd.f32 %v1430_v45, %v689_v33  ;;  %v706_v48 = vmul.f32 0.02, %v700_v44 }
 0x184   : > { %v701_v49 = vadd.f32 8.0, %v698_v46  ;;  %v707_v50 = vadd.f32 3.5, %v706_v48 }
 0x186   : > { %v702_v51 = vsel %vm699_vm7, %v701_v49, %v698_v46  ;;  %v708_v52 = vmul.f32 %v707_v50, %v700_v44 }
 0x187   : > { %v709_v53 = vmul.f32 0.5, %v702_v51  ;;  %v712_v56 = vmul.f32 0.99, %v702_v51 }
 0x189   : > { %v710_v54 = vsub.f32 %v2020_v2, %v709_v53 }
 0x18b   : > { %v711_v55 = vadd.f32 %v710_v54, %v708_v52 }
 0x18d   : > { %v713_v57 = vmul.f32 0.002, %v711_v55  ;;  %vm715_vm8 = vcmp.ge.f32.partialorder %v711_v55, 30.0 }
 0x18e   : > { %v716_v58 = vsel %vm715_vm8, -65.0, %v711_v55  ;;  %v1431_v59 = vsel %vm715_vm8, 1.0, %v1759_v17 }
 0x18f   : > { %v714_v60 = vadd.f32 %v713_v57, %v712_v56  ;;  %v721_v61 = vadd.f32 %v1431_v59, %v705_v47  ;;  %v722_v62 = vmul.f32 0.02, %v716_v58 }
 0x191   : > { %v717_v63 = vadd.f32 8.0, %v714_v60  ;;  %v723_v0 = vadd.f32 3.5, %v722_v62 }
 0x193   : > { %v718_v1 = vsel %vm715_vm8, %v717_v63, %v714_v60  ;;  %v724_v3 = vmul.f32 %v723_v0, %v716_v58 }
 0x194   : > { %v725_v4 = vmul.f32 0.5, %v718_v1  ;;  %v728_v7 = vmul.f32 0.99, %v718_v1 }
 0x196   : > { %v726_v5 = vsub.f32 %v2020_v2, %v725_v4 }
 0x198   : > { %v727_v6 = vadd.f32 %v726_v5, %v724_v3 }
 0x19a   : > { %v729_v8 = vmul.f32 0.002, %v727_v6  ;;  %vm731_vm9 = vcmp.ge.f32.partialorder %v727_v6, 30.0 }
 0x19b   : > { %v732_v9 = vsel %vm731_vm9, -65.0, %v727_v6  ;;  %v1432_v10 = vsel %vm731_vm9, 1.0, %v1759_v17 }
 0x19c   : > { %v730_v11 = vadd.f32 %v729_v8, %v728_v7  ;;  %v737_v12 = vadd.f32 %v1432_v10, %v721_v61  ;;  %v738_v13 = vmul.f32 0.02, %v732_v9 }
 0x19e   : > { %v733_v14 = vadd.f32 8.0, %v730_v11  ;;  %v739_v15 = vadd.f32 3.5, %v738_v13 }
 0x1a0   : > { %v734_v16 = vsel %vm731_vm9, %v733_v14, %v730_v11  ;;  %v740_v18 = vmul.f32 %v739_v15, %v732_v9 }
 0x1a1   : > { %v741_v19 = vmul.f32 0.5, %v734_v16  ;;  %v744_v22 = vmul.f32 0.99, %v734_v16 }
 0x1a3   : > { %v742_v20 = vsub.f32 %v2020_v2, %v741_v19 }
 0x1a5   : > { %v743_v21 = vadd.f32 %v742_v20, %v740_v18 }
 0x1a7   : > { %v745_v23 = vmul.f32 0.002, %v743_v21  ;;  %vm747_vm10 = vcmp.ge.f32.partialorder %v743_v21, 30.0 }
 0x1a8   : > { %v748_v24 = vsel %vm747_vm10, -65.0, %v743_v21  ;;  %v1433_v25 = vsel %vm747_vm10, 1.0, %v1759_v17 }
 0x1a9   : > { %v746_v26 = vadd.f32 %v745_v23, %v744_v22  ;;  %v753_v27 = vadd.f32 %v1433_v25, %v737_v12  ;;  %v754_v28 = vmul.f32 0.02, %v748_v24 }
 0x1ab   : > { %v749_v29 = vadd.f32 8.0, %v746_v26  ;;  %v755_v30 = vadd.f32 3.5, %v754_v28 }
 0x1ad   : > { %v750_v31 = vsel %vm747_vm10, %v749_v29, %v746_v26  ;;  %v756_v32 = vmul.f32 %v755_v30, %v748_v24 }
 0x1ae   : > { %v757_v33 = vmul.f32 0.5, %v750_v31  ;;  %v760_v36 = vmul.f32 0.99, %v750_v31 }
 0x1b0   : > { %v758_v34 = vsub.f32 %v2020_v2, %v757_v33 }
 0x1b2   : > { %v759_v35 = vadd.f32 %v758_v34, %v756_v32 }
 0x1b4   : > { %v761_v37 = vmul.f32 0.002, %v759_v35  ;;  %vm763_vm11 = vcmp.ge.f32.partialorder %v759_v35, 30.0 }
 0x1b5   : > { %v764_v38 = vsel %vm763_vm11, -65.0, %v759_v35  ;;  %v1434_v39 = vsel %vm763_vm11, 1.0, %v1759_v17 }
 0x1b6   : > { %v762_v40 = vadd.f32 %v761_v37, %v760_v36  ;;  %v769_v41 = vadd.f32 %v1434_v39, %v753_v27  ;;  %v770_v42 = vmul.f32 0.02, %v764_v38 }
 0x1b8   : > { %v765_v43 = vadd.f32 8.0, %v762_v40  ;;  %v771_v44 = vadd.f32 3.5, %v770_v42 }
 0x1ba   : > { %v766_v45 = vsel %vm763_vm11, %v765_v43, %v762_v40  ;;  %v772_v46 = vmul.f32 %v771_v44, %v764_v38 }
 0x1bb   : > { %v773_v47 = vmul.f32 0.5, %v766_v45  ;;  %v776_v50 = vmul.f32 0.99, %v766_v45 }
 0x1bd   : > { %v774_v48 = vsub.f32 %v2020_v2, %v773_v47 }
 0x1bf   : > { %v775_v49 = vadd.f32 %v774_v48, %v772_v46 }
 0x1c1   : > { %v777_v51 = vmul.f32 0.002, %v775_v49  ;;  %vm779_vm12 = vcmp.ge.f32.partialorder %v775_v49, 30.0 }
 0x1c2   : > { %v780_v52 = vsel %vm779_vm12, -65.0, %v775_v49  ;;  %v1435_v53 = vsel %vm779_vm12, 1.0, %v1759_v17 }
 0x1c3   : > { %v778_v54 = vadd.f32 %v777_v51, %v776_v50  ;;  %v785_v55 = vadd.f32 %v1435_v53, %v769_v41  ;;  %v786_v56 = vmul.f32 0.02, %v780_v52 }
 0x1c5   : > { %v781_v57 = vadd.f32 8.0, %v778_v54  ;;  %v787_v58 = vadd.f32 3.5, %v786_v56 }
 0x1c7   : > { %v782_v59 = vsel %vm779_vm12, %v781_v57, %v778_v54  ;;  %v788_v60 = vmul.f32 %v787_v58, %v780_v52 }
 0x1c8   : > { %v789_v61 = vmul.f32 0.5, %v782_v59  ;;  %v792_v0 = vmul.f32 0.99, %v782_v59 }
 0x1ca   : > { %v790_v62 = vsub.f32 %v2020_v2, %v789_v61 }
 0x1cc   : > { %v791_v63 = vadd.f32 %v790_v62, %v788_v60 }
 0x1ce   : > { %v793_v1 = vmul.f32 0.002, %v791_v63  ;;  %vm795_vm13 = vcmp.ge.f32.partialorder %v791_v63, 30.0 }
 0x1cf   : > { %v796_v3 = vsel %vm795_vm13, -65.0, %v791_v63  ;;  %v1436_v4 = vsel %vm795_vm13, 1.0, %v1759_v17 }
 0x1d0   : > { %v794_v5 = vadd.f32 %v793_v1, %v792_v0  ;;  %v801_v6 = vadd.f32 %v1436_v4, %v785_v55  ;;  %v802_v7 = vmul.f32 0.02, %v796_v3 }
 0x1d2   : > { %v797_v8 = vadd.f32 8.0, %v794_v5  ;;  %v803_v9 = vadd.f32 3.5, %v802_v7 }
 0x1d4   : > { %v798_v10 = vsel %vm795_vm13, %v797_v8, %v794_v5  ;;  %v804_v11 = vmul.f32 %v803_v9, %v796_v3 }
 0x1d5   : > { %v805_v12 = vmul.f32 0.5, %v798_v10  ;;  %v808_v15 = vmul.f32 0.99, %v798_v10 }
 0x1d7   : > { %v806_v13 = vsub.f32 %v2020_v2, %v805_v12 }
 0x1d9   : > { %v807_v14 = vadd.f32 %v806_v13, %v804_v11 }
 0x1db   : > { %v809_v16 = vmul.f32 0.002, %v807_v14  ;;  %vm811_vm14 = vcmp.ge.f32.partialorder %v807_v14, 30.0 }
 0x1dc   : > { %v812_v18 = vsel %vm811_vm14, -65.0, %v807_v14  ;;  %v1437_v19 = vsel %vm811_vm14, 1.0, %v1759_v17 }
 0x1dd   : > { %v810_v20 = vadd.f32 %v809_v16, %v808_v15  ;;  %v817_v21 = vadd.f32 %v1437_v19, %v801_v6  ;;  %v818_v22 = vmul.f32 0.02, %v812_v18 }
 0x1df   : > { %v813_v23 = vadd.f32 8.0, %v810_v20  ;;  %v819_v24 = vadd.f32 3.5, %v818_v22 }
 0x1e1   : > { %v814_v25 = vsel %vm811_vm14, %v813_v23, %v810_v20  ;;  %v820_v26 = vmul.f32 %v819_v24, %v812_v18 }
 0x1e2   : > { %v821_v27 = vmul.f32 0.5, %v814_v25  ;;  %v824_v30 = vmul.f32 0.99, %v814_v25 }
 0x1e4   : > { %v822_v28 = vsub.f32 %v2020_v2, %v821_v27 }
 0x1e6   : > { %v823_v29 = vadd.f32 %v822_v28, %v820_v26 }
 0x1e8   : > { %v825_v31 = vmul.f32 0.002, %v823_v29  ;;  %vm827_vm15 = vcmp.ge.f32.partialorder %v823_v29, 30.0 }
 0x1e9   : > { %v828_v32 = vsel %vm827_vm15, -65.0, %v823_v29  ;;  %v1438_v33 = vsel %vm827_vm15, 1.0, %v1759_v17 }
 0x1ea   : > { %v826_v34 = vadd.f32 %v825_v31, %v824_v30  ;;  %v833_v35 = vadd.f32 %v1438_v33, %v817_v21  ;;  %v834_v36 = vmul.f32 0.02, %v828_v32 }
 0x1ec   : > { %v829_v37 = vadd.f32 8.0, %v826_v34  ;;  %v835_v38 = vadd.f32 3.5, %v834_v36 }
 0x1ee   : > { %v830_v39 = vsel %vm827_vm15, %v829_v37, %v826_v34  ;;  %v836_v40 = vmul.f32 %v835_v38, %v828_v32 }
 0x1ef   : > { %v837_v41 = vmul.f32 0.5, %v830_v39  ;;  %v840_v44 = vmul.f32 0.99, %v830_v39 }
 0x1f1   : > { %v838_v42 = vsub.f32 %v2020_v2, %v837_v41 }
 0x1f3   : > { %v839_v43 = vadd.f32 %v838_v42, %v836_v40 }
 0x1f5   : > { %v841_v45 = vmul.f32 0.002, %v839_v43  ;;  %vm843_vm0 = vcmp.ge.f32.partialorder %v839_v43, 30.0 }
 0x1f6   : > { %v844_v46 = vsel %vm843_vm0, -65.0, %v839_v43  ;;  %v1439_v47 = vsel %vm843_vm0, 1.0, %v1759_v17 }
 0x1f7   : > { %v842_v48 = vadd.f32 %v841_v45, %v840_v44  ;;  %v849_v49 = vadd.f32 %v1439_v47, %v833_v35  ;;  %v850_v50 = vmul.f32 0.02, %v844_v46 }
 0x1f9   : > { %v845_v51 = vadd.f32 8.0, %v842_v48  ;;  %v851_v52 = vadd.f32 3.5, %v850_v50 }
 0x1fb   : > { %v846_v53 = vsel %vm843_vm0, %v845_v51, %v842_v48  ;;  %v852_v54 = vmul.f32 %v851_v52, %v844_v46 }
 0x1fc   : > { %v853_v55 = vmul.f32 0.5, %v846_v53  ;;  %v856_v58 = vmul.f32 0.99, %v846_v53 }
 0x1fe   : > { %v854_v56 = vsub.f32 %v2020_v2, %v853_v55 }
 0x200   : > { %v855_v57 = vadd.f32 %v854_v56, %v852_v54 }
 0x202   : > { %v857_v59 = vmul.f32 0.002, %v855_v57  ;;  %vm859_vm1 = vcmp.ge.f32.partialorder %v855_v57, 30.0 }
 0x203   : > { %v860_v60 = vsel %vm859_vm1, -65.0, %v855_v57  ;;  %v1440_v61 = vsel %vm859_vm1, 1.0, %v1759_v17 }
 0x204   : > { %v858_v62 = vadd.f32 %v857_v59, %v856_v58  ;;  %v865_v63 = vadd.f32 %v1440_v61, %v849_v49  ;;  %v866_v0 = vmul.f32 0.02, %v860_v60 }
 0x206   : > { %v861_v1 = vadd.f32 8.0, %v858_v62  ;;  %v867_v3 = vadd.f32 3.5, %v866_v0 }
 0x208   : > { %v862_v4 = vsel %vm859_vm1, %v861_v1, %v858_v62  ;;  %v868_v5 = vmul.f32 %v867_v3, %v860_v60 }
 0x209   : > { %v869_v6 = vmul.f32 0.5, %v862_v4  ;;  %v872_v9 = vmul.f32 0.99, %v862_v4 }
 0x20b   : > { %v870_v7 = vsub.f32 %v2020_v2, %v869_v6 }
 0x20d   : > { %v871_v8 = vadd.f32 %v870_v7, %v868_v5 }
 0x20f   : > { %v873_v10 = vmul.f32 0.002, %v871_v8  ;;  %vm875_vm2 = vcmp.ge.f32.partialorder %v871_v8, 30.0 }
 0x210   : > { %v876_v11 = vsel %vm875_vm2, -65.0, %v871_v8  ;;  %v1441_v12 = vsel %vm875_vm2, 1.0, %v1759_v17 }
 0x211   : > { %v874_v13 = vadd.f32 %v873_v10, %v872_v9  ;;  %v881_v14 = vadd.f32 %v1441_v12, %v865_v63  ;;  %v882_v15 = vmul.f32 0.02, %v876_v11 }
 0x213   : > { %v877_v16 = vadd.f32 8.0, %v874_v13  ;;  %v883_v18 = vadd.f32 3.5, %v882_v15 }
 0x215   : > { %v878_v19 = vsel %vm875_vm2, %v877_v16, %v874_v13  ;;  %v884_v20 = vmul.f32 %v883_v18, %v876_v11 }
 0x216   : > { %v885_v21 = vmul.f32 0.5, %v878_v19  ;;  %v888_v24 = vmul.f32 0.99, %v878_v19 }
 0x218   : > { %v886_v22 = vsub.f32 %v2020_v2, %v885_v21 }
 0x21a   : > { %v887_v23 = vadd.f32 %v886_v22, %v884_v20 }
 0x21c   : > { %v889_v25 = vmul.f32 0.002, %v887_v23  ;;  %vm891_vm3 = vcmp.ge.f32.partialorder %v887_v23, 30.0 }
 0x21d   : > { %v892_v26 = vsel %vm891_vm3, -65.0, %v887_v23  ;;  %v1442_v27 = vsel %vm891_vm3, 1.0, %v1759_v17 }
 0x21e   : > { %v890_v28 = vadd.f32 %v889_v25, %v888_v24  ;;  %v897_v29 = vadd.f32 %v1442_v27, %v881_v14  ;;  %v898_v30 = vmul.f32 0.02, %v892_v26 }
 0x220   : > { %v893_v31 = vadd.f32 8.0, %v890_v28  ;;  %v899_v32 = vadd.f32 3.5, %v898_v30 }
 0x222   : > { %v894_v33 = vsel %vm891_vm3, %v893_v31, %v890_v28  ;;  %v900_v34 = vmul.f32 %v899_v32, %v892_v26 }
 0x223   : > { %v901_v35 = vmul.f32 0.5, %v894_v33  ;;  %v904_v38 = vmul.f32 0.99, %v894_v33 }
 0x225   : > { %v902_v36 = vsub.f32 %v2020_v2, %v901_v35 }
 0x227   : > { %v903_v37 = vadd.f32 %v902_v36, %v900_v34 }
 0x229   : > { %v905_v39 = vmul.f32 0.002, %v903_v37  ;;  %vm907_vm4 = vcmp.ge.f32.partialorder %v903_v37, 30.0 }
 0x22a   : > { %v908_v40 = vsel %vm907_vm4, -65.0, %v903_v37  ;;  %v1443_v41 = vsel %vm907_vm4, 1.0, %v1759_v17 }
 0x22b   : > { %v906_v42 = vadd.f32 %v905_v39, %v904_v38  ;;  %v913_v43 = vadd.f32 %v1443_v41, %v897_v29  ;;  %v914_v44 = vmul.f32 0.02, %v908_v40 }
 0x22d   : > { %v909_v45 = vadd.f32 8.0, %v906_v42  ;;  %v915_v46 = vadd.f32 3.5, %v914_v44 }
 0x22f   : > { %v910_v47 = vsel %vm907_vm4, %v909_v45, %v906_v42  ;;  %v916_v48 = vmul.f32 %v915_v46, %v908_v40 }
 0x230   : > { %v917_v49 = vmul.f32 0.5, %v910_v47  ;;  %v920_v52 = vmul.f32 0.99, %v910_v47 }
 0x232   : > { %v918_v50 = vsub.f32 %v2020_v2, %v917_v49 }
 0x234   : > { %v919_v51 = vadd.f32 %v918_v50, %v916_v48 }
 0x236   : > { %v921_v53 = vmul.f32 0.002, %v919_v51  ;;  %vm923_vm5 = vcmp.ge.f32.partialorder %v919_v51, 30.0 }
 0x237   : > { %v924_v54 = vsel %vm923_vm5, -65.0, %v919_v51  ;;  %v1444_v55 = vsel %vm923_vm5, 1.0, %v1759_v17 }
 0x238   : > { %v922_v56 = vadd.f32 %v921_v53, %v920_v52  ;;  %v929_v57 = vadd.f32 %v1444_v55, %v913_v43  ;;  %v930_v58 = vmul.f32 0.02, %v924_v54 }
 0x23a   : > { %v925_v59 = vadd.f32 8.0, %v922_v56  ;;  %v931_v60 = vadd.f32 3.5, %v930_v58 }
 0x23c   : > { %v926_v61 = vsel %vm923_vm5, %v925_v59, %v922_v56  ;;  %v932_v62 = vmul.f32 %v931_v60, %v924_v54 }
 0x23d   : > { %v933_v63 = vmul.f32 0.5, %v926_v61  ;;  %v936_v3 = vmul.f32 0.99, %v926_v61 }
 0x23f   : > { %v934_v0 = vsub.f32 %v2020_v2, %v933_v63 }
 0x241   : > { %v935_v1 = vadd.f32 %v934_v0, %v932_v62 }
 0x243   : > { %v937_v4 = vmul.f32 0.002, %v935_v1  ;;  %vm939_vm6 = vcmp.ge.f32.partialorder %v935_v1, 30.0 }
 0x244   : > { %v940_v5 = vsel %vm939_vm6, -65.0, %v935_v1  ;;  %v1445_v6 = vsel %vm939_vm6, 1.0, %v1759_v17 }
 0x245   : > { %v938_v7 = vadd.f32 %v937_v4, %v936_v3  ;;  %v945_v8 = vadd.f32 %v1445_v6, %v929_v57  ;;  %v946_v9 = vmul.f32 0.02, %v940_v5 }
 0x247   : > { %v941_v10 = vadd.f32 8.0, %v938_v7  ;;  %v947_v11 = vadd.f32 3.5, %v946_v9 }
 0x249   : > { %v942_v12 = vsel %vm939_vm6, %v941_v10, %v938_v7  ;;  %v948_v13 = vmul.f32 %v947_v11, %v940_v5 }
 0x24a   : > { %v949_v14 = vmul.f32 0.5, %v942_v12  ;;  %v952_v18 = vmul.f32 0.99, %v942_v12 }
 0x24c   : > { %v950_v15 = vsub.f32 %v2020_v2, %v949_v14 }
 0x24e   : > { %v951_v16 = vadd.f32 %v950_v15, %v948_v13 }
 0x250   : > { %v953_v19 = vmul.f32 0.002, %v951_v16  ;;  %vm955_vm7 = vcmp.ge.f32.partialorder %v951_v16, 30.0 }
 0x251   : > { %v956_v20 = vsel %vm955_vm7, -65.0, %v951_v16  ;;  %v1446_v21 = vsel %vm955_vm7, 1.0, %v1759_v17 }
 0x252   : > { %v954_v22 = vadd.f32 %v953_v19, %v952_v18  ;;  %v961_v23 = vadd.f32 %v1446_v21, %v945_v8  ;;  %v962_v24 = vmul.f32 0.02, %v956_v20 }
 0x254   : > { %v957_v25 = vadd.f32 8.0, %v954_v22  ;;  %v963_v26 = vadd.f32 3.5, %v962_v24 }
 0x256   : > { %v958_v27 = vsel %vm955_vm7, %v957_v25, %v954_v22  ;;  %v964_v28 = vmul.f32 %v963_v26, %v956_v20 }
 0x257   : > { %v965_v29 = vmul.f32 0.5, %v958_v27  ;;  %v968_v32 = vmul.f32 0.99, %v958_v27 }
 0x259   : > { %v966_v30 = vsub.f32 %v2020_v2, %v965_v29 }
 0x25b   : > { %v967_v31 = vadd.f32 %v966_v30, %v964_v28 }
 0x25d   : > { %v969_v33 = vmul.f32 0.002, %v967_v31  ;;  %vm971_vm8 = vcmp.ge.f32.partialorder %v967_v31, 30.0 }
 0x25e   : > { %v972_v34 = vsel %vm971_vm8, -65.0, %v967_v31  ;;  %v1447_v35 = vsel %vm971_vm8, 1.0, %v1759_v17 }
 0x25f   : > { %v970_v36 = vadd.f32 %v969_v33, %v968_v32  ;;  %v977_v37 = vadd.f32 %v1447_v35, %v961_v23  ;;  %v978_v38 = vmul.f32 0.02, %v972_v34 }
 0x261   : > { %v973_v39 = vadd.f32 8.0, %v970_v36  ;;  %v979_v40 = vadd.f32 3.5, %v978_v38 }
 0x263   : > { %v974_v41 = vsel %vm971_vm8, %v973_v39, %v970_v36  ;;  %v980_v42 = vmul.f32 %v979_v40, %v972_v34 }
 0x264   : > { %v981_v43 = vmul.f32 0.5, %v974_v41  ;;  %v984_v46 = vmul.f32 0.99, %v974_v41 }
 0x266   : > { %v982_v44 = vsub.f32 %v2020_v2, %v981_v43 }
 0x268   : > { %v983_v45 = vadd.f32 %v982_v44, %v980_v42 }
 0x26a   : > { %v985_v47 = vmul.f32 0.002, %v983_v45  ;;  %vm987_vm9 = vcmp.ge.f32.partialorder %v983_v45, 30.0 }
 0x26b   : > { %v988_v48 = vsel %vm987_vm9, -65.0, %v983_v45  ;;  %v1448_v49 = vsel %vm987_vm9, 1.0, %v1759_v17 }
 0x26c   : > { %v986_v50 = vadd.f32 %v985_v47, %v984_v46  ;;  %v993_v51 = vadd.f32 %v1448_v49, %v977_v37  ;;  %v994_v52 = vmul.f32 0.02, %v988_v48 }
 0x26e   : > { %v989_v53 = vadd.f32 8.0, %v986_v50  ;;  %v995_v54 = vadd.f32 3.5, %v994_v52 }
 0x270   : > { %v990_v55 = vsel %vm987_vm9, %v989_v53, %v986_v50  ;;  %v996_v56 = vmul.f32 %v995_v54, %v988_v48 }
 0x271   : > { %v997_v57 = vmul.f32 0.5, %v990_v55  ;;  %v1000_v60 = vmul.f32 0.99, %v990_v55 }
 0x273   : > { %v998_v58 = vsub.f32 %v2020_v2, %v997_v57 }
 0x275   : > { %v999_v59 = vadd.f32 %v998_v58, %v996_v56 }
 0x277   : > { %v1001_v61 = vmul.f32 0.002, %v999_v59  ;;  %vm1003_vm10 = vcmp.ge.f32.partialorder %v999_v59, 30.0 }
 0x278   : > { %v1004_v62 = vsel %vm1003_vm10, -65.0, %v999_v59  ;;  %v1449_v63 = vsel %vm1003_vm10, 1.0, %v1759_v17 }
 0x279   : > { %v1002_v0 = vadd.f32 %v1001_v61, %v1000_v60  ;;  %v1009_v1 = vadd.f32 %v1449_v63, %v993_v51  ;;  %v1010_v3 = vmul.f32 0.02, %v1004_v62 }
 0x27b   : > { %v1005_v4 = vadd.f32 8.0, %v1002_v0  ;;  %v1011_v5 = vadd.f32 3.5, %v1010_v3 }
 0x27d   : > { %v1006_v6 = vsel %vm1003_vm10, %v1005_v4, %v1002_v0  ;;  %v1012_v7 = vmul.f32 %v1011_v5, %v1004_v62 }
 0x27e   : > { %v1013_v8 = vmul.f32 0.5, %v1006_v6  ;;  %v1016_v11 = vmul.f32 0.99, %v1006_v6 }
 0x280   : > { %v1014_v9 = vsub.f32 %v2020_v2, %v1013_v8 }
 0x282   : > { %v1015_v10 = vadd.f32 %v1014_v9, %v1012_v7 }
 0x284   : > { %v1017_v12 = vmul.f32 0.002, %v1015_v10  ;;  %vm1019_vm11 = vcmp.ge.f32.partialorder %v1015_v10, 30.0 }
 0x285   : > { %v1020_v13 = vsel %vm1019_vm11, -65.0, %v1015_v10  ;;  %v1450_v14 = vsel %vm1019_vm11, 1.0, %v1759_v17 }
 0x286   : > { %v1018_v15 = vadd.f32 %v1017_v12, %v1016_v11  ;;  %v1025_v16 = vadd.f32 %v1450_v14, %v1009_v1  ;;  %v1026_v18 = vmul.f32 0.02, %v1020_v13 }
 0x288   : > { %v1021_v19 = vadd.f32 8.0, %v1018_v15  ;;  %v1027_v20 = vadd.f32 3.5, %v1026_v18 }
 0x28a   : > { %v1022_v21 = vsel %vm1019_vm11, %v1021_v19, %v1018_v15  ;;  %v1028_v22 = vmul.f32 %v1027_v20, %v1020_v13 }
 0x28b   : > { %v1029_v23 = vmul.f32 0.5, %v1022_v21  ;;  %v1032_v26 = vmul.f32 0.99, %v1022_v21 }
 0x28d   : > { %v1030_v24 = vsub.f32 %v2020_v2, %v1029_v23 }
 0x28f   : > { %v1031_v25 = vadd.f32 %v1030_v24, %v1028_v22 }
 0x291   : > { %v1033_v27 = vmul.f32 0.002, %v1031_v25  ;;  %vm1035_vm12 = vcmp.ge.f32.partialorder %v1031_v25, 30.0 }
 0x292   : > { %v1036_v28 = vsel %vm1035_vm12, -65.0, %v1031_v25  ;;  %v1451_v29 = vsel %vm1035_vm12, 1.0, %v1759_v17 }
 0x293   : > { %v1034_v30 = vadd.f32 %v1033_v27, %v1032_v26  ;;  %v1041_v31 = vadd.f32 %v1451_v29, %v1025_v16  ;;  %v1042_v32 = vmul.f32 0.02, %v1036_v28 }
 0x295   : > { %v1037_v33 = vadd.f32 8.0, %v1034_v30  ;;  %v1043_v34 = vadd.f32 3.5, %v1042_v32 }
 0x297   : > { %v1038_v35 = vsel %vm1035_vm12, %v1037_v33, %v1034_v30  ;;  %v1044_v36 = vmul.f32 %v1043_v34, %v1036_v28 }
 0x298   : > { %v1045_v37 = vmul.f32 0.5, %v1038_v35  ;;  %v1048_v40 = vmul.f32 0.99, %v1038_v35 }
 0x29a   : > { %v1046_v38 = vsub.f32 %v2020_v2, %v1045_v37 }
 0x29c   : > { %v1047_v39 = vadd.f32 %v1046_v38, %v1044_v36 }
 0x29e   : > { %v1049_v41 = vmul.f32 0.002, %v1047_v39  ;;  %vm1051_vm13 = vcmp.ge.f32.partialorder %v1047_v39, 30.0 }
 0x29f   : > { %v1052_v42 = vsel %vm1051_vm13, -65.0, %v1047_v39  ;;  %v1452_v43 = vsel %vm1051_vm13, 1.0, %v1759_v17 }
 0x2a0   : > { %v1050_v44 = vadd.f32 %v1049_v41, %v1048_v40  ;;  %v1057_v45 = vadd.f32 %v1452_v43, %v1041_v31  ;;  %v1058_v46 = vmul.f32 0.02, %v1052_v42 }
 0x2a2   : > { %v1053_v47 = vadd.f32 8.0, %v1050_v44  ;;  %v1059_v48 = vadd.f32 3.5, %v1058_v46 }
 0x2a4   : > { %v1054_v49 = vsel %vm1051_vm13, %v1053_v47, %v1050_v44  ;;  %v1060_v50 = vmul.f32 %v1059_v48, %v1052_v42 }
 0x2a5   : > { %v1061_v51 = vmul.f32 0.5, %v1054_v49  ;;  %v1064_v54 = vmul.f32 0.99, %v1054_v49 }
 0x2a7   : > { %v1062_v52 = vsub.f32 %v2020_v2, %v1061_v51 }
 0x2a9   : > { %v1063_v53 = vadd.f32 %v1062_v52, %v1060_v50 }
 0x2ab   : > { %v1065_v55 = vmul.f32 0.002, %v1063_v53  ;;  %vm1067_vm14 = vcmp.ge.f32.partialorder %v1063_v53, 30.0 }
 0x2ac   : > { %v1068_v56 = vsel %vm1067_vm14, -65.0, %v1063_v53  ;;  %v1453_v57 = vsel %vm1067_vm14, 1.0, %v1759_v17 }
 0x2ad   : > { %v1066_v58 = vadd.f32 %v1065_v55, %v1064_v54  ;;  %v1073_v59 = vadd.f32 %v1453_v57, %v1057_v45  ;;  %v1074_v60 = vmul.f32 0.02, %v1068_v56 }
 0x2af   : > { %v1069_v61 = vadd.f32 8.0, %v1066_v58  ;;  %v1075_v62 = vadd.f32 3.5, %v1074_v60 }
 0x2b1   : > { %v1070_v63 = vsel %vm1067_vm14, %v1069_v61, %v1066_v58  ;;  %v1076_v0 = vmul.f32 %v1075_v62, %v1068_v56 }
 0x2b2   : > { %v1077_v1 = vmul.f32 0.5, %v1070_v63  ;;  %v1080_v5 = vmul.f32 0.99, %v1070_v63 }
 0x2b4   : > { %v1078_v3 = vsub.f32 %v2020_v2, %v1077_v1 }
 0x2b6   : > { %v1079_v4 = vadd.f32 %v1078_v3, %v1076_v0 }
 0x2b7   : > { %1659 = shalt.err (!%p1656_p1)
}
 0x2b8   : > { %s1660_s26 = scalar_lea.hbm %s2109_s13, 128  ;;  %s1664_s11 = scalar_lea.hbm %s2222_s4, 256 }
 0x2b9   : > { %p1661_p5 = scmp.ne.s32.totalorder %s2109_s13, %s1660_s26  ;;  %p1665_p4 = scmp.lt.u32.totalorder %s2109_s13, %s2222_s4 }
 0x2ba   : > { %p1666_p10 = scmp.lt.u32.totalorder %s1664_s11, %s1660_s26  ;;  %p1668_p9 = scmp.lt.u32.totalorder %s1660_s26, %s2109_s13 }
 0x2bb   : > { %p1662_p11 = pnand %p1661_p5, %p2239_p12 }
 0x2bc   : > { %p1667_p7 = por %p1666_p10, %p1665_p4 }
 0x2bd   : > { %p1663_p8 = pneg %p1662_p11 }
 0x2be   : > { %p1669_p13 = por %p1668_p9, %p1667_p7 }
 0x2c0   : > { %p1670_p6 = pnand %p1669_p13, %p1663_p8 }
 0x2c2   : > { %1673 = shalt.err (!%p1670_p6)
}
 0x2c3   : > { %1481 = dma.vmem_to_hbm [thread:$0]  (%p2239_p12), %s1263_s8, 128, %s2109_s13, %s1236_s14   ;;  %v1081_v6 = vmul.f32 0.002, %v1079_v4  ;;  %vm1083_vm15 = vcmp.ge.f32.partialorder %v1079_v4, 30.0 }
 0x2c4   : > { %v1084_v7 = vsel %vm1083_vm15, -65.0, %v1079_v4  ;;  %v1454_v8 = vsel %vm1083_vm15, 1.0, %v1759_v17  ;;  %s266_s12 = scalar_lea.vmem [#allocation8], %s1976_s9  ;;  %s2174_s6 = scalar_lea.hbm %s2221_s3, %s1466_s23 }
 0x2c5   : > { %v1082_v9 = vadd.f32 %v1081_v6, %v1080_v5  ;;  %v1089_v10 = vadd.f32 %v1454_v8, %v1073_v59  ;;  %v1090_v11 = vmul.f32 0.02, %v1084_v7  ;;  %s1249_s13 = sshll.u32 %s266_s12, 4  ;;  %s1231_s7 = scalar_lea.sflag [#allocation4], %s1962_s24  ;;  %s2176_s13 = int_to_ptr.vmem [resolvable:$true] %s1249_s13 }
 0x2c6   : > { %s1674_s20 = scalar_lea.vmem %s2176_s13, 128  ;;  %s1761_s9 = smov [#allocation8]  }
 0x2c7   : > { %v1085_v12 = vadd.f32 8.0, %v1082_v9  ;;  %v1091_v13 = vadd.f32 3.5, %v1090_v11  ;;  %p1675_p2 = scmp.ne.s32.totalorder %s2176_s13, %s1674_s20  ;;  %s1678_s21 = sshll.u32 %s1761_s9, 4  ;;  %s1679_s21 = int_to_ptr.vmem [resolvable:$false] %s1678_s21 }
 0x2c8   : > { %s1680_s27 = scalar_lea.vmem %s1679_s21, 256  ;;  %p1681_p1 = scmp.lt.s32.totalorder %s2176_s13, %s1679_s21 }
 0x2c9   : > { %v1086_v14 = vsel %vm1083_vm15, %v1085_v12, %v1082_v9  ;;  %v1092_v15 = vmul.f32 %v1091_v13, %v1084_v7  ;;  %p1676_p0 = pnand %p1675_p2, %p2239_p12  ;;  %p1682_p5 = scmp.lt.s32.totalorder %s1680_s27, %s1674_s20 }
 0x2ca   : > { %v1093_v16 = vmul.f32 0.5, %v1086_v14  ;;  %v1096_v20 = vmul.f32 0.99, %v1086_v14 }
 0x2cb   : > { %p1677_p3 = pneg %p1676_p0  ;;  %p1683_p11 = por %p1682_p5, %p1681_p1 }
 0x2cc   : > { %v1094_v18 = vsub.f32 %v2020_v2, %v1093_v16 }
 0x2cd   : > { %p1684_p8 = pnand %p1683_p11, %p1677_p3 }
 0x2ce   : > { %v1095_v19 = vadd.f32 %v1094_v18, %v1092_v15 }
 0x2d0   : > { %v1097_v21 = vmul.f32 0.002, %v1095_v19  ;;  %vm1099_vm0 = vcmp.ge.f32.partialorder %v1095_v19, 30.0 }
 0x2d1   : > { %v1100_v22 = vsel %vm1099_vm0, -65.0, %v1095_v19  ;;  %v1455_v23 = vsel %vm1099_vm0, 1.0, %v1759_v17 }
 0x2d2   : > { %v1098_v24 = vadd.f32 %v1097_v21, %v1096_v20  ;;  %v1105_v25 = vadd.f32 %v1455_v23, %v1089_v10  ;;  %v1106_v26 = vmul.f32 0.02, %v1100_v22 }
 0x2d4   : > { %v1101_v27 = vadd.f32 8.0, %v1098_v24  ;;  %v1107_v28 = vadd.f32 3.5, %v1106_v26 }
 0x2d6   : > { %v1102_v29 = vsel %vm1099_vm0, %v1101_v27, %v1098_v24  ;;  %v1108_v30 = vmul.f32 %v1107_v28, %v1100_v22 }
 0x2d7   : > { %v1109_v31 = vmul.f32 0.5, %v1102_v29  ;;  %v1112_v34 = vmul.f32 0.99, %v1102_v29 }
 0x2d9   : > { %v1110_v32 = vsub.f32 %v2020_v2, %v1109_v31 }
 0x2db   : > { %v1111_v33 = vadd.f32 %v1110_v32, %v1108_v30 }
 0x2dd   : > { %v1113_v35 = vmul.f32 0.002, %v1111_v33  ;;  %vm1115_vm1 = vcmp.ge.f32.partialorder %v1111_v33, 30.0 }
 0x2de   : > { %v1116_v36 = vsel %vm1115_vm1, -65.0, %v1111_v33  ;;  %v1456_v37 = vsel %vm1115_vm1, 1.0, %v1759_v17 }
 0x2df   : > { %v1114_v38 = vadd.f32 %v1113_v35, %v1112_v34  ;;  %v2136_v39 = vadd.f32 %v1456_v37, %v1105_v25  ;;  %v1122_v40 = vmul.f32 0.02, %v1116_v36 }
 0x2e1   : > { %v1117_v41 = vadd.f32 8.0, %v1114_v38  ;;  %v1123_v42 = vadd.f32 3.5, %v1122_v40 }
 0x2e3   : > { %v1118_v43 = vsel %vm1115_vm1, %v1117_v41, %v1114_v38  ;;  %v1124_v44 = vmul.f32 %v1123_v42, %v1116_v36 }
 0x2e4   : > { %v1125_v45 = vmul.f32 0.5, %v1118_v43  ;;  %v1128_v48 = vmul.f32 0.99, %v1118_v43 }
 0x2e6   : > { %v1126_v46 = vsub.f32 %v2020_v2, %v1125_v45 }
 0x2e8   : > { %v1127_v47 = vadd.f32 %v1126_v46, %v1124_v44 }
 0x2ea   : > { %v1129_v49 = vmul.f32 0.002, %v1127_v47  ;;  %vm1131_vm2 = vcmp.ge.f32.partialorder %v1127_v47, 30.0 }
 0x2eb   : > { %v1132_v50 = vsel %vm1131_vm2, -65.0, %v1127_v47  ;;  %v1457_v36 = vsel %vm1131_vm2, 1.0, %v1759_v17 }
 0x2ec   : > { %v1130_v51 = vadd.f32 %v1129_v49, %v1128_v48  ;;  %v1138_v52 = vmul.f32 0.02, %v1132_v50  ;;  %v1137_v41 = vadd.f32 %v1457_v36, %v2136_v39 }
 0x2ee   : > { %v1133_v53 = vadd.f32 8.0, %v1130_v51  ;;  %v1139_v54 = vadd.f32 3.5, %v1138_v52 }
 0x2f0   : > { %v1134_v55 = vsel %vm1131_vm2, %v1133_v53, %v1130_v51  ;;  %v1140_v56 = vmul.f32 %v1139_v54, %v1132_v50 }
 0x2f1   : > { %v1141_v57 = vmul.f32 0.5, %v1134_v55  ;;  %v1144_v60 = vmul.f32 0.99, %v1134_v55 }
 0x2f3   : > { %v1142_v58 = vsub.f32 %v2020_v2, %v1141_v57 }
 0x2f5   : > { %v1143_v59 = vadd.f32 %v1142_v58, %v1140_v56 }
 0x2f7   : > { %v1145_v61 = vmul.f32 0.002, %v1143_v59  ;;  %vm1147_vm3 = vcmp.ge.f32.partialorder %v1143_v59, 30.0 }
 0x2f8   : > { %v1148_v62 = vsel %vm1147_vm3, -65.0, %v1143_v59  ;;  %v1458_v44 = vsel %vm1147_vm3, 1.0, %v1759_v17 }
 0x2f9   : > { %v1146_v63 = vadd.f32 %v1145_v61, %v1144_v60  ;;  %v1154_v0 = vmul.f32 0.02, %v1148_v62  ;;  %v1153_v49 = vadd.f32 %v1458_v44, %v1137_v41 }
 0x2fb   : > { %v1149_v1 = vadd.f32 8.0, %v1146_v63  ;;  %v1155_v3 = vadd.f32 3.5, %v1154_v0 }
 0x2fd   : > { %v1150_v4 = vsel %vm1147_vm3, %v1149_v1, %v1146_v63  ;;  %v1156_v5 = vmul.f32 %v1155_v3, %v1148_v62 }
 0x2fe   : > { %v1157_v6 = vmul.f32 0.5, %v1150_v4  ;;  %v1160_v9 = vmul.f32 0.99, %v1150_v4 }
 0x300   : > { %v1158_v7 = vsub.f32 %v2020_v2, %v1157_v6 }
 0x302   : > { %v1159_v8 = vadd.f32 %v1158_v7, %v1156_v5 }
 0x304   : > { %v1161_v10 = vmul.f32 0.002, %v1159_v8  ;;  %vm1163_vm4 = vcmp.ge.f32.partialorder %v1159_v8, 30.0 }
 0x305   : > { %v1164_v11 = vsel %vm1163_vm4, -65.0, %v1159_v8  ;;  %v1459_v47 = vsel %vm1163_vm4, 1.0, %v1759_v17 }
 0x306   : > { %v1162_v12 = vadd.f32 %v1161_v10, %v1160_v9  ;;  %v1170_v13 = vmul.f32 0.02, %v1164_v11  ;;  %v1169_v53 = vadd.f32 %v1459_v47, %v1153_v49 }
 0x308   : > { %v1165_v14 = vadd.f32 8.0, %v1162_v12  ;;  %v1171_v15 = vadd.f32 3.5, %v1170_v13 }
 0x30a   : > { %v1166_v16 = vsel %vm1163_vm4, %v1165_v14, %v1162_v12  ;;  %v1172_v18 = vmul.f32 %v1171_v15, %v1164_v11 }
 0x30b   : > { %v1173_v19 = vmul.f32 0.5, %v1166_v16  ;;  %v1176_v22 = vmul.f32 0.99, %v1166_v16 }
 0x30d   : > { %v1174_v20 = vsub.f32 %v2020_v2, %v1173_v19 }
 0x30f   : > { %v1175_v21 = vadd.f32 %v1174_v20, %v1172_v18 }
 0x311   : > { %v1177_v23 = vmul.f32 0.002, %v1175_v21  ;;  %vm1179_vm5 = vcmp.ge.f32.partialorder %v1175_v21, 30.0 }
 0x312   : > { %v1180_v24 = vsel %vm1179_vm5, -65.0, %v1175_v21  ;;  %v1460_v39 = vsel %vm1179_vm5, 1.0, %v1759_v17 }
 0x313   : > { %v1178_v25 = vadd.f32 %v1177_v23, %v1176_v22  ;;  %v1186_v26 = vmul.f32 0.02, %v1180_v24  ;;  %v1185_v58 = vadd.f32 %v1460_v39, %v1169_v53 }
 0x315   : > { %v1181_v27 = vadd.f32 8.0, %v1178_v25  ;;  %v1187_v28 = vadd.f32 3.5, %v1186_v26 }
 0x317   : > { %v1182_v29 = vsel %vm1179_vm5, %v1181_v27, %v1178_v25  ;;  %v1188_v30 = vmul.f32 %v1187_v28, %v1180_v24 }
 0x318   : > { %v1189_v31 = vmul.f32 0.5, %v1182_v29  ;;  %v1192_v34 = vmul.f32 0.99, %v1182_v29 }
 0x31a   : > { %v1190_v32 = vsub.f32 %v2020_v2, %v1189_v31 }
 0x31c   : > { %v1191_v33 = vadd.f32 %v1190_v32, %v1188_v30 }
 0x31e   : > { %v1193_v35 = vmul.f32 0.002, %v1191_v33  ;;  %vm1195_vm6 = vcmp.ge.f32.partialorder %v1191_v33, 30.0 }
 0x31f   : > { %v1196_v37 = vsel %vm1195_vm6, -65.0, %v1191_v33  ;;  %v1461_v59 = vsel %vm1195_vm6, 1.0, %v1759_v17 }
 0x320   : > { %v1194_v38 = vadd.f32 %v1193_v35, %v1192_v34  ;;  %v1202_v40 = vmul.f32 0.02, %v1196_v37  ;;  %v1201_v63 = vadd.f32 %v1461_v59, %v1185_v58 }
 0x322   : > { %v1197_v42 = vadd.f32 8.0, %v1194_v38  ;;  %v1203_v43 = vadd.f32 3.5, %v1202_v40 }
 0x324   : > { %v1198_v45 = vsel %vm1195_vm6, %v1197_v42, %v1194_v38  ;;  %v1204_v46 = vmul.f32 %v1203_v43, %v1196_v37 }
 0x325   : > { %v1205_v48 = vmul.f32 0.5, %v1198_v45  ;;  %v1208_v52 = vmul.f32 0.99, %v1198_v45 }
 0x327   : > { %v1206_v50 = vsub.f32 %v2020_v2, %v1205_v48 }
 0x329   : > { %v1207_v51 = vadd.f32 %v1206_v50, %v1204_v46 }
 0x32b   : > { %v1209_v54 = vmul.f32 0.002, %v1207_v51  ;;  %vm1211_vm7 = vcmp.ge.f32.partialorder %v1207_v51, 30.0 }
 0x32c   : > { %v1212_v55 = vsel %vm1211_vm7, -65.0, %v1207_v51  ;;  %v1462_v3 = vsel %vm1211_vm7, 1.0, %v1759_v17 }
 0x32d   : > { %v1210_v56 = vadd.f32 %v1209_v54, %v1208_v52  ;;  %v1218_v57 = vmul.f32 0.02, %v1212_v55  ;;  %v1217_v5 = vadd.f32 %v1462_v3, %v1201_v63 }
 0x32f   : > { %v1213_v60 = vadd.f32 8.0, %v1210_v56  ;;  %v1219_v61 = vadd.f32 3.5, %v1218_v57 }
 0x331   : > { %v1214_v62 = vsel %vm1211_vm7, %v1213_v60, %v1210_v56  ;;  %v1220_v0 = vmul.f32 %v1219_v61, %v1212_v55 }
 0x332   : > { %v1221_v1 = vmul.f32 0.5, %v1214_v62 }
 0x334   : > { %v1222_v4 = vsub.f32 %v2020_v2, %v1221_v1 }
 0x336   : > { %v1223_v6 = vadd.f32 %v1222_v4, %v1220_v0 }
 0x338   : > { %vm1224_vm8 = vcmp.ge.f32.partialorder %v1223_v6, 30.0 }
 0x339   : > { %v1463_v7 = vsel %vm1224_vm8, 1.0, %v1759_v17 }
 0x33a   : > { %v1227_v8 = vadd.f32 %v1463_v7, %v1217_v5 }
 0x33c   : > { %v1228_v9 = vmul.f32 0.02, %v1227_v8 }
 0x33e   : > { %1229 = vst [vmem:[%s266_s12] sm:$0xff] %v1228_v9 }
 0x33f   : > { %1687 = shalt.err (!%p1684_p8)
}
 0x340   : > { %s1688_s24 = scalar_lea.hbm %s2174_s6, 128  ;;  %s1692_s25 = scalar_lea.hbm %s2221_s3, 256 }
 0x341   : > { %p1689_p4 = scmp.ne.s32.totalorder %s2174_s6, %s1688_s24  ;;  %p1693_p9 = scmp.lt.u32.totalorder %s2174_s6, %s2221_s3 }
 0x342   : > { %p1694_p13 = scmp.lt.u32.totalorder %s1692_s25, %s1688_s24  ;;  %p1696_p2 = scmp.lt.u32.totalorder %s1688_s24, %s2174_s6 }
 0x343   : > { %p1690_p10 = pnand %p1689_p4, %p2239_p12 }
 0x344   : > { %p1695_p6 = por %p1694_p13, %p1693_p9 }
 0x345   : > { %p1691_p7 = pneg %p1690_p10 }
 0x346   : > { %p1697_p0 = por %p1696_p2, %p1695_p6 }
 0x348   : > { %p1698_p3 = pnand %p1697_p0, %p1691_p7 }
 0x34a   : > { %1701 = shalt.err (!%p1698_p3)
}
 0x34b   : > { %1480 = dma.vmem_to_hbm [thread:$0]  (%p2239_p12), %s2176_s13, 128, %s2174_s6, %s1231_s7  }
 0x34c PF: > { %s1274_s30 = sand.u32 1, %s1740_s15   ;;  %p2240_p1 = scmp.ne.s32.totalorder %s2231_s5, 0 }
 0x34d   : > { %p2241_p5 = scmp.ge.s32.totalorder %s1752_s18, 2  ;;  %s1275_s10 = scalar_lea.sflag [#allocation4], %s1274_s30 }
 0x34f   : > { %p1496_p11 = pnand %p2241_p5, %p2240_p1 }
 0x351   : > { %1731 = dma.done.wait (!%p1496_p11), %s1275_s10, 128  }
 0x352   : > { %1733 = vsyncadd (!%p1496_p11), %s1275_s10, 4294967168  ;;  %s1284_s12 = scalar_lea.sflag [#allocation10], %s1274_s30 }
 0x353   : > { %1735 = dma.done.wait (!%p1496_p11), %s1284_s12, 128  }
 0x354   : > { %1737 = vsyncadd (!%p1496_p11), %s1284_s12, 4294967168  ;;  %p22_p12 = scmp.ge.s32.totalorder %s1808_s19, 4   ;;  %s2242_s15 = smov %s1744_s16 }
 0x355   : > { %s2243_s16 = smov %s1748_s17  ;;  %s2244_s17 = smov %s1819_s22 }
 0x356   : > { %s2245_s18 = smov %s1808_s19  ;;  %24 = sbr.rel (!%p22_p12) target bundleno = 8 (0x8), region = 109 }
 0x35d   :  { %1289 = vsyncpa [#allocation3], 1 }
 0x35e   :  { %1291 = vsyncpa [#allocation3 + $0x1], 1 }
 0x35f   :  { %1292 = vsyncpa [#allocation6], 1 }
 0x360   :  { %1293 = vsyncpa [#allocation4], 1 }
 0x361   :  { %1295 = vsyncpa [#allocation4 + $0x1], 1 }
 0x362   :  { %1296 = vsyncpa [#allocation10], 1 }
 0x363   :  { %1298 = vsyncpa [#allocation10 + $0x1], 1 }

</bundles_post_ra>
